<compile_context>
chip_gen: v5e
topology: v5e:2x2
jax: 0.10.0
libtpu: 0.0.40
codegen_flags: <defaults>
</compile_context>

<pallas_src>
import math

import jax
import jax.numpy as jnp
from jax.experimental import pallas as pl
from jax.experimental.pallas import tpu as pltpu


CP = 128  # channel padding (lane width) for all conv operands


# ---------------------------------------------------------------------------
# Fused conv (+ bias [+ residual] [+ LeakyReLU]) kernel
# ---------------------------------------------------------------------------
def _make_conv_kernel(kh, kw, wp, oh, cout_p, apply_leaky, fuse_residual):
    """Kernel over one batch element.

    x_ref : [1, Lp, Cin_p]   flattened spatially-padded image rows
    w_ref : [KH*KW, Cin_p, Cout_p]
    b_ref : [1, Cout_p]
    r_ref : [1, M_out, Cout_p]   (only if fuse_residual)
    o_ref : [1, M_out, Cout_p]   with M_out = OH * Wp (garbage cols sliced
                                  off by the wrapper)
    """
    m_out = oh * wp
    taps = [(di, dj) for di in range(kh) for dj in range(kw)]

    def kernel(x_ref, w_ref, b_ref, *rest):
        if fuse_residual:
            r_ref, o_ref = rest
        else:
            (o_ref,) = rest

        acc = jnp.zeros((m_out, cout_p), jnp.float32)
        for t, (di, dj) in enumerate(taps):
            shift = di * wp + dj                      # static row shift
            xs = x_ref[0, pl.ds(shift, m_out), :]     # [M_out, Cin_p]
            acc = acc + jnp.dot(xs, w_ref[t],
                                preferred_element_type=jnp.float32)
        acc = acc + b_ref[...]
        if fuse_residual:
            acc = acc + r_ref[0]
        if apply_leaky:
            acc = jnp.where(acc >= 0, acc, jnp.float32(0.01) * acc)
        o_ref[0] = acc.astype(o_ref.dtype)

    return kernel


def _conv2d_same(x, w_taps, b, *, kh, kw, pad, apply_leaky, residual=None):
    """Stride-1 conv on channel-padded NHWC input.

    x       : [N, H, W, CP]
    w_taps  : [KH*KW, CP, CP]
    b       : [1, CP]
    residual: optional [N, H, W, CP]  (only valid for 1x1, pad=0)
    returns : [N, OH, OW, CP]
    """
    n, h, w, cp = x.shape
    t = kh * kw
    oh = h + 2 * pad - kh + 1
    ow = w + 2 * pad - kw + 1
    hp, wp = h + 2 * pad, w + 2 * pad
    m_out = oh * wp

    # Spatial zero-pad, flatten rows, then add kw-1 extra zero rows so every
    # shifted window slice stays in-bounds.
    xp = jnp.pad(x, ((0, 0), (pad, pad), (pad, pad), (0, 0))) if pad else x
    x_flat = xp.reshape(n, hp * wp, cp)
    extra = kw - 1
    if extra:
        x_flat = jnp.pad(x_flat, ((0, 0), (0, extra), (0, 0)))
    lp = hp * wp + extra

    fuse_residual = residual is not None
    if fuse_residual:
        assert kh == 1 and kw == 1 and pad == 0
        r_flat = residual.reshape(n, m_out, cp)

    kernel = _make_conv_kernel(kh, kw, wp, oh, cp, apply_leaky, fuse_residual)

    in_specs = [
        pl.BlockSpec((1, lp, cp), lambda i: (i, 0, 0)),
        pl.BlockSpec((t, cp, cp), lambda i: (0, 0, 0)),
        pl.BlockSpec((1, cp), lambda i: (0, 0)),
    ]
    inputs = [x_flat, w_taps, b]
    if fuse_residual:
        in_specs.append(pl.BlockSpec((1, m_out, cp), lambda i: (i, 0, 0)))
        inputs.append(r_flat)

    flops = 2 * n * m_out * cp * cp * t
    bytes_accessed = 4 * (x_flat.size + w_taps.size + b.size
                          + n * m_out * cp
                          + (n * m_out * cp if fuse_residual else 0))

    out_flat = pl.pallas_call(
        kernel,
        out_shape=jax.ShapeDtypeStruct((n, m_out, cp), jnp.float32),
        grid_spec=pl.GridSpec(
            grid=(n,),
            in_specs=in_specs,
            out_specs=pl.BlockSpec((1, m_out, cp), lambda i: (i, 0, 0)),
        ),
        compiler_params=pltpu.CompilerParams(
            dimension_semantics=("parallel",)),
        cost_estimate=pl.CostEstimate(flops=flops, transcendentals=0,
                                      bytes_accessed=bytes_accessed),
    )(*inputs)

    out = out_flat.reshape(n, oh, wp, cp)
    if wp != ow:
        out = out[:, :, :ow, :]      # drop garbage columns from the flat trick
    return out


# ---------------------------------------------------------------------------
# Parameter prep (PyTorch conv layout -> lane-padded tap matrices)
# ---------------------------------------------------------------------------
def _prep_weight(weight, bias, cp=CP):
    """weight: [OC, IC, KH, KW] (PyTorch), bias: [OC]."""
    oc, ic, kh, kw = weight.shape
    w_taps = jnp.transpose(weight, (2, 3, 1, 0)).reshape(kh * kw, ic, oc)
    w_taps = jnp.pad(w_taps, ((0, 0), (0, cp - ic), (0, cp - oc)))
    b = jnp.pad(bias, (0, cp - oc)).reshape(1, cp)
    return w_taps, b


def _pad_channels(x, cp=CP):
    c = x.shape[-1]
    if c == cp:
        return x
    return jnp.pad(x, ((0, 0),) * (x.ndim - 1) + ((0, cp - c),))


# ---------------------------------------------------------------------------
# ResBlockCC forward (add_bn=False)
# ---------------------------------------------------------------------------
@jax.jit
def resblockcc_forward(x_nchw, params):
    """x_nchw: [N, C_in, H, W]  ->  [N, C_out, H, W]"""
    out_channels = params["layer"][0].shape[0]

    x = jnp.transpose(x_nchw, (0, 2, 3, 1)).astype(jnp.float32)   # NHWC
    x = _pad_channels(x)                                          # [N,H,W,CP]

    # ResBlockCC.layer: ConvLeaky(C_in, C_out, 3, padding=1)
    w0, b0 = _prep_weight(*params["layer"])
    y = _conv2d_same(x, w0, b0, kh=3, kw=3, pad=1, apply_leaky=True)

    # ResBlockCC.block: num_units x ResUnit(add_bn=False)
    for unit in params["units"]:
        w1, b1 = _prep_weight(*unit["layer1"])
        w2, b2 = _prep_weight(*unit["layer2"])
        w3, b3 = _prep_weight(*unit["layer3"])
        h = _conv2d_same(y, w1, b1, kh=1, kw=1, pad=0, apply_leaky=True)
        h = _conv2d_same(h, w2, b2, kh=3, kw=3, pad=1, apply_leaky=True)
        # layer3 (no act) + residual add + LeakyReLU fused in one kernel
        y = _conv2d_same(h, w3, b3, kh=1, kw=1, pad=0,
                         apply_leaky=True, residual=y)

    out = jnp.transpose(y[..., :out_channels], (0, 3, 1, 2))      # NCHW
    return out


# ---------------------------------------------------------------------------
# Pure-JAX reference
# ---------------------------------------------------------------------------
def _conv_ref(x, w, b, pad):
    out = jax.lax.conv_general_dilated(
        x, w, window_strides=(1, 1),
        padding=[(pad, pad), (pad, pad)],
        dimension_numbers=("NCHW", "OIHW", "NCHW"))
    return out + b.reshape(1, -1, 1, 1)


def _leaky(x):
    return jnp.where(x >= 0, x, 0.01 * x)


def resblockcc_ref(x, params):
    w0, b0 = params["layer"]
    y = _leaky(_conv_ref(x, w0, b0, 1))
    for unit in params["units"]:
        w1, b1 = unit["layer1"]
        w2, b2 = unit["layer2"]
        w3, b3 = unit["layer3"]
        h = _leaky(_conv_ref(y, w1, b1, 0))
        h = _leaky(_conv_ref(h, w2, b2, 1))
        y = _leaky(y + _conv_ref(h, w3, b3, 0))
    return y


# ---------------------------------------------------------------------------
# Demo / correctness check
# ---------------------------------------------------------------------------
def _init_conv(key, oc, ic, kh, kw):
    kw_, kb = jax.random.split(key)
    fan_in = ic * kh * kw
    bound = 1.0 / math.sqrt(fan_in)
    weight = jax.random.uniform(kw_, (oc, ic, kh, kw),
                                minval=-bound, maxval=bound, dtype=jnp.float32)
    bias = jax.random.uniform(kb, (oc,), minval=-bound, maxval=bound,
                              dtype=jnp.float32)
    return weight, bias


if __name__ == "__main__":
    # ResBlockCC(in_channels=4, out_channels=8, num_units=2, add_bn=False)
    N, C_in, H, W = 2, 4, 16, 16
    C_out, num_units = 8, 2
    c_half = math.ceil(C_out / 2)

    key = jax.random.PRNGKey(0)
    keys = jax.random.split(key, 2 + 3 * num_units)

    x = jax.random.normal(keys[0], (N, C_in, H, W), dtype=jnp.float32)

    params = {"layer": _init_conv(keys[1], C_out, C_in, 3, 3), "units": []}
    for u in range(num_units):
        k1, k2, k3 = keys[2 + 3 * u], keys[3 + 3 * u], keys[4 + 3 * u]
        params["units"].append({
            "layer1": _init_conv(k1, c_half, C_out, 1, 1),
            "layer2": _init_conv(k2, c_half, c_half, 3, 3),
            "layer3": _init_conv(k3, C_out, c_half, 1, 1),
        })

    out = resblockcc_forward(x, params)
    out = jax.block_until_ready(out)

    ref = resblockcc_ref(x, params)
    assert out.shape == (N, C_out, H, W), out.shape
    assert jnp.allclose(out, ref, atol=1e-3, rtol=1e-3), float(
        jnp.max(jnp.abs(out - ref)))

    print("KERNEL_OK")
</pallas_src>

<mosaic_0001>
module attributes {stable_mosaic.version = 11 : i64} {
  func.func @kernel(%arg0: i32, %arg1: memref<1x326x128xf32, #tpu.memory_space<vmem>>, %arg2: memref<9x128x128xf32, #tpu.memory_space<vmem>>, %arg3: memref<1x128xf32, #tpu.memory_space<vmem>>, %arg4: memref<1x288x128xf32, #tpu.memory_space<vmem>>) attributes {dimension_semantics = [#tpu.dimension_semantics<parallel>], iteration_bounds = array<i64: 2>, scalar_prefetch = 0 : i64, scratch_operands = 0 : i64, tpu.core_type = #tpu.core_type<tc>, window_params = [{transform_indices = @transform_0, window_bounds = array<i64: 1, 326, 128>}, {pipeline_mode = #tpu.pipeline_mode<synchronous>, transform_indices = @transform_1, window_bounds = array<i64: 9, 128, 128>}, {pipeline_mode = #tpu.pipeline_mode<synchronous>, transform_indices = @transform_2, window_bounds = array<i64: 1, 128>}, {transform_indices = @transform_3, window_bounds = array<i64: 1, 288, 128>}]} {
    %cst = arith.constant 0.000000e+00 : f32
    %0 = vector.broadcast %cst : f32 to vector<288x128xf32>
    %c0 = arith.constant 0 : index
    %c0_0 = arith.constant 0 : index
    %c0_1 = arith.constant 0 : index
    %1 = vector.load %arg1[%c0, %c0_0, %c0_1] : memref<1x326x128xf32, #tpu.memory_space<vmem>>, vector<1x288x128xf32>
    %2 = vector.shape_cast %1 : vector<1x288x128xf32> to vector<288x128xf32>
    %c0_2 = arith.constant 0 : index
    %c0_3 = arith.constant 0 : index
    %c0_4 = arith.constant 0 : index
    %3 = vector.load %arg2[%c0_2, %c0_3, %c0_4] : memref<9x128x128xf32, #tpu.memory_space<vmem>>, vector<1x128x128xf32>
    %4 = vector.shape_cast %3 : vector<1x128x128xf32> to vector<128x128xf32>
    %cst_5 = arith.constant dense<0.000000e+00> : vector<288x128xf32>
    %5 = tpu.matmul %2, %4, %cst_5 {dimension_numbers = #tpu.dot_dimension_numbers<[1], [0], [0], [1], [0, 0, 1, 1], [], []>} : vector<288x128xf32>, vector<128x128xf32>, vector<288x128xf32> -> vector<288x128xf32>
    %6 = arith.addf %0, %5 : vector<288x128xf32>
    %c0_6 = arith.constant 0 : index
    %c1 = arith.constant 1 : index
    %c0_7 = arith.constant 0 : index
    %7 = vector.load %arg1[%c0_6, %c1, %c0_7] : memref<1x326x128xf32, #tpu.memory_space<vmem>>, vector<1x288x128xf32>
    %8 = vector.shape_cast %7 : vector<1x288x128xf32> to vector<288x128xf32>
    %c1_8 = arith.constant 1 : index
    %c0_9 = arith.constant 0 : index
    %c0_10 = arith.constant 0 : index
    %9 = vector.load %arg2[%c1_8, %c0_9, %c0_10] : memref<9x128x128xf32, #tpu.memory_space<vmem>>, vector<1x128x128xf32>
    %10 = vector.shape_cast %9 : vector<1x128x128xf32> to vector<128x128xf32>
    %cst_11 = arith.constant dense<0.000000e+00> : vector<288x128xf32>
    %11 = tpu.matmul %8, %10, %cst_11 {dimension_numbers = #tpu.dot_dimension_numbers<[1], [0], [0], [1], [0, 0, 1, 1], [], []>} : vector<288x128xf32>, vector<128x128xf32>, vector<288x128xf32> -> vector<288x128xf32>
    %12 = arith.addf %6, %11 : vector<288x128xf32>
    %c0_12 = arith.constant 0 : index
    %c2 = arith.constant 2 : index
    %c0_13 = arith.constant 0 : index
    %13 = vector.load %arg1[%c0_12, %c2, %c0_13] : memref<1x326x128xf32, #tpu.memory_space<vmem>>, vector<1x288x128xf32>
    %14 = vector.shape_cast %13 : vector<1x288x128xf32> to vector<288x128xf32>
    %c2_14 = arith.constant 2 : index
    %c0_15 = arith.constant 0 : index
    %c0_16 = arith.constant 0 : index
    %15 = vector.load %arg2[%c2_14, %c0_15, %c0_16] : memref<9x128x128xf32, #tpu.memory_space<vmem>>, vector<1x128x128xf32>
    %16 = vector.shape_cast %15 : vector<1x128x128xf32> to vector<128x128xf32>
    %cst_17 = arith.constant dense<0.000000e+00> : vector<288x128xf32>
    %17 = tpu.matmul %14, %16, %cst_17 {dimension_numbers = #tpu.dot_dimension_numbers<[1], [0], [0], [1], [0, 0, 1, 1], [], []>} : vector<288x128xf32>, vector<128x128xf32>, vector<288x128xf32> -> vector<288x128xf32>
    %18 = arith.addf %12, %17 : vector<288x128xf32>
    %c0_18 = arith.constant 0 : index
    %c18 = arith.constant 18 : index
    %c0_19 = arith.constant 0 : index
    %19 = vector.load %arg1[%c0_18, %c18, %c0_19] : memref<1x326x128xf32, #tpu.memory_space<vmem>>, vector<1x288x128xf32>
    %20 = vector.shape_cast %19 : vector<1x288x128xf32> to vector<288x128xf32>
    %c3 = arith.constant 3 : index
    %c0_20 = arith.constant 0 : index
    %c0_21 = arith.constant 0 : index
    %21 = vector.load %arg2[%c3, %c0_20, %c0_21] : memref<9x128x128xf32, #tpu.memory_space<vmem>>, vector<1x128x128xf32>
    %22 = vector.shape_cast %21 : vector<1x128x128xf32> to vector<128x128xf32>
    %cst_22 = arith.constant dense<0.000000e+00> : vector<288x128xf32>
    %23 = tpu.matmul %20, %22, %cst_22 {dimension_numbers = #tpu.dot_dimension_numbers<[1], [0], [0], [1], [0, 0, 1, 1], [], []>} : vector<288x128xf32>, vector<128x128xf32>, vector<288x128xf32> -> vector<288x128xf32>
    %24 = arith.addf %18, %23 : vector<288x128xf32>
    %c0_23 = arith.constant 0 : index
    %c19 = arith.constant 19 : index
    %c0_24 = arith.constant 0 : index
    %25 = vector.load %arg1[%c0_23, %c19, %c0_24] : memref<1x326x128xf32, #tpu.memory_space<vmem>>, vector<1x288x128xf32>
    %26 = vector.shape_cast %25 : vector<1x288x128xf32> to vector<288x128xf32>
    %c4 = arith.constant 4 : index
    %c0_25 = arith.constant 0 : index
    %c0_26 = arith.constant 0 : index
    %27 = vector.load %arg2[%c4, %c0_25, %c0_26] : memref<9x128x128xf32, #tpu.memory_space<vmem>>, vector<1x128x128xf32>
    %28 = vector.shape_cast %27 : vector<1x128x128xf32> to vector<128x128xf32>
    %cst_27 = arith.constant dense<0.000000e+00> : vector<288x128xf32>
    %29 = tpu.matmul %26, %28, %cst_27 {dimension_numbers = #tpu.dot_dimension_numbers<[1], [0], [0], [1], [0, 0, 1, 1], [], []>} : vector<288x128xf32>, vector<128x128xf32>, vector<288x128xf32> -> vector<288x128xf32>
    %30 = arith.addf %24, %29 : vector<288x128xf32>
    %c0_28 = arith.constant 0 : index
    %c20 = arith.constant 20 : index
    %c0_29 = arith.constant 0 : index
    %31 = vector.load %arg1[%c0_28, %c20, %c0_29] : memref<1x326x128xf32, #tpu.memory_space<vmem>>, vector<1x288x128xf32>
    %32 = vector.shape_cast %31 : vector<1x288x128xf32> to vector<288x128xf32>
    %c5 = arith.constant 5 : index
    %c0_30 = arith.constant 0 : index
    %c0_31 = arith.constant 0 : index
    %33 = vector.load %arg2[%c5, %c0_30, %c0_31] : memref<9x128x128xf32, #tpu.memory_space<vmem>>, vector<1x128x128xf32>
    %34 = vector.shape_cast %33 : vector<1x128x128xf32> to vector<128x128xf32>
    %cst_32 = arith.constant dense<0.000000e+00> : vector<288x128xf32>
    %35 = tpu.matmul %32, %34, %cst_32 {dimension_numbers = #tpu.dot_dimension_numbers<[1], [0], [0], [1], [0, 0, 1, 1], [], []>} : vector<288x128xf32>, vector<128x128xf32>, vector<288x128xf32> -> vector<288x128xf32>
    %36 = arith.addf %30, %35 : vector<288x128xf32>
    %c0_33 = arith.constant 0 : index
    %c36 = arith.constant 36 : index
    %c0_34 = arith.constant 0 : index
    %37 = vector.load %arg1[%c0_33, %c36, %c0_34] : memref<1x326x128xf32, #tpu.memory_space<vmem>>, vector<1x288x128xf32>
    %38 = vector.shape_cast %37 : vector<1x288x128xf32> to vector<288x128xf32>
    %c6 = arith.constant 6 : index
    %c0_35 = arith.constant 0 : index
    %c0_36 = arith.constant 0 : index
    %39 = vector.load %arg2[%c6, %c0_35, %c0_36] : memref<9x128x128xf32, #tpu.memory_space<vmem>>, vector<1x128x128xf32>
    %40 = vector.shape_cast %39 : vector<1x128x128xf32> to vector<128x128xf32>
    %cst_37 = arith.constant dense<0.000000e+00> : vector<288x128xf32>
    %41 = tpu.matmul %38, %40, %cst_37 {dimension_numbers = #tpu.dot_dimension_numbers<[1], [0], [0], [1], [0, 0, 1, 1], [], []>} : vector<288x128xf32>, vector<128x128xf32>, vector<288x128xf32> -> vector<288x128xf32>
    %42 = arith.addf %36, %41 : vector<288x128xf32>
    %c0_38 = arith.constant 0 : index
    %c37 = arith.constant 37 : index
    %c0_39 = arith.constant 0 : index
    %43 = vector.load %arg1[%c0_38, %c37, %c0_39] : memref<1x326x128xf32, #tpu.memory_space<vmem>>, vector<1x288x128xf32>
    %44 = vector.shape_cast %43 : vector<1x288x128xf32> to vector<288x128xf32>
    %c7 = arith.constant 7 : index
    %c0_40 = arith.constant 0 : index
    %c0_41 = arith.constant 0 : index
    %45 = vector.load %arg2[%c7, %c0_40, %c0_41] : memref<9x128x128xf32, #tpu.memory_space<vmem>>, vector<1x128x128xf32>
    %46 = vector.shape_cast %45 : vector<1x128x128xf32> to vector<128x128xf32>
    %cst_42 = arith.constant dense<0.000000e+00> : vector<288x128xf32>
    %47 = tpu.matmul %44, %46, %cst_42 {dimension_numbers = #tpu.dot_dimension_numbers<[1], [0], [0], [1], [0, 0, 1, 1], [], []>} : vector<288x128xf32>, vector<128x128xf32>, vector<288x128xf32> -> vector<288x128xf32>
    %48 = arith.addf %42, %47 : vector<288x128xf32>
    %c0_43 = arith.constant 0 : index
    %c38 = arith.constant 38 : index
    %c0_44 = arith.constant 0 : index
    %49 = vector.load %arg1[%c0_43, %c38, %c0_44] : memref<1x326x128xf32, #tpu.memory_space<vmem>>, vector<1x288x128xf32>
    %50 = vector.shape_cast %49 : vector<1x288x128xf32> to vector<288x128xf32>
    %c8 = arith.constant 8 : index
    %c0_45 = arith.constant 0 : index
    %c0_46 = arith.constant 0 : index
    %51 = vector.load %arg2[%c8, %c0_45, %c0_46] : memref<9x128x128xf32, #tpu.memory_space<vmem>>, vector<1x128x128xf32>
    %52 = vector.shape_cast %51 : vector<1x128x128xf32> to vector<128x128xf32>
    %cst_47 = arith.constant dense<0.000000e+00> : vector<288x128xf32>
    %53 = tpu.matmul %50, %52, %cst_47 {dimension_numbers = #tpu.dot_dimension_numbers<[1], [0], [0], [1], [0, 0, 1, 1], [], []>} : vector<288x128xf32>, vector<128x128xf32>, vector<288x128xf32> -> vector<288x128xf32>
    %54 = arith.addf %48, %53 : vector<288x128xf32>
    %c0_48 = arith.constant 0 : index
    %c0_49 = arith.constant 0 : index
    %55 = vector.load %arg3[%c0_48, %c0_49] : memref<1x128xf32, #tpu.memory_space<vmem>>, vector<1x128xf32>
    %56 = vector.broadcast %55 : vector<1x128xf32> to vector<288x128xf32>
    %57 = arith.addf %54, %56 : vector<288x128xf32>
    %cst_50 = arith.constant 0.000000e+00 : f32
    %58 = vector.broadcast %cst_50 : f32 to vector<288x128xf32>
    %59 = arith.cmpf oge, %57, %58 : vector<288x128xf32>
    %cst_51 = arith.constant 0.00999999977 : f32
    %60 = vector.broadcast %cst_51 : f32 to vector<288x128xf32>
    %61 = arith.mulf %60, %57 : vector<288x128xf32>
    %62 = arith.select %59, %57, %61 : vector<288x128xi1>, vector<288x128xf32>
    %c0_52 = arith.constant 0 : index
    %c0_53 = arith.constant 0 : index
    %c0_54 = arith.constant 0 : index
    %63 = vector.load %arg4[%c0_52, %c0_53, %c0_54] : memref<1x288x128xf32, #tpu.memory_space<vmem>>, vector<1x288x128xf32>
    %64 = vector.shape_cast %63 : vector<1x288x128xf32> to vector<288x128xf32>
    %65 = vector.shape_cast %62 : vector<288x128xf32> to vector<1x288x128xf32>
    tpu.vector_store %arg4[%c0_52, %c0_53, %c0_54], %65 {strides = array<i32>} : memref<1x288x128xf32, #tpu.memory_space<vmem>>, vector<1x288x128xf32>,
    return
  }
  func.func @transform_0(%arg0: i32) -> (i32, i32, i32) {
    %c0_i32 = arith.constant 0 : i32
    %c0_i32_0 = arith.constant 0 : i32
    %c0_i32_1 = arith.constant 0 : i32
    return %arg0, %c0_i32, %c0_i32_0 : i32, i32, i32
  }
  func.func @transform_1(%arg0: i32) -> (i32, i32, i32) {
    %c0_i32 = arith.constant 0 : i32
    %c0_i32_0 = arith.constant 0 : i32
    %c0_i32_1 = arith.constant 0 : i32
    %c0_i32_2 = arith.constant 0 : i32
    return %c0_i32, %c0_i32_0, %c0_i32_1 : i32, i32, i32
  }
  func.func @transform_2(%arg0: i32) -> (i32, i32) {
    %c0_i32 = arith.constant 0 : i32
    %c0_i32_0 = arith.constant 0 : i32
    %c0_i32_1 = arith.constant 0 : i32
    return %c0_i32, %c0_i32_0 : i32, i32
  }
  func.func @transform_3(%arg0: i32) -> (i32, i32, i32) {
    %c0_i32 = arith.constant 0 : i32
    %c0_i32_0 = arith.constant 0 : i32
    %c0_i32_1 = arith.constant 0 : i32
    return %arg0, %c0_i32, %c0_i32_0 : i32, i32, i32
  }
}

module attributes {stable_mosaic.version = 11 : i64} {
  func.func @kernel(%arg0: i32, %arg1: memref<1x256x128xf32, #tpu.memory_space<vmem>>, %arg2: memref<1x128x128xf32, #tpu.memory_space<vmem>>, %arg3: memref<1x128xf32, #tpu.memory_space<vmem>>, %arg4: memref<1x256x128xf32, #tpu.memory_space<vmem>>) attributes {dimension_semantics = [#tpu.dimension_semantics<parallel>], iteration_bounds = array<i64: 2>, scalar_prefetch = 0 : i64, scratch_operands = 0 : i64, tpu.core_type = #tpu.core_type<tc>, window_params = [{transform_indices = @transform_0, window_bounds = array<i64: 1, 256, 128>}, {pipeline_mode = #tpu.pipeline_mode<synchronous>, transform_indices = @transform_1, window_bounds = array<i64: 1, 128, 128>}, {pipeline_mode = #tpu.pipeline_mode<synchronous>, transform_indices = @transform_2, window_bounds = array<i64: 1, 128>}, {transform_indices = @transform_3, window_bounds = array<i64: 1, 256, 128>}]} {
    %cst = arith.constant 0.000000e+00 : f32
    %0 = vector.broadcast %cst : f32 to vector<256x128xf32>
    %c0 = arith.constant 0 : index
    %c0_0 = arith.constant 0 : index
    %c0_1 = arith.constant 0 : index
    %1 = vector.load %arg1[%c0, %c0_0, %c0_1] : memref<1x256x128xf32, #tpu.memory_space<vmem>>, vector<1x256x128xf32>
    %2 = vector.shape_cast %1 : vector<1x256x128xf32> to vector<256x128xf32>
    %c0_2 = arith.constant 0 : index
    %c0_3 = arith.constant 0 : index
    %c0_4 = arith.constant 0 : index
    %3 = vector.load %arg2[%c0_2, %c0_3, %c0_4] : memref<1x128x128xf32, #tpu.memory_space<vmem>>, vector<1x128x128xf32>
    %4 = vector.shape_cast %3 : vector<1x128x128xf32> to vector<128x128xf32>
    %cst_5 = arith.constant dense<0.000000e+00> : vector<256x128xf32>
    %5 = tpu.matmul %2, %4, %cst_5 {dimension_numbers = #tpu.dot_dimension_numbers<[1], [0], [0], [1], [0, 0, 1, 1], [], []>} : vector<256x128xf32>, vector<128x128xf32>, vector<256x128xf32> -> vector<256x128xf32>
    %6 = arith.addf %0, %5 : vector<256x128xf32>
    %c0_6 = arith.constant 0 : index
    %c0_7 = arith.constant 0 : index
    %7 = vector.load %arg3[%c0_6, %c0_7] : memref<1x128xf32, #tpu.memory_space<vmem>>, vector<1x128xf32>
    %8 = vector.broadcast %7 : vector<1x128xf32> to vector<256x128xf32>
    %9 = arith.addf %6, %8 : vector<256x128xf32>
    %cst_8 = arith.constant 0.000000e+00 : f32
    %10 = vector.broadcast %cst_8 : f32 to vector<256x128xf32>
    %11 = arith.cmpf oge, %9, %10 : vector<256x128xf32>
    %cst_9 = arith.constant 0.00999999977 : f32
    %12 = vector.broadcast %cst_9 : f32 to vector<256x128xf32>
    %13 = arith.mulf %12, %9 : vector<256x128xf32>
    %14 = arith.select %11, %9, %13 : vector<256x128xi1>, vector<256x128xf32>
    %c0_10 = arith.constant 0 : index
    %c0_11 = arith.constant 0 : index
    %c0_12 = arith.constant 0 : index
    %15 = vector.load %arg4[%c0_10, %c0_11, %c0_12] : memref<1x256x128xf32, #tpu.memory_space<vmem>>, vector<1x256x128xf32>
    %16 = vector.shape_cast %15 : vector<1x256x128xf32> to vector<256x128xf32>
    %17 = vector.shape_cast %14 : vector<256x128xf32> to vector<1x256x128xf32>
    tpu.vector_store %arg4[%c0_10, %c0_11, %c0_12], %17 {strides = array<i32>} : memref<1x256x128xf32, #tpu.memory_space<vmem>>, vector<1x256x128xf32>,
    return
  }
  func.func @transform_0(%arg0: i32) -> (i32, i32, i32) {
    %c0_i32 = arith.constant 0 : i32
    %c0_i32_0 = arith.constant 0 : i32
    %c0_i32_1 = arith.constant 0 : i32
    return %arg0, %c0_i32, %c0_i32_0 : i32, i32, i32
  }
  func.func @transform_1(%arg0: i32) -> (i32, i32, i32) {
    %c0_i32 = arith.constant 0 : i32
    %c0_i32_0 = arith.constant 0 : i32
    %c0_i32_1 = arith.constant 0 : i32
    %c0_i32_2 = arith.constant 0 : i32
    return %c0_i32, %c0_i32_0, %c0_i32_1 : i32, i32, i32
  }
  func.func @transform_2(%arg0: i32) -> (i32, i32) {
    %c0_i32 = arith.constant 0 : i32
    %c0_i32_0 = arith.constant 0 : i32
    %c0_i32_1 = arith.constant 0 : i32
    return %c0_i32, %c0_i32_0 : i32, i32
  }
  func.func @transform_3(%arg0: i32) -> (i32, i32, i32) {
    %c0_i32 = arith.constant 0 : i32
    %c0_i32_0 = arith.constant 0 : i32
    %c0_i32_1 = arith.constant 0 : i32
    return %arg0, %c0_i32, %c0_i32_0 : i32, i32, i32
  }
}

module attributes {stable_mosaic.version = 11 : i64} {
  func.func @kernel(%arg0: i32, %arg1: memref<1x256x128xf32, #tpu.memory_space<vmem>>, %arg2: memref<1x128x128xf32, #tpu.memory_space<vmem>>, %arg3: memref<1x128xf32, #tpu.memory_space<vmem>>, %arg4: memref<1x256x128xf32, #tpu.memory_space<vmem>>, %arg5: memref<1x256x128xf32, #tpu.memory_space<vmem>>) attributes {dimension_semantics = [#tpu.dimension_semantics<parallel>], iteration_bounds = array<i64: 2>, scalar_prefetch = 0 : i64, scratch_operands = 0 : i64, tpu.core_type = #tpu.core_type<tc>, window_params = [{transform_indices = @transform_0, window_bounds = array<i64: 1, 256, 128>}, {pipeline_mode = #tpu.pipeline_mode<synchronous>, transform_indices = @transform_1, window_bounds = array<i64: 1, 128, 128>}, {pipeline_mode = #tpu.pipeline_mode<synchronous>, transform_indices = @transform_2, window_bounds = array<i64: 1, 128>}, {transform_indices = @transform_3, window_bounds = array<i64: 1, 256, 128>}, {transform_indices = @transform_4, window_bounds = array<i64: 1, 256, 128>}]} {
    %cst = arith.constant 0.000000e+00 : f32
    %0 = vector.broadcast %cst : f32 to vector<256x128xf32>
    %c0 = arith.constant 0 : index
    %c0_0 = arith.constant 0 : index
    %c0_1 = arith.constant 0 : index
    %1 = vector.load %arg1[%c0, %c0_0, %c0_1] : memref<1x256x128xf32, #tpu.memory_space<vmem>>, vector<1x256x128xf32>
    %2 = vector.shape_cast %1 : vector<1x256x128xf32> to vector<256x128xf32>
    %c0_2 = arith.constant 0 : index
    %c0_3 = arith.constant 0 : index
    %c0_4 = arith.constant 0 : index
    %3 = vector.load %arg2[%c0_2, %c0_3, %c0_4] : memref<1x128x128xf32, #tpu.memory_space<vmem>>, vector<1x128x128xf32>
    %4 = vector.shape_cast %3 : vector<1x128x128xf32> to vector<128x128xf32>
    %cst_5 = arith.constant dense<0.000000e+00> : vector<256x128xf32>
    %5 = tpu.matmul %2, %4, %cst_5 {dimension_numbers = #tpu.dot_dimension_numbers<[1], [0], [0], [1], [0, 0, 1, 1], [], []>} : vector<256x128xf32>, vector<128x128xf32>, vector<256x128xf32> -> vector<256x128xf32>
    %6 = arith.addf %0, %5 : vector<256x128xf32>
    %c0_6 = arith.constant 0 : index
    %c0_7 = arith.constant 0 : index
    %7 = vector.load %arg3[%c0_6, %c0_7] : memref<1x128xf32, #tpu.memory_space<vmem>>, vector<1x128xf32>
    %8 = vector.broadcast %7 : vector<1x128xf32> to vector<256x128xf32>
    %9 = arith.addf %6, %8 : vector<256x128xf32>
    %c0_8 = arith.constant 0 : index
    %c0_9 = arith.constant 0 : index
    %c0_10 = arith.constant 0 : index
    %10 = vector.load %arg4[%c0_8, %c0_9, %c0_10] : memref<1x256x128xf32, #tpu.memory_space<vmem>>, vector<1x256x128xf32>
    %11 = vector.shape_cast %10 : vector<1x256x128xf32> to vector<256x128xf32>
    %12 = arith.addf %9, %11 : vector<256x128xf32>
    %cst_11 = arith.constant 0.000000e+00 : f32
    %13 = vector.broadcast %cst_11 : f32 to vector<256x128xf32>
    %14 = arith.cmpf oge, %12, %13 : vector<256x128xf32>
    %cst_12 = arith.constant 0.00999999977 : f32
    %15 = vector.broadcast %cst_12 : f32 to vector<256x128xf32>
    %16 = arith.mulf %15, %12 : vector<256x128xf32>
    %17 = arith.select %14, %12, %16 : vector<256x128xi1>, vector<256x128xf32>
    %c0_13 = arith.constant 0 : index
    %c0_14 = arith.constant 0 : index
    %c0_15 = arith.constant 0 : index
    %18 = vector.load %arg5[%c0_13, %c0_14, %c0_15] : memref<1x256x128xf32, #tpu.memory_space<vmem>>, vector<1x256x128xf32>
    %19 = vector.shape_cast %18 : vector<1x256x128xf32> to vector<256x128xf32>
    %20 = vector.shape_cast %17 : vector<256x128xf32> to vector<1x256x128xf32>
    tpu.vector_store %arg5[%c0_13, %c0_14, %c0_15], %20 {strides = array<i32>} : memref<1x256x128xf32, #tpu.memory_space<vmem>>, vector<1x256x128xf32>,
    return
  }
  func.func @transform_0(%arg0: i32) -> (i32, i32, i32) {
    %c0_i32 = arith.constant 0 : i32
    %c0_i32_0 = arith.constant 0 : i32
    %c0_i32_1 = arith.constant 0 : i32
    return %arg0, %c0_i32, %c0_i32_0 : i32, i32, i32
  }
  func.func @transform_1(%arg0: i32) -> (i32, i32, i32) {
    %c0_i32 = arith.constant 0 : i32
    %c0_i32_0 = arith.constant 0 : i32
    %c0_i32_1 = arith.constant 0 : i32
    %c0_i32_2 = arith.constant 0 : i32
    return %c0_i32, %c0_i32_0, %c0_i32_1 : i32, i32, i32
  }
  func.func @transform_2(%arg0: i32) -> (i32, i32) {
    %c0_i32 = arith.constant 0 : i32
    %c0_i32_0 = arith.constant 0 : i32
    %c0_i32_1 = arith.constant 0 : i32
    return %c0_i32, %c0_i32_0 : i32, i32
  }
  func.func @transform_3(%arg0: i32) -> (i32, i32, i32) {
    %c0_i32 = arith.constant 0 : i32
    %c0_i32_0 = arith.constant 0 : i32
    %c0_i32_1 = arith.constant 0 : i32
    return %arg0, %c0_i32, %c0_i32_0 : i32, i32, i32
  }
  func.func @transform_4(%arg0: i32) -> (i32, i32, i32) {
    %c0_i32 = arith.constant 0 : i32
    %c0_i32_0 = arith.constant 0 : i32
    %c0_i32_1 = arith.constant 0 : i32
    return %arg0, %c0_i32, %c0_i32_0 : i32, i32, i32
  }
}

</mosaic_0001>

<bundles_post_ra>
// kernel: resblockcc_forward.8
= control target key start
LH: loop header
LB: loop body
LE: loop exit
PB: predicated region body
PF: predicated region fallthrough
CT: control target
= control target key end

     0   :  { %s617_s12 = smov 0   ;;  %s798_s0 = inlined_call_operand.vmem [shape: f32[2,256,128], index: 0, kind: input, shape index: {}]   ;;  %s799_s1 = inlined_call_operand.vmem [shape: f32[1,128,128], index: 1, kind: input, shape index: {}]   ;;  %s800_s2 = inlined_call_operand.vmem [shape: f32[1,128], index: 2, kind: input, shape index: {}]   ;;  %s801_s3 = inlined_call_operand.vmem [shape: f32[2,256,128], index: 3, kind: output, shape index: {}]  }
   0x1 LB: > { %s519_s13 = sadd.s32 4294967295, %s595_s12   ;;  %p523_p0 = scmp.ge.s32.totalorder %s595_s12, 1  ;;  %s595_s12 = sphi %s617_s12, %s13_s12  }
   0x2   : > { %p137_p1 = scmp.lt.s32.totalorder %s595_s12, 3 }
   0x4   : > { %p138_p2 = pnand %p523_p0, %p137_p1 }
   0x5   : > { %p161_p3 = scmp.lt.s32.totalorder (!%p138_p2), %s519_s13, 1 }
   0x6   : > { %141 = sbr.rel (%p138_p2) target bundleno = 238 (0xee), region = 32 }
   0xb   : > { %v218_v0 = vld [vmem:[%s799_s1 + $0x78] sm:$0xff]  ;;  %v217_v1 = vld [vmem:[%s799_s1 + $0x70] sm:$0xff]  ;;  %v216_v2 = vld [vmem:[%s799_s1 + $0x68] sm:$0xff]  ;;  %s803_s13 = smov (!%p161_p3, %s519_s13), 1 }
   0xc   : > { %533 = vmatpush.msra.mxu2 %v218_v0  ;;  %534 = vmatpush.msra.mxu3 %v218_v0  ;;  %v215_v3 = vld [vmem:[%s799_s1 + $0x60] sm:$0xff]  ;;  %v214_v4 = vld [vmem:[%s799_s1 + $0x58] sm:$0xff]  ;;  %v213_v5 = vld [vmem:[%s799_s1 + $0x50] sm:$0xff]  ;;  %s530_s15 = sshll.u32 %s803_s13, 8 }
   0xd   : > { %223 = vmatpush.msra.mxu0 %v218_v0  ;;  %532 = vmatpush.msra.mxu1 %v218_v0  ;;  %v212_v6 = vld [vmem:[%s799_s1 + $0x48] sm:$0xff]  ;;  %v211_v7 = vld [vmem:[%s799_s1 + $0x40] sm:$0xff]  ;;  %v210_v8 = vld [vmem:[%s799_s1 + $0x38] sm:$0xff]  ;;  %s682_s22 = scalar_lea.vmem %s798_s0, %s530_s15  ;;  %s731_s29 = scalar_lea.vmem %s801_s3, %s530_s15 }
   0xe   : > { %536 = vmatpush.msra.mxu2 %v217_v1  ;;  %537 = vmatpush.msra.mxu3 %v217_v1  ;;  %v209_v9 = vld [vmem:[%s799_s1 + $0x30] sm:$0xff]  ;;  %v208_v10 = vld [vmem:[%s799_s1 + $0x28] sm:$0xff]  ;;  %v207_v11 = vld [vmem:[%s799_s1 + $0x20] sm:$0xff] }
   0xf   : > { %224 = vmatpush.msra.mxu0 %v217_v1  ;;  %535 = vmatpush.msra.mxu1 %v217_v1  ;;  %v206_v12 = vld [vmem:[%s799_s1 + $0x18] sm:$0xff]  ;;  %v205_v13 = vld [vmem:[%s799_s1 + $0x10] sm:$0xff]  ;;  %v204_v14 = vld [vmem:[%s799_s1 + $0x8] sm:$0xff] }
  0x10   : > { %539 = vmatpush.msra.mxu2 %v216_v2  ;;  %540 = vmatpush.msra.mxu3 %v216_v2  ;;  %v203_v15 = vld [vmem:[%s799_s1] sm:$0xff]  ;;  %v188_v20 = vld [vmem:[%s682_s22 + $0x88] sm:$0xff]  ;;  %v189_v24 = vld [vmem:[%s682_s22 + $0x90] sm:$0xff] }
  0x11   : > { %225 = vmatpush.msra.mxu0 %v216_v2  ;;  %538 = vmatpush.msra.mxu1 %v216_v2  ;;  %v187_v16 = vld [vmem:[%s682_s22 + $0x80] sm:$0xff]  ;;  %v196_v21 = vld [vmem:[%s682_s22 + $0xc8] sm:$0xff]  ;;  %v197_v25 = vld [vmem:[%s682_s22 + $0xd0] sm:$0xff] }
  0x12   : > { %542 = vmatpush.msra.mxu2 %v215_v3  ;;  %543 = vmatpush.msra.mxu3 %v215_v3  ;;  %v195_v17 = vld [vmem:[%s682_s22 + $0xc0] sm:$0xff]  ;;  %v172_v22 = vld [vmem:[%s682_s22 + $0x8] sm:$0xff]  ;;  %v173_v26 = vld [vmem:[%s682_s22 + $0x10] sm:$0xff] }
  0x13   : > { %226 = vmatpush.msra.mxu0 %v215_v3  ;;  %541 = vmatpush.msra.mxu1 %v215_v3  ;;  %v171_v18 = vld [vmem:[%s682_s22] sm:$0xff]  ;;  %v180_v23 = vld [vmem:[%s682_s22 + $0x48] sm:$0xff]  ;;  %v181_v27 = vld [vmem:[%s682_s22 + $0x50] sm:$0xff] }
  0x14   : > { %545 = vmatpush.msra.mxu2 %v214_v4  ;;  %546 = vmatpush.msra.mxu3 %v214_v4  ;;  %v179_v19 = vld [vmem:[%s682_s22 + $0x40] sm:$0xff]  ;;  %v190_v28 = vld [vmem:[%s682_s22 + $0x98] sm:$0xff]  ;;  %v192_v36 = vld [vmem:[%s682_s22 + $0xa8] sm:$0xff] }
  0x15   : > { %227 = vmatpush.msra.mxu0 %v214_v4  ;;  %544 = vmatpush.msra.mxu1 %v214_v4  ;;  %v198_v29 = vld [vmem:[%s682_s22 + $0xd8] sm:$0xff]  ;;  %v191_v32 = vld [vmem:[%s682_s22 + $0xa0] sm:$0xff]  ;;  %v200_v37 = vld [vmem:[%s682_s22 + $0xe8] sm:$0xff] }
  0x16   : > { %548 = vmatpush.msra.mxu2 %v213_v5  ;;  %549 = vmatpush.msra.mxu3 %v213_v5  ;;  %v174_v30 = vld [vmem:[%s682_s22 + $0x18] sm:$0xff]  ;;  %v199_v33 = vld [vmem:[%s682_s22 + $0xe0] sm:$0xff]  ;;  %v176_v38 = vld [vmem:[%s682_s22 + $0x28] sm:$0xff] }
  0x17   : > { %228 = vmatpush.msra.mxu0 %v213_v5  ;;  %547 = vmatpush.msra.mxu1 %v213_v5  ;;  %v182_v31 = vld [vmem:[%s682_s22 + $0x58] sm:$0xff]  ;;  %v175_v34 = vld [vmem:[%s682_s22 + $0x20] sm:$0xff]  ;;  %v184_v39 = vld [vmem:[%s682_s22 + $0x68] sm:$0xff] }
  0x18   : > { %551 = vmatpush.msra.mxu2 %v212_v6  ;;  %552 = vmatpush.msra.mxu3 %v212_v6  ;;  %v183_v35 = vld [vmem:[%s682_s22 + $0x60] sm:$0xff]  ;;  %v193_v40 = vld [vmem:[%s682_s22 + $0xb0] sm:$0xff]  ;;  %v194_v44 = vld [vmem:[%s682_s22 + $0xb8] sm:$0xff] }
  0x19   : > { %229 = vmatpush.msra.mxu0 %v212_v6  ;;  %550 = vmatpush.msra.mxu1 %v212_v6  ;;  %v201_v41 = vld [vmem:[%s682_s22 + $0xf0] sm:$0xff]  ;;  %v202_v45 = vld [vmem:[%s682_s22 + $0xf8] sm:$0xff]  ;;  %v722_v48 = vld [vmem:[%s800_s2] ss:$0 sm:$0xff] }
  0x1a   : > { %554 = vmatpush.msra.mxu2 %v211_v7  ;;  %555 = vmatpush.msra.mxu3 %v211_v7  ;;  %v177_v42 = vld [vmem:[%s682_s22 + $0x30] sm:$0xff]  ;;  %v178_v46 = vld [vmem:[%s682_s22 + $0x38] sm:$0xff] }
  0x1b   : > { %230 = vmatpush.msra.mxu0 %v211_v7  ;;  %553 = vmatpush.msra.mxu1 %v211_v7  ;;  %v185_v43 = vld [vmem:[%s682_s22 + $0x70] sm:$0xff]  ;;  %v186_v47 = vld [vmem:[%s682_s22 + $0x78] sm:$0xff] }
  0x1c   : > { %557 = vmatpush.msra.mxu2 %v210_v8  ;;  %558 = vmatpush.msra.mxu3 %v210_v8 }
  0x1d   : > { %231 = vmatpush.msra.mxu0 %v210_v8  ;;  %556 = vmatpush.msra.mxu1 %v210_v8 }
  0x1e   : > { %560 = vmatpush.msra.mxu2 %v209_v9  ;;  %561 = vmatpush.msra.mxu3 %v209_v9 }
  0x1f   : > { %232 = vmatpush.msra.mxu0 %v209_v9  ;;  %559 = vmatpush.msra.mxu1 %v209_v9 }
  0x20   : > { %563 = vmatpush.msra.mxu2 %v208_v10  ;;  %564 = vmatpush.msra.mxu3 %v208_v10 }
  0x21   : > { %233 = vmatpush.msra.mxu0 %v208_v10  ;;  %562 = vmatpush.msra.mxu1 %v208_v10 }
  0x22   : > { %566 = vmatpush.msra.mxu2 %v207_v11  ;;  %567 = vmatpush.msra.mxu3 %v207_v11 }
  0x23   : > { %234 = vmatpush.msra.mxu0 %v207_v11  ;;  %565 = vmatpush.msra.mxu1 %v207_v11 }
  0x24   : > { %569 = vmatpush.msra.mxu2 %v206_v12  ;;  %570 = vmatpush.msra.mxu3 %v206_v12 }
  0x25   : > { %235 = vmatpush.msra.mxu0 %v206_v12  ;;  %568 = vmatpush.msra.mxu1 %v206_v12 }
  0x26   : > { %572 = vmatpush.msra.mxu2 %v205_v13  ;;  %573 = vmatpush.msra.mxu3 %v205_v13 }
  0x27   : > { %236 = vmatpush.msra.mxu0 %v205_v13  ;;  %571 = vmatpush.msra.mxu1 %v205_v13 }
  0x28   : > { %575 = vmatpush.msra.mxu2 %v204_v14  ;;  %576 = vmatpush.msra.mxu3 %v204_v14 }
  0x29   : > { %237 = vmatpush.msra.mxu0 %v204_v14  ;;  %574 = vmatpush.msra.mxu1 %v204_v14 }
  0x2a   : > { %578 = vmatpush.msra.mxu2 %v203_v15  ;;  %579 = vmatpush.msra.mxu3 %v203_v15 }
  0x2b   : > { %287 = vmatmul.f32.vlgmr.msra.gmra.mxu2 %v187_v16  ;;  %311 = vmatmul.f32.vlgmr.msra.gmra.mxu3 %v195_v17 }
  0x2c   : > { %238 = vmatpush.msra.mxu0 %v203_v15  ;;  %577 = vmatpush.msra.mxu1 %v203_v15 }
  0x2d   : > { %239 = vmatmul.f32.vlgmr.msra.gmra.mxu0 %v171_v18  ;;  %263 = vmatmul.f32.vlgmr.msra.gmra.mxu1 %v179_v19 }
  0x33   : > { %290 = vmatmul.f32.gmra.mxu2 %v188_v20  ;;  %314 = vmatmul.f32.gmra.mxu3 %v196_v21 }
  0x35   : > { %242 = vmatmul.f32.gmra.mxu0 %v172_v22  ;;  %266 = vmatmul.f32.gmra.mxu1 %v180_v23 }
  0x3b   : > { %293 = vmatmul.f32.gmra.mxu2 %v189_v24  ;;  %317 = vmatmul.f32.gmra.mxu3 %v197_v25 }
  0x3d   : > { %245 = vmatmul.f32.gmra.mxu0 %v173_v26  ;;  %269 = vmatmul.f32.gmra.mxu1 %v181_v27 }
  0x43   : > { %296 = vmatmul.f32.gmra.mxu2 %v190_v28  ;;  %320 = vmatmul.f32.gmra.mxu3 %v198_v29 }
  0x45   : > { %248 = vmatmul.f32.gmra.mxu0 %v174_v30  ;;  %272 = vmatmul.f32.gmra.mxu1 %v182_v31 }
  0x4b   : > { %299 = vmatmul.f32.gmra.mxu2 %v191_v32  ;;  %323 = vmatmul.f32.gmra.mxu3 %v199_v33 }
  0x4d   : > { %251 = vmatmul.f32.gmra.mxu0 %v175_v34  ;;  %275 = vmatmul.f32.gmra.mxu1 %v183_v35 }
  0x53   : > { %302 = vmatmul.f32.gmra.mxu2 %v192_v36  ;;  %326 = vmatmul.f32.gmra.mxu3 %v200_v37 }
  0x55   : > { %254 = vmatmul.f32.gmra.mxu0 %v176_v38  ;;  %278 = vmatmul.f32.gmra.mxu1 %v184_v39 }
  0x5b   : > { %305 = vmatmul.f32.gmra.mxu2 %v193_v40  ;;  %329 = vmatmul.f32.gmra.mxu3 %v201_v41 }
  0x5d   : > { %257 = vmatmul.f32.gmra.mxu0 %v177_v42  ;;  %281 = vmatmul.f32.gmra.mxu1 %v185_v43 }
  0x63   : > { %308 = vmatmul.f32.gmra.mxu2 %v194_v44  ;;  %332 = vmatmul.f32.gmra.mxu3 %v202_v45 }
  0x65   : > { %260 = vmatmul.f32.gmra.mxu0 %v178_v46  ;;  %284 = vmatmul.f32.gmra.mxu1 %v186_v47 }
  0xaa   : > { %v240_v49 = vpop.f32.mrf.mxu0  ;;  %v264_v50 = vpop.f32.mrf.mxu1 }
  0xab   : > { %v241_v51 = vadd.f32 %v722_v48, %v240_v49  ;;  %v265_v52 = vadd.f32 %v722_v48, %v264_v50 }
  0xad   : > { %vm336_vm0 = vcmp.ge.f32.partialorder %v241_v51, 0.0  ;;  %v368_v53 = vmul.f32 0.01, %v241_v51  ;;  %vm344_vm1 = vcmp.ge.f32.partialorder %v265_v52, 0.0  ;;  %v376_v54 = vmul.f32 0.01, %v265_v52 }
  0xae   : > { %v288_v55 = vpop.f32.mrf.mxu2  ;;  %v312_v56 = vpop.f32.mrf.mxu3 }
  0xaf   : > { %v400_v57 = vsel %vm336_vm0, %v241_v51, %v368_v53  ;;  %v408_v58 = vsel %vm344_vm1, %v265_v52, %v376_v54  ;;  %v289_v59 = vadd.f32 %v722_v48, %v288_v55  ;;  %v313_v60 = vadd.f32 %v722_v48, %v312_v56 }
  0xb0   : > { %432 = vst [vmem:[%s731_s29] sm:$0xff] %v400_v57 }
  0xb1   : > { %440 = vst [vmem:[%s731_s29 + $0x40] sm:$0xff] %v408_v58  ;;  %vm352_vm2 = vcmp.ge.f32.partialorder %v289_v59, 0.0  ;;  %v384_v61 = vmul.f32 0.01, %v289_v59  ;;  %vm360_vm3 = vcmp.ge.f32.partialorder %v313_v60, 0.0 }
  0xb2   : > { %v392_v62 = vmul.f32 0.01, %v313_v60  ;;  %v243_v63 = vpop.f32.mrf.mxu0  ;;  %v267_v0 = vpop.f32.mrf.mxu1 }
  0xb3   : > { %v416_v1 = vsel %vm352_vm2, %v289_v59, %v384_v61  ;;  %v244_v2 = vadd.f32 %v722_v48, %v243_v63  ;;  %v268_v3 = vadd.f32 %v722_v48, %v267_v0 }
  0xb4   : > { %448 = vst [vmem:[%s731_s29 + $0x80] sm:$0xff] %v416_v1  ;;  %v424_v4 = vsel %vm360_vm3, %v313_v60, %v392_v62 }
  0xb5   : > { %456 = vst [vmem:[%s731_s29 + $0xc0] sm:$0xff] %v424_v4  ;;  %vm337_vm4 = vcmp.ge.f32.partialorder %v244_v2, 0.0  ;;  %v369_v5 = vmul.f32 0.01, %v244_v2  ;;  %vm345_vm5 = vcmp.ge.f32.partialorder %v268_v3, 0.0 }
  0xb6   : > { %v377_v6 = vmul.f32 0.01, %v268_v3  ;;  %v291_v7 = vpop.f32.mrf.mxu2  ;;  %v315_v8 = vpop.f32.mrf.mxu3 }
  0xb7   : > { %v401_v9 = vsel %vm337_vm4, %v244_v2, %v369_v5  ;;  %v292_v10 = vadd.f32 %v722_v48, %v291_v7  ;;  %v316_v11 = vadd.f32 %v722_v48, %v315_v8 }
  0xb8   : > { %433 = vst [vmem:[%s731_s29 + $0x8] sm:$0xff] %v401_v9  ;;  %v409_v12 = vsel %vm345_vm5, %v268_v3, %v377_v6 }
  0xb9   : > { %441 = vst [vmem:[%s731_s29 + $0x48] sm:$0xff] %v409_v12  ;;  %vm353_vm6 = vcmp.ge.f32.partialorder %v292_v10, 0.0  ;;  %v385_v13 = vmul.f32 0.01, %v292_v10  ;;  %vm361_vm7 = vcmp.ge.f32.partialorder %v316_v11, 0.0 }
  0xba   : > { %v393_v14 = vmul.f32 0.01, %v316_v11  ;;  %v246_v15 = vpop.f32.mrf.mxu0  ;;  %v270_v16 = vpop.f32.mrf.mxu1 }
  0xbb   : > { %v417_v17 = vsel %vm353_vm6, %v292_v10, %v385_v13  ;;  %v247_v18 = vadd.f32 %v722_v48, %v246_v15  ;;  %v271_v19 = vadd.f32 %v722_v48, %v270_v16 }
  0xbc   : > { %449 = vst [vmem:[%s731_s29 + $0x88] sm:$0xff] %v417_v17  ;;  %v425_v20 = vsel %vm361_vm7, %v316_v11, %v393_v14 }
  0xbd   : > { %457 = vst [vmem:[%s731_s29 + $0xc8] sm:$0xff] %v425_v20  ;;  %vm338_vm8 = vcmp.ge.f32.partialorder %v247_v18, 0.0  ;;  %v370_v21 = vmul.f32 0.01, %v247_v18  ;;  %vm346_vm9 = vcmp.ge.f32.partialorder %v271_v19, 0.0 }
  0xbe   : > { %v378_v22 = vmul.f32 0.01, %v271_v19  ;;  %v294_v23 = vpop.f32.mrf.mxu2  ;;  %v318_v24 = vpop.f32.mrf.mxu3 }
  0xbf   : > { %v402_v25 = vsel %vm338_vm8, %v247_v18, %v370_v21  ;;  %v295_v26 = vadd.f32 %v722_v48, %v294_v23  ;;  %v319_v27 = vadd.f32 %v722_v48, %v318_v24 }
  0xc0   : > { %434 = vst [vmem:[%s731_s29 + $0x10] sm:$0xff] %v402_v25  ;;  %v410_v28 = vsel %vm346_vm9, %v271_v19, %v378_v22 }
  0xc1   : > { %442 = vst [vmem:[%s731_s29 + $0x50] sm:$0xff] %v410_v28  ;;  %vm354_vm10 = vcmp.ge.f32.partialorder %v295_v26, 0.0  ;;  %v386_v29 = vmul.f32 0.01, %v295_v26  ;;  %vm362_vm11 = vcmp.ge.f32.partialorder %v319_v27, 0.0 }
  0xc2   : > { %v394_v30 = vmul.f32 0.01, %v319_v27  ;;  %v249_v31 = vpop.f32.mrf.mxu0  ;;  %v273_v32 = vpop.f32.mrf.mxu1 }
  0xc3   : > { %v418_v33 = vsel %vm354_vm10, %v295_v26, %v386_v29  ;;  %v250_v34 = vadd.f32 %v722_v48, %v249_v31  ;;  %v274_v35 = vadd.f32 %v722_v48, %v273_v32 }
  0xc4   : > { %450 = vst [vmem:[%s731_s29 + $0x90] sm:$0xff] %v418_v33  ;;  %v426_v36 = vsel %vm362_vm11, %v319_v27, %v394_v30 }
  0xc5   : > { %458 = vst [vmem:[%s731_s29 + $0xd0] sm:$0xff] %v426_v36  ;;  %vm339_vm12 = vcmp.ge.f32.partialorder %v250_v34, 0.0  ;;  %v371_v37 = vmul.f32 0.01, %v250_v34  ;;  %vm347_vm13 = vcmp.ge.f32.partialorder %v274_v35, 0.0 }
  0xc6   : > { %v379_v38 = vmul.f32 0.01, %v274_v35  ;;  %v297_v39 = vpop.f32.mrf.mxu2  ;;  %v321_v40 = vpop.f32.mrf.mxu3 }
  0xc7   : > { %v403_v41 = vsel %vm339_vm12, %v250_v34, %v371_v37  ;;  %v298_v42 = vadd.f32 %v722_v48, %v297_v39  ;;  %v322_v43 = vadd.f32 %v722_v48, %v321_v40 }
  0xc8   : > { %435 = vst [vmem:[%s731_s29 + $0x18] sm:$0xff] %v403_v41  ;;  %v411_v44 = vsel %vm347_vm13, %v274_v35, %v379_v38 }
  0xc9   : > { %443 = vst [vmem:[%s731_s29 + $0x58] sm:$0xff] %v411_v44  ;;  %vm355_vm14 = vcmp.ge.f32.partialorder %v298_v42, 0.0  ;;  %v387_v45 = vmul.f32 0.01, %v298_v42  ;;  %vm363_vm15 = vcmp.ge.f32.partialorder %v322_v43, 0.0 }
  0xca   : > { %v395_v46 = vmul.f32 0.01, %v322_v43  ;;  %v252_v47 = vpop.f32.mrf.mxu0  ;;  %v276_v49 = vpop.f32.mrf.mxu1 }
  0xcb   : > { %v419_v50 = vsel %vm355_vm14, %v298_v42, %v387_v45  ;;  %v253_v51 = vadd.f32 %v722_v48, %v252_v47  ;;  %v277_v52 = vadd.f32 %v722_v48, %v276_v49 }
  0xcc   : > { %451 = vst [vmem:[%s731_s29 + $0x98] sm:$0xff] %v419_v50  ;;  %v427_v53 = vsel %vm363_vm15, %v322_v43, %v395_v46 }
  0xcd   : > { %459 = vst [vmem:[%s731_s29 + $0xd8] sm:$0xff] %v427_v53  ;;  %vm340_vm0 = vcmp.ge.f32.partialorder %v253_v51, 0.0  ;;  %v372_v54 = vmul.f32 0.01, %v253_v51  ;;  %vm348_vm1 = vcmp.ge.f32.partialorder %v277_v52, 0.0 }
  0xce   : > { %v380_v55 = vmul.f32 0.01, %v277_v52  ;;  %v300_v56 = vpop.f32.mrf.mxu2  ;;  %v324_v57 = vpop.f32.mrf.mxu3 }
  0xcf   : > { %v404_v58 = vsel %vm340_vm0, %v253_v51, %v372_v54  ;;  %v301_v59 = vadd.f32 %v722_v48, %v300_v56  ;;  %v325_v60 = vadd.f32 %v722_v48, %v324_v57 }
  0xd0   : > { %436 = vst [vmem:[%s731_s29 + $0x20] sm:$0xff] %v404_v58  ;;  %v412_v61 = vsel %vm348_vm1, %v277_v52, %v380_v55 }
  0xd1   : > { %444 = vst [vmem:[%s731_s29 + $0x60] sm:$0xff] %v412_v61  ;;  %vm356_vm2 = vcmp.ge.f32.partialorder %v301_v59, 0.0  ;;  %v388_v62 = vmul.f32 0.01, %v301_v59  ;;  %vm364_vm3 = vcmp.ge.f32.partialorder %v325_v60, 0.0 }
  0xd2   : > { %v396_v63 = vmul.f32 0.01, %v325_v60  ;;  %v255_v0 = vpop.f32.mrf.mxu0  ;;  %v279_v1 = vpop.f32.mrf.mxu1 }
  0xd3   : > { %v420_v2 = vsel %vm356_vm2, %v301_v59, %v388_v62  ;;  %v256_v3 = vadd.f32 %v722_v48, %v255_v0  ;;  %v280_v4 = vadd.f32 %v722_v48, %v279_v1 }
  0xd4   : > { %452 = vst [vmem:[%s731_s29 + $0xa0] sm:$0xff] %v420_v2  ;;  %v428_v5 = vsel %vm364_vm3, %v325_v60, %v396_v63 }
  0xd5   : > { %460 = vst [vmem:[%s731_s29 + $0xe0] sm:$0xff] %v428_v5  ;;  %vm341_vm4 = vcmp.ge.f32.partialorder %v256_v3, 0.0  ;;  %v373_v6 = vmul.f32 0.01, %v256_v3  ;;  %vm349_vm5 = vcmp.ge.f32.partialorder %v280_v4, 0.0 }
  0xd6   : > { %v381_v7 = vmul.f32 0.01, %v280_v4  ;;  %v303_v8 = vpop.f32.mrf.mxu2  ;;  %v327_v9 = vpop.f32.mrf.mxu3 }
  0xd7   : > { %v405_v10 = vsel %vm341_vm4, %v256_v3, %v373_v6  ;;  %v304_v11 = vadd.f32 %v722_v48, %v303_v8  ;;  %v328_v12 = vadd.f32 %v722_v48, %v327_v9 }
  0xd8   : > { %437 = vst [vmem:[%s731_s29 + $0x28] sm:$0xff] %v405_v10  ;;  %v413_v13 = vsel %vm349_vm5, %v280_v4, %v381_v7 }
  0xd9   : > { %445 = vst [vmem:[%s731_s29 + $0x68] sm:$0xff] %v413_v13  ;;  %vm357_vm6 = vcmp.ge.f32.partialorder %v304_v11, 0.0  ;;  %v389_v14 = vmul.f32 0.01, %v304_v11  ;;  %vm365_vm7 = vcmp.ge.f32.partialorder %v328_v12, 0.0 }
  0xda   : > { %v397_v15 = vmul.f32 0.01, %v328_v12  ;;  %v258_v16 = vpop.f32.mrf.mxu0  ;;  %v282_v17 = vpop.f32.mrf.mxu1 }
  0xdb   : > { %v421_v18 = vsel %vm357_vm6, %v304_v11, %v389_v14  ;;  %v259_v19 = vadd.f32 %v722_v48, %v258_v16  ;;  %v283_v20 = vadd.f32 %v722_v48, %v282_v17 }
  0xdc   : > { %453 = vst [vmem:[%s731_s29 + $0xa8] sm:$0xff] %v421_v18  ;;  %v429_v21 = vsel %vm365_vm7, %v328_v12, %v397_v15 }
  0xdd   : > { %461 = vst [vmem:[%s731_s29 + $0xe8] sm:$0xff] %v429_v21  ;;  %vm342_vm8 = vcmp.ge.f32.partialorder %v259_v19, 0.0  ;;  %v374_v22 = vmul.f32 0.01, %v259_v19  ;;  %vm350_vm9 = vcmp.ge.f32.partialorder %v283_v20, 0.0 }
  0xde   : > { %v382_v23 = vmul.f32 0.01, %v283_v20  ;;  %v306_v24 = vpop.f32.mrf.mxu2  ;;  %v330_v25 = vpop.f32.mrf.mxu3 }
  0xdf   : > { %v406_v26 = vsel %vm342_vm8, %v259_v19, %v374_v22  ;;  %v307_v27 = vadd.f32 %v722_v48, %v306_v24  ;;  %v331_v28 = vadd.f32 %v722_v48, %v330_v25 }
  0xe0   : > { %438 = vst [vmem:[%s731_s29 + $0x30] sm:$0xff] %v406_v26  ;;  %v414_v29 = vsel %vm350_vm9, %v283_v20, %v382_v23 }
  0xe1   : > { %446 = vst [vmem:[%s731_s29 + $0x70] sm:$0xff] %v414_v29  ;;  %vm358_vm10 = vcmp.ge.f32.partialorder %v307_v27, 0.0  ;;  %v390_v30 = vmul.f32 0.01, %v307_v27  ;;  %vm366_vm11 = vcmp.ge.f32.partialorder %v331_v28, 0.0 }
  0xe2   : > { %v398_v31 = vmul.f32 0.01, %v331_v28  ;;  %v261_v32 = vpop.f32.mrf.mxu0  ;;  %v285_v33 = vpop.f32.mrf.mxu1 }
  0xe3   : > { %v422_v34 = vsel %vm358_vm10, %v307_v27, %v390_v30  ;;  %v262_v35 = vadd.f32 %v722_v48, %v261_v32  ;;  %v286_v36 = vadd.f32 %v722_v48, %v285_v33 }
  0xe4   : > { %454 = vst [vmem:[%s731_s29 + $0xb0] sm:$0xff] %v422_v34  ;;  %v430_v37 = vsel %vm366_vm11, %v331_v28, %v398_v31 }
  0xe5   : > { %462 = vst [vmem:[%s731_s29 + $0xf0] sm:$0xff] %v430_v37  ;;  %vm343_vm12 = vcmp.ge.f32.partialorder %v262_v35, 0.0  ;;  %v375_v38 = vmul.f32 0.01, %v262_v35  ;;  %vm351_vm13 = vcmp.ge.f32.partialorder %v286_v36, 0.0 }
  0xe6   : > { %v383_v39 = vmul.f32 0.01, %v286_v36  ;;  %v309_v40 = vpop.f32.mrf.mxu2  ;;  %v333_v41 = vpop.f32.mrf.mxu3 }
  0xe7   : > { %v407_v42 = vsel %vm343_vm12, %v262_v35, %v375_v38  ;;  %v310_v43 = vadd.f32 %v722_v48, %v309_v40  ;;  %v334_v44 = vadd.f32 %v722_v48, %v333_v41 }
  0xe8   : > { %439 = vst [vmem:[%s731_s29 + $0x38] sm:$0xff] %v407_v42  ;;  %v415_v45 = vsel %vm351_vm13, %v286_v36, %v383_v39 }
  0xe9   : > { %447 = vst [vmem:[%s731_s29 + $0x78] sm:$0xff] %v415_v45  ;;  %vm359_vm14 = vcmp.ge.f32.partialorder %v310_v43, 0.0  ;;  %v391_v46 = vmul.f32 0.01, %v310_v43  ;;  %vm367_vm15 = vcmp.ge.f32.partialorder %v334_v44, 0.0 }
  0xea   : > { %v399_v47 = vmul.f32 0.01, %v334_v44 }
  0xeb   : > { %v423_v49 = vsel %vm359_vm14, %v310_v43, %v391_v46 }
  0xec   : > { %455 = vst [vmem:[%s731_s29 + $0xb8] sm:$0xff] %v423_v49  ;;  %v431_v50 = vsel %vm367_vm15, %v334_v44, %v399_v47 }
  0xed   : > { %463 = vst [vmem:[%s731_s29 + $0xf8] sm:$0xff] %v431_v50 }
  0xee PF: > { %s13_s12 = sadd.s32 1, %s595_s12  }
  0xef   : > { %p10_p4 = scmp.ge.s32.totalorder %s13_s12, 4  }
  0xf1   :  { %12 = sbr.rel (!%p10_p4) target bundleno = 1 (0x1), region = 62 }

// kernel: resblockcc_forward.7
= control target key start
LH: loop header
LB: loop body
LE: loop exit
PB: predicated region body
PF: predicated region fallthrough
CT: control target
= control target key end

     0   :  { %s2488_s12 = smov 0   ;;  %s3503_s0 = inlined_call_operand.vmem [shape: f32[2,326,128], index: 0, kind: input, shape index: {}]   ;;  %s3504_s1 = inlined_call_operand.vmem [shape: f32[9,128,128], index: 1, kind: input, shape index: {}]   ;;  %s3505_s2 = inlined_call_operand.vmem [shape: f32[1,128], index: 2, kind: input, shape index: {}]   ;;  %s3506_s3 = inlined_call_operand.vmem [shape: f32[2,288,128], index: 3, kind: output, shape index: {}]  }
   0x1 LB: > { %s2263_s13 = sadd.s32 4294967295, %s2466_s12   ;;  %p2267_p0 = scmp.ge.s32.totalorder %s2466_s12, 1  ;;  %s2466_s12 = sphi %s2488_s12, %s13_s12  }
   0x2   : > { %p137_p1 = scmp.lt.s32.totalorder %s2466_s12, 3 }
   0x4   : > { %p138_p2 = pnand %p2267_p0, %p137_p1 }
   0x5   : > { %p161_p3 = scmp.lt.s32.totalorder (!%p138_p2), %s2263_s13, 1 }
   0x6   : > { %141 = sbr.rel (%p138_p2) target bundleno = 827 (0x33b), region = 32 }
   0xb   : > { %v2285_v0 = vld [vmem:[%s3504_s1 + $0xf8] sm:$0xff]  ;;  %v2284_v1 = vld [vmem:[%s3504_s1 + $0xf0] sm:$0xff]  ;;  %v2283_v2 = vld [vmem:[%s3504_s1 + $0xe8] sm:$0xff]  ;;  %s3508_s13 = smov (!%p161_p3, %s2263_s13), 1 }
   0xc   : > { %2400 = vmatpush.msra.mxu1 %v2285_v0  ;;  %2401 = vmatpush.msra.mxu2 %v2285_v0  ;;  %v2282_v3 = vld [vmem:[%s3504_s1 + $0xe0] sm:$0xff]  ;;  %v2281_v4 = vld [vmem:[%s3504_s1 + $0xd8] sm:$0xff]  ;;  %v2280_v5 = vld [vmem:[%s3504_s1 + $0xd0] sm:$0xff]  ;;  %s2448_s15 = smul.u32 328, %s3508_s13 }
   0xd   : > { %2402 = vmatpush.msra.mxu3 %v2285_v0  ;;  %276 = vmatpush.msra.mxu0 %v2285_v0  ;;  %v2279_v6 = vld [vmem:[%s3504_s1 + $0xc8] sm:$0xff]  ;;  %v2278_v7 = vld [vmem:[%s3504_s1 + $0xc0] sm:$0xff]  ;;  %v2277_v8 = vld [vmem:[%s3504_s1 + $0xb8] sm:$0xff]  ;;  %s2449_s18 = smul.u32 288, %s3508_s13 }
   0xe   : > { %2403 = vmatpush.msra.mxu1 %v2284_v1  ;;  %2404 = vmatpush.msra.mxu2 %v2284_v1  ;;  %v2276_v9 = vld [vmem:[%s3504_s1 + $0xb0] sm:$0xff]  ;;  %v2275_v10 = vld [vmem:[%s3504_s1 + $0xa8] sm:$0xff]  ;;  %v2274_v11 = vld [vmem:[%s3504_s1 + $0xa0] sm:$0xff]  ;;  %s2551_s22 = scalar_lea.vmem %s3503_s0, %s2448_s15 }
   0xf   : > { %2405 = vmatpush.msra.mxu3 %v2284_v1  ;;  %277 = vmatpush.msra.mxu0 %v2284_v1  ;;  %v2273_v12 = vld [vmem:[%s3504_s1 + $0x98] sm:$0xff]  ;;  %v2272_v13 = vld [vmem:[%s3504_s1 + $0x90] sm:$0xff]  ;;  %v2271_v14 = vld [vmem:[%s3504_s1 + $0x88] sm:$0xff]  ;;  %s3334_s21 = scalar_lea.vmem %s3506_s3, %s2449_s18 }
  0x10   : > { %2406 = vmatpush.msra.mxu1 %v2283_v2  ;;  %2407 = vmatpush.msra.mxu2 %v2283_v2  ;;  %v2270_v15 = vld [vmem:[%s3504_s1 + $0x80] sm:$0xff]  ;;  %v232_v16 = vld [vmem:[%s2551_s22 + $0x49] sm:$0xff]  ;;  %v241_v17 = vld [vmem:[%s2551_s22 + $0x91] sm:$0xff] }
  0x11   : > { %2408 = vmatpush.msra.mxu3 %v2283_v2  ;;  %278 = vmatpush.msra.mxu0 %v2283_v2  ;;  %v2301_v18 = vld [vmem:[%s3504_s1 + $0x178] sm:$0xff]  ;;  %v2300_v22 = vld [vmem:[%s3504_s1 + $0x170] sm:$0xff]  ;;  %v2299_v25 = vld [vmem:[%s3504_s1 + $0x168] sm:$0xff] }
  0x12   : > { %2409 = vmatpush.msra.mxu1 %v2282_v3  ;;  %2410 = vmatpush.msra.mxu2 %v2282_v3  ;;  %v250_v19 = vld [vmem:[%s2551_s22 + $0xd9] sm:$0xff]  ;;  %v221_v23 = vld [vmem:[%s3504_s1 + $0x70] sm:$0xff]  ;;  %v223_v26 = vld [vmem:[%s2551_s22 + $0x1] sm:$0xff] }
  0x13   : > { %2411 = vmatpush.msra.mxu3 %v2282_v3  ;;  %279 = vmatpush.msra.mxu0 %v2282_v3  ;;  %v222_v20 = vld [vmem:[%s3504_s1 + $0x78] sm:$0xff]  ;;  %v2316_v24 = vld [vmem:[%s3504_s1 + $0x1f0] sm:$0xff]  ;;  %v220_v27 = vld [vmem:[%s3504_s1 + $0x68] sm:$0xff] }
  0x14   : > { %2412 = vmatpush.msra.mxu1 %v2281_v4  ;;  %2413 = vmatpush.msra.mxu2 %v2281_v4  ;;  %v2317_v21 = vld [vmem:[%s3504_s1 + $0x1f8] sm:$0xff]  ;;  %v2315_v29 = vld [vmem:[%s3504_s1 + $0x1e8] sm:$0xff]  ;;  %v2298_v32 = vld [vmem:[%s3504_s1 + $0x160] sm:$0xff] }
  0x15   : > { %2414 = vmatpush.msra.mxu3 %v2281_v4  ;;  %280 = vmatpush.msra.mxu0 %v2281_v4  ;;  %v2333_v28 = vld [vmem:[%s3504_s1 + $0x278] sm:$0xff]  ;;  %v2332_v33 = vld [vmem:[%s3504_s1 + $0x270] sm:$0xff]  ;;  %v251_v34 = vld [vmem:[%s2551_s22 + $0xe1] sm:$0xff] }
  0x16   : > { %2415 = vmatpush.msra.mxu1 %v2280_v5  ;;  %2416 = vmatpush.msra.mxu2 %v2280_v5  ;;  %v233_v30 = vld [vmem:[%s2551_s22 + $0x51] sm:$0xff]  ;;  %v242_v31 = vld [vmem:[%s2551_s22 + $0x99] sm:$0xff]  ;;  %v2331_v38 = vld [vmem:[%s3504_s1 + $0x268] sm:$0xff] }
  0x17   : > { %2417 = vmatpush.msra.mxu3 %v2280_v5  ;;  %281 = vmatpush.msra.mxu0 %v2280_v5  ;;  %v219_v35 = vld [vmem:[%s3504_s1 + $0x60] sm:$0xff]  ;;  %v2297_v37 = vld [vmem:[%s3504_s1 + $0x158] sm:$0xff]  ;;  %v2296_v41 = vld [vmem:[%s3504_s1 + $0x150] sm:$0xff] }
  0x18   : > { %2418 = vmatpush.msra.mxu1 %v2279_v6  ;;  %2419 = vmatpush.msra.mxu2 %v2279_v6  ;;  %v2314_v36 = vld [vmem:[%s3504_s1 + $0x1e0] sm:$0xff]  ;;  %v218_v39 = vld [vmem:[%s3504_s1 + $0x58] sm:$0xff]  ;;  %v224_v42 = vld [vmem:[%s2551_s22 + $0x9] sm:$0xff] }
  0x19   : > { %2420 = vmatpush.msra.mxu3 %v2279_v6  ;;  %282 = vmatpush.msra.mxu0 %v2279_v6  ;;  %v2313_v40 = vld [vmem:[%s3504_s1 + $0x1d8] sm:$0xff]  ;;  %v217_v43 = vld [vmem:[%s3504_s1 + $0x50] sm:$0xff]  ;;  %v2330_v44 = vld [vmem:[%s3504_s1 + $0x260] sm:$0xff] }
  0x1a   : > { %2421 = vmatpush.msra.mxu1 %v2278_v7  ;;  %2422 = vmatpush.msra.mxu2 %v2278_v7  ;;  %v2312_v45 = vld [vmem:[%s3504_s1 + $0x1d0] sm:$0xff]  ;;  %v234_v46 = vld [vmem:[%s2551_s22 + $0x59] sm:$0xff]  ;;  %v243_v47 = vld [vmem:[%s2551_s22 + $0xa1] sm:$0xff] }
  0x1b   : > { %2423 = vmatpush.msra.mxu3 %v2278_v7  ;;  %283 = vmatpush.msra.mxu0 %v2278_v7  ;;  %v2295_v48 = vld [vmem:[%s3504_s1 + $0x148] sm:$0xff]  ;;  %v2329_v49 = vld [vmem:[%s3504_s1 + $0x258] sm:$0xff]  ;;  %v2294_v53 = vld [vmem:[%s3504_s1 + $0x140] sm:$0xff] }
  0x1c   : > { %2424 = vmatpush.msra.mxu1 %v2277_v8  ;;  %2425 = vmatpush.msra.mxu2 %v2277_v8  ;;  %v252_v50 = vld [vmem:[%s2551_s22 + $0xe9] sm:$0xff]  ;;  %v215_v55 = vld [vmem:[%s3504_s1 + $0x40] sm:$0xff]  ;;  %v2293_v57 = vld [vmem:[%s3504_s1 + $0x138] sm:$0xff] }
  0x1d   : > { %2426 = vmatpush.msra.mxu3 %v2277_v8  ;;  %284 = vmatpush.msra.mxu0 %v2277_v8  ;;  %v216_v51 = vld [vmem:[%s3504_s1 + $0x48] sm:$0xff]  ;;  %v2328_v54 = vld [vmem:[%s3504_s1 + $0x250] sm:$0xff]  ;;  %v2310_v56 = vld [vmem:[%s3504_s1 + $0x1c0] sm:$0xff] }
  0x1e   : > { %2427 = vmatpush.msra.mxu1 %v2276_v9  ;;  %2428 = vmatpush.msra.mxu2 %v2276_v9  ;;  %v2311_v52 = vld [vmem:[%s3504_s1 + $0x1c8] sm:$0xff]  ;;  %v225_v58 = vld [vmem:[%s2551_s22 + $0x11] sm:$0xff]  ;;  %v2326_v1 = vld [vmem:[%s3504_s1 + $0x240] sm:$0xff] }
  0x1f   : > { %2429 = vmatpush.msra.mxu3 %v2276_v9  ;;  %285 = vmatpush.msra.mxu0 %v2276_v9  ;;  %v214_v59 = vld [vmem:[%s3504_s1 + $0x38] sm:$0xff]  ;;  %v2327_v60 = vld [vmem:[%s3504_s1 + $0x248] sm:$0xff]  ;;  %v2292_v0 = vld [vmem:[%s3504_s1 + $0x130] sm:$0xff] }
  0x20   : > { %2430 = vmatpush.msra.mxu1 %v2275_v10  ;;  %2431 = vmatpush.msra.mxu2 %v2275_v10  ;;  %v2309_v61 = vld [vmem:[%s3504_s1 + $0x1b8] sm:$0xff]  ;;  %v235_v62 = vld [vmem:[%s2551_s22 + $0x61] sm:$0xff]  ;;  %v244_v63 = vld [vmem:[%s2551_s22 + $0xa9] sm:$0xff] }
  0x21   : > { %2432 = vmatpush.msra.mxu3 %v2275_v10  ;;  %286 = vmatpush.msra.mxu0 %v2275_v10  ;;  %v253_v2 = vld [vmem:[%s2551_s22 + $0xf1] sm:$0xff]  ;;  %v2291_v5 = vld [vmem:[%s3504_s1 + $0x128] sm:$0xff]  ;;  %v2290_v9 = vld [vmem:[%s3504_s1 + $0x120] sm:$0xff] }
  0x22   : > { %2433 = vmatpush.msra.mxu1 %v2274_v11  ;;  %2434 = vmatpush.msra.mxu2 %v2274_v11  ;;  %v213_v3 = vld [vmem:[%s3504_s1 + $0x30] sm:$0xff]  ;;  %v2325_v6 = vld [vmem:[%s3504_s1 + $0x238] sm:$0xff]  ;;  %v212_v7 = vld [vmem:[%s3504_s1 + $0x28] sm:$0xff] }
  0x23   : > { %2435 = vmatpush.msra.mxu3 %v2274_v11  ;;  %287 = vmatpush.msra.mxu0 %v2274_v11  ;;  %v2308_v4 = vld [vmem:[%s3504_s1 + $0x1b0] sm:$0xff]  ;;  %v2307_v8 = vld [vmem:[%s3504_s1 + $0x1a8] sm:$0xff]  ;;  %v226_v10 = vld [vmem:[%s2551_s22 + $0x19] sm:$0xff] }
  0x24   : > { %2436 = vmatpush.msra.mxu1 %v2273_v12  ;;  %2437 = vmatpush.msra.mxu2 %v2273_v12  ;;  %v211_v11 = vld [vmem:[%s3504_s1 + $0x20] sm:$0xff] }
  0x25   : > { %2438 = vmatpush.msra.mxu3 %v2273_v12  ;;  %288 = vmatpush.msra.mxu0 %v2273_v12  ;;  %v2324_v12 = vld [vmem:[%s3504_s1 + $0x230] sm:$0xff] }
  0x26   : > { %2439 = vmatpush.msra.mxu1 %v2272_v13  ;;  %2440 = vmatpush.msra.mxu2 %v2272_v13 }
  0x27   : > { %2441 = vmatpush.msra.mxu3 %v2272_v13  ;;  %289 = vmatpush.msra.mxu0 %v2272_v13  ;;  %v2306_v13 = vld [vmem:[%s3504_s1 + $0x1a0] sm:$0xff] }
  0x28   : > { %2442 = vmatpush.msra.mxu1 %v2271_v14  ;;  %2443 = vmatpush.msra.mxu2 %v2271_v14 }
  0x29   : > { %2444 = vmatpush.msra.mxu3 %v2271_v14  ;;  %290 = vmatpush.msra.mxu0 %v2271_v14  ;;  %v236_v14 = vld [vmem:[%s2551_s22 + $0x69] sm:$0xff] }
  0x2a   : > { %2445 = vmatpush.msra.mxu1 %v2270_v15  ;;  %2446 = vmatpush.msra.mxu2 %v2270_v15 }
  0x2b   : > { %319 = vmatmul.f32.vlgmr.msra.gmra.mxu1 %v232_v16  ;;  %346 = vmatmul.f32.vlgmr.msra.gmra.mxu2 %v241_v17  ;;  %v2289_v16 = vld [vmem:[%s3504_s1 + $0x118] sm:$0xff]  ;;  %v2323_v17 = vld [vmem:[%s3504_s1 + $0x228] sm:$0xff] }
  0x2c   : > { %579 = vmatpush.msrb.mxu2 %v2301_v18  ;;  %2447 = vmatpush.msra.mxu3 %v2270_v15  ;;  %v254_v18 = vld [vmem:[%s2551_s22 + $0xf9] sm:$0xff] }
  0x2d   : > { %373 = vmatmul.f32.vlgmr.msra.gmra.mxu3 %v250_v19  ;;  %401 = vmatpush.msrb.mxu1 %v222_v20  ;;  %v210_v19 = vld [vmem:[%s3504_s1 + $0x18] sm:$0xff] }
  0x2e   : > { %793 = vmatpush.msrb.mxu3 %v2317_v21  ;;  %580 = vmatpush.msrb.mxu2 %v2300_v22  ;;  %v2305_v20 = vld [vmem:[%s3504_s1 + $0x198] sm:$0xff]  ;;  %v2288_v21 = vld [vmem:[%s3504_s1 + $0x110] sm:$0xff]  ;;  %v2322_v22 = vld [vmem:[%s3504_s1 + $0x220] sm:$0xff] }
  0x2f   : > { %291 = vmatpush.msra.mxu0 %v2270_v15  ;;  %402 = vmatpush.msrb.mxu1 %v221_v23  ;;  %v245_v15 = vld [vmem:[%s2551_s22 + $0xb1] sm:$0xff] }
  0x30   : > { %794 = vmatpush.msrb.mxu3 %v2316_v24  ;;  %581 = vmatpush.msrb.mxu2 %v2299_v25  ;;  %v209_v23 = vld [vmem:[%s3504_s1 + $0x10] sm:$0xff]  ;;  %v2287_v25 = vld [vmem:[%s3504_s1 + $0x108] sm:$0xff] }
  0x31   : > { %292 = vmatmul.f32.vlgmr.msra.gmra.mxu0 %v223_v26  ;;  %403 = vmatpush.msrb.mxu1 %v220_v27  ;;  %v2304_v24 = vld [vmem:[%s3504_s1 + $0x190] sm:$0xff]  ;;  %v227_v26 = vld [vmem:[%s2551_s22 + $0x21] sm:$0xff] }
  0x32   : > { %1007 = vmatpush.msrb.mxu0 %v2333_v28  ;;  %795 = vmatpush.msrb.mxu3 %v2315_v29  ;;  %v208_v27 = vld [vmem:[%s3504_s1 + $0x8] sm:$0xff]  ;;  %v2321_v28 = vld [vmem:[%s3504_s1 + $0x218] sm:$0xff] }
  0x33   : > { %322 = vmatmul.f32.gmra.mxu1 %v233_v30  ;;  %349 = vmatmul.f32.gmra.mxu2 %v242_v31  ;;  %v2303_v29 = vld [vmem:[%s3504_s1 + $0x188] sm:$0xff]  ;;  %v237_v30 = vld [vmem:[%s2551_s22 + $0x71] sm:$0xff]  ;;  %v246_v31 = vld [vmem:[%s2551_s22 + $0xb9] sm:$0xff] }
  0x34   : > { %582 = vmatpush.msrb.mxu2 %v2298_v32  ;;  %1008 = vmatpush.msrb.mxu0 %v2332_v33  ;;  %v2286_v32 = vld [vmem:[%s3504_s1 + $0x100] sm:$0xff]  ;;  %v2320_v33 = vld [vmem:[%s3504_s1 + $0x210] sm:$0xff] }
  0x35   : > { %376 = vmatmul.f32.gmra.mxu3 %v251_v34  ;;  %404 = vmatpush.msrb.mxu1 %v219_v35  ;;  %v255_v34 = vld [vmem:[%s2551_s22 + $0x101] sm:$0xff] }
  0x36   : > { %796 = vmatpush.msrb.mxu3 %v2314_v36  ;;  %583 = vmatpush.msrb.mxu2 %v2297_v37  ;;  %v207_v35 = vld [vmem:[%s3504_s1] sm:$0xff]  ;;  %v2365_v37 = vld [vmem:[%s3504_s1 + $0x378] sm:$0xff] }
  0x37   : > { %1009 = vmatpush.msrb.mxu0 %v2331_v38  ;;  %405 = vmatpush.msrb.mxu1 %v218_v39  ;;  %v2302_v36 = vld [vmem:[%s3504_s1 + $0x180] sm:$0xff]  ;;  %v2319_v38 = vld [vmem:[%s3504_s1 + $0x208] sm:$0xff]  ;;  %v2381_v39 = vld [vmem:[%s3504_s1 + $0x3f8] sm:$0xff] }
  0x38   : > { %797 = vmatpush.msrb.mxu3 %v2313_v40  ;;  %584 = vmatpush.msrb.mxu2 %v2296_v41  ;;  %v2349_v40 = vld [vmem:[%s3504_s1 + $0x2f8] sm:$0xff]  ;;  %v228_v41 = vld [vmem:[%s2551_s22 + $0x29] sm:$0xff] }
  0x39   : > { %295 = vmatmul.f32.gmra.mxu0 %v224_v42  ;;  %406 = vmatpush.msrb.mxu1 %v217_v43  ;;  %v2318_v42 = vld [vmem:[%s3504_s1 + $0x200] sm:$0xff] }
  0x3a   : > { %1010 = vmatpush.msrb.mxu0 %v2330_v44  ;;  %798 = vmatpush.msrb.mxu3 %v2312_v45  ;;  %v238_v43 = vld [vmem:[%s2551_s22 + $0x79] sm:$0xff]  ;;  %v247_v44 = vld [vmem:[%s2551_s22 + $0xc1] sm:$0xff]  ;;  %v256_v45 = vld [vmem:[%s2551_s22 + $0x109] sm:$0xff] }
  0x3b   : > { %325 = vmatmul.f32.gmra.mxu1 %v234_v46  ;;  %352 = vmatmul.f32.gmra.mxu2 %v243_v47  ;;  %v2397_v46 = vld [vmem:[%s3504_s1 + $0x478] sm:$0xff] }
  0x3c   : > { %585 = vmatpush.msrb.mxu2 %v2295_v48  ;;  %1011 = vmatpush.msrb.mxu0 %v2329_v49  ;;  %v229_v47 = vld [vmem:[%s2551_s22 + $0x31] sm:$0xff]  ;;  %v239_v48 = vld [vmem:[%s2551_s22 + $0x81] sm:$0xff]  ;;  %v248_v49 = vld [vmem:[%s2551_s22 + $0xc9] sm:$0xff] }
  0x3d   : > { %379 = vmatmul.f32.gmra.mxu3 %v252_v50  ;;  %407 = vmatpush.msrb.mxu1 %v216_v51  ;;  %v257_v50 = vld [vmem:[%s2551_s22 + $0x111] sm:$0xff] }
  0x3e   : > { %799 = vmatpush.msrb.mxu3 %v2311_v52  ;;  %586 = vmatpush.msrb.mxu2 %v2294_v53  ;;  %v2364_v51 = vld [vmem:[%s3504_s1 + $0x370] sm:$0xff] }
  0x3f   : > { %1012 = vmatpush.msrb.mxu0 %v2328_v54  ;;  %408 = vmatpush.msrb.mxu1 %v215_v55  ;;  %v2380_v52 = vld [vmem:[%s3504_s1 + $0x3f0] sm:$0xff]  ;;  %v230_v54 = vld [vmem:[%s2551_s22 + $0x39] sm:$0xff] }
  0x40   : > { %800 = vmatpush.msrb.mxu3 %v2310_v56  ;;  %587 = vmatpush.msrb.mxu2 %v2293_v57  ;;  %v2348_v53 = vld [vmem:[%s3504_s1 + $0x2f0] sm:$0xff]  ;;  %v258_v57 = vld [vmem:[%s2551_s22 + $0x119] sm:$0xff] }
  0x41   : > { %298 = vmatmul.f32.gmra.mxu0 %v225_v58  ;;  %409 = vmatpush.msrb.mxu1 %v214_v59  ;;  %v240_v55 = vld [vmem:[%s2551_s22 + $0x89] sm:$0xff]  ;;  %v249_v56 = vld [vmem:[%s2551_s22 + $0xd1] sm:$0xff]  ;;  %v231_v59 = vld [vmem:[%s2551_s22 + $0x41] sm:$0xff] }
  0x42   : > { %1013 = vmatpush.msrb.mxu0 %v2327_v60  ;;  %801 = vmatpush.msrb.mxu3 %v2309_v61  ;;  %v2396_v58 = vld [vmem:[%s3504_s1 + $0x470] sm:$0xff]  ;;  %v171_v60 = vld [vmem:[%s2551_s22] sm:$0xff] }
  0x43   : > { %328 = vmatmul.f32.gmra.mxu1 %v235_v62  ;;  %355 = vmatmul.f32.gmra.mxu2 %v244_v63  ;;  %v526_v61 = vld [vmem:[%s2551_s22 + $0x2] sm:$0xff]  ;;  %v740_v62 = vld [vmem:[%s2551_s22 + $0x12] sm:$0xff] }
  0x44   : > { %588 = vmatpush.msrb.mxu2 %v2292_v0  ;;  %1014 = vmatpush.msrb.mxu0 %v2326_v1  ;;  %v2363_v63 = vld [vmem:[%s3504_s1 + $0x368] sm:$0xff]  ;;  %v954_v1 = vld [vmem:[%s2551_s22 + $0x13] sm:$0xff] }
  0x45   : > { %382 = vmatmul.f32.gmra.mxu3 %v253_v2  ;;  %410 = vmatpush.msrb.mxu1 %v213_v3  ;;  %v2379_v0 = vld [vmem:[%s3504_s1 + $0x3e8] sm:$0xff] }
  0x46   : > { %802 = vmatpush.msrb.mxu3 %v2308_v4  ;;  %589 = vmatpush.msrb.mxu2 %v2291_v5  ;;  %v172_v2 = vld [vmem:[%s2551_s22 + $0x8] sm:$0xff]  ;;  %v741_v4 = vld [vmem:[%s2551_s22 + $0x1a] sm:$0xff] }
  0x47   : > { %1015 = vmatpush.msrb.mxu0 %v2325_v6  ;;  %411 = vmatpush.msrb.mxu1 %v212_v7  ;;  %v527_v3 = vld [vmem:[%s2551_s22 + $0xa] sm:$0xff]  ;;  %v955_v7 = vld [vmem:[%s2551_s22 + $0x1b] sm:$0xff] }
  0x48   : > { %803 = vmatpush.msrb.mxu3 %v2307_v8  ;;  %590 = vmatpush.msrb.mxu2 %v2290_v9  ;;  %v2347_v5 = vld [vmem:[%s3504_s1 + $0x2e8] sm:$0xff]  ;;  %v173_v8 = vld [vmem:[%s2551_s22 + $0x10] sm:$0xff] }
  0x49   : > { %301 = vmatmul.f32.gmra.mxu0 %v226_v10  ;;  %412 = vmatpush.msrb.mxu1 %v211_v11  ;;  %v2395_v6 = vld [vmem:[%s3504_s1 + $0x468] sm:$0xff]  ;;  %v174_v11 = vld [vmem:[%s2551_s22 + $0x18] sm:$0xff] }
  0x4a   : > { %1016 = vmatpush.msrb.mxu0 %v2324_v12  ;;  %804 = vmatpush.msrb.mxu3 %v2306_v13  ;;  %v742_v9 = vld [vmem:[%s2551_s22 + $0x22] sm:$0xff]  ;;  %v743_v13 = vld [vmem:[%s2551_s22 + $0x2a] sm:$0xff] }
  0x4b   : > { %331 = vmatmul.f32.gmra.mxu1 %v236_v14  ;;  %358 = vmatmul.f32.gmra.mxu2 %v245_v15  ;;  %v956_v10 = vld [vmem:[%s2551_s22 + $0x23] sm:$0xff] }
  0x4c   : > { %591 = vmatpush.msrb.mxu2 %v2289_v16  ;;  %1017 = vmatpush.msrb.mxu0 %v2323_v17  ;;  %v2362_v12 = vld [vmem:[%s3504_s1 + $0x360] sm:$0xff]  ;;  %v957_v16 = vld [vmem:[%s2551_s22 + $0x2b] sm:$0xff] }
  0x4d   : > { %385 = vmatmul.f32.gmra.mxu3 %v254_v18  ;;  %413 = vmatpush.msrb.mxu1 %v210_v19  ;;  %v2378_v14 = vld [vmem:[%s3504_s1 + $0x3e0] sm:$0xff]  ;;  %v744_v18 = vld [vmem:[%s2551_s22 + $0x32] sm:$0xff] }
  0x4e   : > { %805 = vmatpush.msrb.mxu3 %v2305_v20  ;;  %592 = vmatpush.msrb.mxu2 %v2288_v21  ;;  %v2346_v15 = vld [vmem:[%s3504_s1 + $0x2e0] sm:$0xff]  ;;  %v958_v20 = vld [vmem:[%s2551_s22 + $0x33] sm:$0xff]  ;;  %v176_v21 = vld [vmem:[%s2551_s22 + $0x28] sm:$0xff] }
  0x4f   : > { %1018 = vmatpush.msrb.mxu0 %v2322_v22  ;;  %414 = vmatpush.msrb.mxu1 %v209_v23  ;;  %v175_v17 = vld [vmem:[%s2551_s22 + $0x20] sm:$0xff]  ;;  %v2361_v23 = vld [vmem:[%s3504_s1 + $0x358] sm:$0xff] }
  0x50   : > { %806 = vmatpush.msrb.mxu3 %v2304_v24  ;;  %593 = vmatpush.msrb.mxu2 %v2287_v25  ;;  %v2394_v19 = vld [vmem:[%s3504_s1 + $0x460] sm:$0xff]  ;;  %v2377_v24 = vld [vmem:[%s3504_s1 + $0x3d8] sm:$0xff] }
  0x51   : > { %304 = vmatmul.f32.gmra.mxu0 %v227_v26  ;;  %415 = vmatpush.msrb.mxu1 %v208_v27  ;;  %v745_v22 = vld [vmem:[%s2551_s22 + $0x3a] sm:$0xff]  ;;  %v177_v27 = vld [vmem:[%s2551_s22 + $0x30] sm:$0xff] }
  0x52   : > { %1019 = vmatpush.msrb.mxu0 %v2321_v28  ;;  %807 = vmatpush.msrb.mxu3 %v2303_v29  ;;  %v959_v25 = vld [vmem:[%s2551_s22 + $0x3b] sm:$0xff] }
  0x53   : > { %334 = vmatmul.f32.gmra.mxu1 %v237_v30  ;;  %361 = vmatmul.f32.gmra.mxu2 %v246_v31  ;;  %v2345_v26 = vld [vmem:[%s3504_s1 + $0x2d8] sm:$0xff]  ;;  %v746_v28 = vld [vmem:[%s2551_s22 + $0x42] sm:$0xff] }
  0x54   : > { %594 = vmatpush.msrb.mxu2 %v2286_v32  ;;  %1020 = vmatpush.msrb.mxu0 %v2320_v33  ;;  %v2393_v29 = vld [vmem:[%s3504_s1 + $0x458] sm:$0xff]  ;;  %v960_v30 = vld [vmem:[%s2551_s22 + $0x43] sm:$0xff] }
  0x55   : > { %388 = vmatmul.f32.gmra.mxu3 %v255_v34  ;;  %416 = vmatpush.msrb.mxu1 %v207_v35  ;;  %v178_v32 = vld [vmem:[%s2551_s22 + $0x38] sm:$0xff]  ;;  %v747_v33 = vld [vmem:[%s2551_s22 + $0x4a] sm:$0xff] }
  0x56   : > { %808 = vmatpush.msrb.mxu3 %v2302_v36  ;;  %1435 = vmatpush.msra.mxu2 %v2365_v37  ;;  %v2360_v34 = vld [vmem:[%s3504_s1 + $0x350] sm:$0xff] }
  0x57   : > { %1021 = vmatpush.msrb.mxu0 %v2319_v38  ;;  %1221 = vmatpush.msra.mxu1 %v2349_v40  ;;  %v961_v37 = vld [vmem:[%s2551_s22 + $0x4b] sm:$0xff] }
  0x58   : > { %1649 = vmatpush.msra.mxu3 %v2381_v39  ;;  %1436 = vmatpush.msra.mxu2 %v2364_v51  ;;  %v2376_v38 = vld [vmem:[%s3504_s1 + $0x3d0] sm:$0xff]  ;;  %v749_v51 = vld [vmem:[%s2551_s22 + $0x5a] sm:$0xff] }
  0x59   : > { %307 = vmatmul.f32.gmra.mxu0 %v228_v41  ;;  %1222 = vmatpush.msra.mxu1 %v2348_v53  ;;  %v179_v41 = vld [vmem:[%s2551_s22 + $0x40] sm:$0xff] }
  0x5a   : > { %1022 = vmatpush.msrb.mxu0 %v2318_v42  ;;  %1650 = vmatpush.msra.mxu3 %v2380_v52  ;;  %v2344_v42 = vld [vmem:[%s3504_s1 + $0x2d0] sm:$0xff] }
  0x5b   : > { %337 = vmatmul.f32.gmra.mxu1 %v238_v43  ;;  %364 = vmatmul.f32.gmra.mxu2 %v247_v44  ;;  %v748_v43 = vld [vmem:[%s2551_s22 + $0x52] sm:$0xff] }
  0x5c   : > { %1863 = vmatpush.msra.mxu0 %v2397_v46  ;;  %1437 = vmatpush.msra.mxu2 %v2363_v63  ;;  %v962_v46 = vld [vmem:[%s2551_s22 + $0x53] sm:$0xff] }
  0x5d   : > { %391 = vmatmul.f32.gmra.mxu3 %v256_v45  ;;  %1223 = vmatpush.msra.mxu1 %v2347_v5  ;;  %v751_v5 = vld [vmem:[%s2551_s22 + $0x6a] sm:$0xff] }
  0x5e   : > { %1864 = vmatpush.msra.mxu0 %v2396_v58  ;;  %1651 = vmatpush.msra.mxu3 %v2379_v0  ;;  %v181_v58 = vld [vmem:[%s2551_s22 + $0x50] sm:$0xff]  ;;  %v964_v0 = vld [vmem:[%s2551_s22 + $0x63] sm:$0xff] }
  0x5f   : > { %1438 = vmatpush.msra.mxu2 %v2362_v12  ;;  %1224 = vmatpush.msra.mxu1 %v2346_v15  ;;  %v2358_v12 = vld [vmem:[%s3504_s1 + $0x340] sm:$0xff] }
  0x60   : > { %1865 = vmatpush.msra.mxu0 %v2395_v6  ;;  %1652 = vmatpush.msra.mxu3 %v2378_v14  ;;  %v2374_v14 = vld [vmem:[%s3504_s1 + $0x3c0] sm:$0xff] }
  0x61   : > { %310 = vmatmul.f32.gmra.mxu0 %v229_v47  ;;  %1439 = vmatpush.msra.mxu2 %v2361_v23  ;;  %v2392_v47 = vld [vmem:[%s3504_s1 + $0x450] sm:$0xff]  ;;  %v2342_v15 = vld [vmem:[%s3504_s1 + $0x2c0] sm:$0xff] }
  0x62   : > { %1866 = vmatpush.msra.mxu0 %v2394_v19  ;;  %1653 = vmatpush.msra.mxu3 %v2377_v24  ;;  %v2390_v23 = vld [vmem:[%s3504_s1 + $0x440] sm:$0xff] }
  0x63   : > { %340 = vmatmul.f32.gmra.mxu1 %v239_v48  ;;  %367 = vmatmul.f32.gmra.mxu2 %v248_v49 }
  0x64   : > { %1225 = vmatpush.msra.mxu1 %v2345_v26  ;;  %1867 = vmatpush.msra.mxu0 %v2393_v29  ;;  %v967_v26 = vld [vmem:[%s2551_s22 + $0x7b] sm:$0xff]  ;;  %v185_v29 = vld [vmem:[%s2551_s22 + $0x70] sm:$0xff] }
  0x65   : > { %394 = vmatmul.f32.gmra.mxu3 %v257_v50  ;;  %1440 = vmatpush.msra.mxu2 %v2360_v34  ;;  %v180_v50 = vld [vmem:[%s2551_s22 + $0x48] sm:$0xff] }
  0x66   : > { %1654 = vmatpush.msra.mxu3 %v2376_v38  ;;  %1226 = vmatpush.msra.mxu1 %v2344_v42  ;;  %v968_v38 = vld [vmem:[%s2551_s22 + $0x83] sm:$0xff] }
  0x67   : > { %1868 = vmatpush.msra.mxu0 %v2392_v47  ;;  %v755_v47 = vld [vmem:[%s2551_s22 + $0x8a] sm:$0xff] }
  0x69   : > { %313 = vmatmul.f32.gmra.mxu0 %v230_v54  ;;  %v963_v54 = vld [vmem:[%s2551_s22 + $0x5b] sm:$0xff] }
  0x6b   : > { %343 = vmatmul.f32.gmra.mxu1 %v240_v55  ;;  %370 = vmatmul.f32.gmra.mxu2 %v249_v56  ;;  %v2359_v55 = vld [vmem:[%s3504_s1 + $0x348] sm:$0xff] }
  0x6c   : > { %1441 = vmatpush.msra.mxu2 %v2359_v55  ;;  %v969_v55 = vld [vmem:[%s2551_s22 + $0x8b] sm:$0xff] }
  0x6d   : > { %397 = vmatmul.f32.gmra.mxu3 %v258_v57 }
  0x6e   : > { %1442 = vmatpush.msra.mxu2 %v2358_v12  ;;  %v2372_v12 = vld [vmem:[%s3504_s1 + $0x3b0] sm:$0xff] }
  0x71   : > { %316 = vmatmul.f32.gmra.mxu0 %v231_v59  ;;  %v2375_v59 = vld [vmem:[%s3504_s1 + $0x3c8] sm:$0xff] }
  0x72   : > { %1655 = vmatpush.msra.mxu3 %v2375_v59 }
  0x73   : > { %417 = vmatmul.f32.vlgmr.msrb.gmra.mxu1 %v171_v60  ;;  %595 = vmatmul.f32.vlgmr.msrb.gmra.mxu2 %v526_v61  ;;  %v750_v60 = vld [vmem:[%s2551_s22 + $0x62] sm:$0xff] }
  0x74   : > { %v2343_v61 = vld [vmem:[%s3504_s1 + $0x2c8] sm:$0xff]  ;;  %1656 = vmatpush.msra.mxu3 %v2374_v14 }
  0x75   : > { %809 = vmatmul.f32.vlgmr.msrb.gmra.mxu3 %v740_v62  ;;  %1227 = vmatpush.msra.mxu1 %v2343_v61  ;;  %v756_v61 = vld [vmem:[%s2551_s22 + $0x92] sm:$0xff] }
  0x77   : > { %1228 = vmatpush.msra.mxu1 %v2342_v15  ;;  %v188_v15 = vld [vmem:[%s2551_s22 + $0x88] sm:$0xff] }
  0x79   : > { %1023 = vmatmul.f32.vlgmr.msrb.gmra.mxu0 %v954_v1 }
  0x7b   : > { %420 = vmatmul.f32.gmra.mxu1 %v172_v2  ;;  %598 = vmatmul.f32.gmra.mxu2 %v527_v3  ;;  %v182_v3 = vld [vmem:[%s2551_s22 + $0x58] sm:$0xff] }
  0x7d   : > { %812 = vmatmul.f32.gmra.mxu3 %v741_v4 }
  0x81   : > { %1026 = vmatmul.f32.gmra.mxu0 %v955_v7 }
  0x83   : > { %423 = vmatmul.f32.gmra.mxu1 %v173_v8  ;;  %601 = vmatmul.f32.gmra.mxu2 %v740_v62  ;;  %v965_v8 = vld [vmem:[%s2551_s22 + $0x6b] sm:$0xff] }
  0x85   : > { %815 = vmatmul.f32.gmra.mxu3 %v742_v9 }
  0x89   : > { %1029 = vmatmul.f32.gmra.mxu0 %v956_v10 }
  0x8b   : > { %426 = vmatmul.f32.gmra.mxu1 %v174_v11  ;;  %604 = vmatmul.f32.gmra.mxu2 %v741_v4  ;;  %v2391_v4 = vld [vmem:[%s3504_s1 + $0x448] sm:$0xff]  ;;  %v183_v11 = vld [vmem:[%s2551_s22 + $0x60] sm:$0xff] }
  0x8c   : > { %1869 = vmatpush.msra.mxu0 %v2391_v4 }
  0x8d   : > { %818 = vmatmul.f32.gmra.mxu3 %v743_v13 }
  0x8e   : > { %1870 = vmatpush.msra.mxu0 %v2390_v23 }
  0x91   : > { %1032 = vmatmul.f32.gmra.mxu0 %v957_v16 }
  0x93   : > { %429 = vmatmul.f32.gmra.mxu1 %v175_v17  ;;  %607 = vmatmul.f32.gmra.mxu2 %v742_v9 }
  0x95   : > { %821 = vmatmul.f32.gmra.mxu3 %v744_v18 }
  0x99   : > { %1035 = vmatmul.f32.gmra.mxu0 %v958_v20 }
  0x9b   : > { %432 = vmatmul.f32.gmra.mxu1 %v176_v21  ;;  %610 = vmatmul.f32.gmra.mxu2 %v743_v13  ;;  %v752_v13 = vld [vmem:[%s2551_s22 + $0x72] sm:$0xff]  ;;  %v184_v21 = vld [vmem:[%s2551_s22 + $0x68] sm:$0xff] }
  0x9d   : > { %824 = vmatmul.f32.gmra.mxu3 %v745_v22 }
  0xa1   : > { %1038 = vmatmul.f32.gmra.mxu0 %v959_v25 }
  0xa3   : > { %435 = vmatmul.f32.gmra.mxu1 %v177_v27  ;;  %613 = vmatmul.f32.gmra.mxu2 %v744_v18  ;;  %v966_v18 = vld [vmem:[%s2551_s22 + $0x73] sm:$0xff] }
  0xa5   : > { %827 = vmatmul.f32.gmra.mxu3 %v746_v28 }
  0xa8   : > { %v2867_v31 = vpop.f32.mrf.mxu1 }
  0xa9   : > { %1041 = vmatmul.f32.gmra.mxu0 %v960_v30  ;;  %v754_v30 = vld [vmem:[%s2551_s22 + $0x82] sm:$0xff] }
  0xab   : > { %438 = vmatmul.f32.gmra.mxu1 %v178_v32  ;;  %616 = vmatmul.f32.gmra.mxu2 %v745_v22  ;;  %v753_v22 = vld [vmem:[%s2551_s22 + $0x7a] sm:$0xff] }
  0xac   : > { %v2357_v32 = vld [vmem:[%s3504_s1 + $0x338] sm:$0xff] }
  0xad   : > { %830 = vmatmul.f32.gmra.mxu3 %v747_v33  ;;  %1443 = vmatpush.msra.mxu2 %v2357_v32 }
  0xae   : > { %v2874_v35 = vpop.f32.mrf.mxu2  ;;  %v2876_v36 = vpop.f32.mrf.mxu0 }
  0xb0   : > { %v2882_v39 = vpop.f32.mrf.mxu1  ;;  %v2884_v40 = vpop.f32.mrf.mxu3 }
  0xb1   : > { %1044 = vmatmul.f32.gmra.mxu0 %v961_v37 }
  0xb3   : > { %441 = vmatmul.f32.gmra.mxu1 %v179_v41  ;;  %619 = vmatmul.f32.gmra.mxu2 %v746_v28  ;;  %v2341_v41 = vld [vmem:[%s3504_s1 + $0x2b8] sm:$0xff] }
  0xb4   : > { %1229 = vmatpush.msra.mxu1 %v2341_v41 }
  0xb5   : > { %833 = vmatmul.f32.gmra.mxu3 %v748_v43 }
  0xb6   : > { %v2891_v44 = vpop.f32.mrf.mxu2  ;;  %v2893_v45 = vpop.f32.mrf.mxu0 }
  0xb8   : > { %v2899_v48 = vpop.f32.mrf.mxu1  ;;  %v2901_v49 = vpop.f32.mrf.mxu3 }
  0xb9   : > { %1047 = vmatmul.f32.gmra.mxu0 %v962_v46  ;;  %v186_v46 = vld [vmem:[%s2551_s22 + $0x78] sm:$0xff] }
  0xbb   : > { %444 = vmatmul.f32.gmra.mxu1 %v180_v50  ;;  %622 = vmatmul.f32.gmra.mxu2 %v747_v33  ;;  %v2373_v33 = vld [vmem:[%s3504_s1 + $0x3b8] sm:$0xff] }
  0xbc   : > { %1657 = vmatpush.msra.mxu3 %v2373_v33  ;;  %v2389_v50 = vld [vmem:[%s3504_s1 + $0x438] sm:$0xff]  ;;  %v2388_v33 = vld [vmem:[%s3504_s1 + $0x430] sm:$0xff] }
  0xbd   : > { %836 = vmatmul.f32.gmra.mxu3 %v749_v51  ;;  %1871 = vmatpush.msra.mxu0 %v2389_v50 }
  0xbe   : > { %v2905_v52 = vpop.f32.mrf.mxu2  ;;  %v2907_v53 = vpop.f32.mrf.mxu0  ;;  %1658 = vmatpush.msra.mxu3 %v2372_v12 }
  0xbf   : > { %1872 = vmatpush.msra.mxu0 %v2388_v33 }
  0xc0   : > { %v2913_v56 = vpop.f32.mrf.mxu1  ;;  %v2915_v57 = vpop.f32.mrf.mxu3 }
  0xc1   : > { %1050 = vmatmul.f32.gmra.mxu0 %v963_v54 }
  0xc3   : > { %447 = vmatmul.f32.gmra.mxu1 %v181_v58  ;;  %625 = vmatmul.f32.gmra.mxu2 %v748_v43 }
  0xc5   : > { %839 = vmatmul.f32.gmra.mxu3 %v750_v60 }
  0xc6   : > { %v2925_v62 = vpop.f32.mrf.mxu2  ;;  %v2927_v63 = vpop.f32.mrf.mxu0 }
  0xc8   : > { %v2930_v1 = vpop.f32.mrf.mxu1  ;;  %v2932_v2 = vpop.f32.mrf.mxu3 }
  0xc9   : > { %1053 = vmatmul.f32.gmra.mxu0 %v964_v0 }
  0xcb   : > { %450 = vmatmul.f32.gmra.mxu1 %v182_v3  ;;  %628 = vmatmul.f32.gmra.mxu2 %v749_v51  ;;  %v2356_v3 = vld [vmem:[%s3504_s1 + $0x330] sm:$0xff] }
  0xcc   : > { %1444 = vmatpush.msra.mxu2 %v2356_v3 }
  0xcd   : > { %842 = vmatmul.f32.gmra.mxu3 %v751_v5 }
  0xce   : > { %v2939_v6 = vpop.f32.mrf.mxu2  ;;  %v2941_v7 = vpop.f32.mrf.mxu0 }
  0xd0   : > { %v2944_v9 = vpop.f32.mrf.mxu1  ;;  %v2946_v10 = vpop.f32.mrf.mxu3 }
  0xd1   : > { %1056 = vmatmul.f32.gmra.mxu0 %v965_v8  ;;  %v970_v8 = vld [vmem:[%s2551_s22 + $0x93] sm:$0xff] }
  0xd3   : > { %453 = vmatmul.f32.gmra.mxu1 %v183_v11  ;;  %631 = vmatmul.f32.gmra.mxu2 %v750_v60  ;;  %v187_v60 = vld [vmem:[%s2551_s22 + $0x80] sm:$0xff] }
  0xd5   : > { %845 = vmatmul.f32.gmra.mxu3 %v752_v13 }
  0xd6   : > { %v2959_v16 = vpop.f32.mrf.mxu2  ;;  %v2961_v17 = vpop.f32.mrf.mxu0 }
  0xd8   : > { %v2964_v19 = vpop.f32.mrf.mxu1  ;;  %v2966_v20 = vpop.f32.mrf.mxu3 }
  0xd9   : > { %1059 = vmatmul.f32.gmra.mxu0 %v966_v18  ;;  %v2340_v18 = vld [vmem:[%s3504_s1 + $0x2b0] sm:$0xff] }
  0xda   : > { %1230 = vmatpush.msra.mxu1 %v2340_v18 }
  0xdb   : > { %456 = vmatmul.f32.gmra.mxu1 %v184_v21  ;;  %634 = vmatmul.f32.gmra.mxu2 %v751_v5  ;;  %v757_v21 = vld [vmem:[%s2551_s22 + $0x9a] sm:$0xff] }
  0xdd   : > { %848 = vmatmul.f32.gmra.mxu3 %v753_v22 }
  0xde   : > { %v2973_v24 = vpop.f32.mrf.mxu2  ;;  %v2975_v25 = vpop.f32.mrf.mxu0 }
  0xe0   : > { %v2978_v27 = vpop.f32.mrf.mxu1  ;;  %v2980_v28 = vpop.f32.mrf.mxu3 }
  0xe1   : > { %1062 = vmatmul.f32.gmra.mxu0 %v967_v26 }
  0xe3   : > { %459 = vmatmul.f32.gmra.mxu1 %v185_v29  ;;  %637 = vmatmul.f32.gmra.mxu2 %v752_v13 }
  0xe5   : > { %851 = vmatmul.f32.gmra.mxu3 %v754_v30 }
  0xe6   : > { %v2990_v34 = vpop.f32.mrf.mxu2  ;;  %v2992_v37 = vpop.f32.mrf.mxu0 }
  0xe8   : > { %v2998_v42 = vpop.f32.mrf.mxu1  ;;  %v3000_v43 = vpop.f32.mrf.mxu3 }
  0xe9   : > { %1065 = vmatmul.f32.gmra.mxu0 %v968_v38 }
  0xeb   : > { %462 = vmatmul.f32.gmra.mxu1 %v186_v46  ;;  %640 = vmatmul.f32.gmra.mxu2 %v753_v22  ;;  %v189_v46 = vld [vmem:[%s2551_s22 + $0x90] sm:$0xff] }
  0xed   : > { %854 = vmatmul.f32.gmra.mxu3 %v755_v47 }
  0xee   : > { %v3007_v51 = vpop.f32.mrf.mxu2  ;;  %v3009_v54 = vpop.f32.mrf.mxu0 }
  0xf0   : > { %v3012_v58 = vpop.f32.mrf.mxu3  ;;  %v418_v59 = vpop.f32.mrf.mxu1 }
  0xf1   : > { %1068 = vmatmul.f32.gmra.mxu0 %v969_v55  ;;  %v419_v0 = vadd.f32 %v418_v59, %v2876_v36 }
  0xf3   : > { %465 = vmatmul.f32.gmra.mxu1 %v187_v60  ;;  %643 = vmatmul.f32.gmra.mxu2 %v754_v30  ;;  %v971_v30 = vld [vmem:[%s2551_s22 + $0x9b] sm:$0xff] }
  0xf5   : > { %857 = vmatmul.f32.gmra.mxu3 %v756_v61 }
  0xf6   : > { %v596_v4 = vpop.f32.mrf.mxu2  ;;  %v1024_v5 = vpop.f32.mrf.mxu0 }
  0xf7   : > { %v704_v11 = vadd.f32 %v596_v4, %v419_v0  ;;  %v972_v0 = vld [vmem:[%s2551_s22 + $0xa3] sm:$0xff] }
  0xf8   : > { %v421_v13 = vpop.f32.mrf.mxu1  ;;  %v810_v14 = vpop.f32.mrf.mxu3  ;;  %v2355_v4 = vld [vmem:[%s3504_s1 + $0x328] sm:$0xff] }
  0xf9   : > { %v918_v36 = vadd.f32 %v810_v14, %v704_v11  ;;  %1071 = vmatmul.f32.gmra.mxu0 %v970_v8  ;;  %v422_v23 = vadd.f32 %v421_v13, %v2893_v45  ;;  %v190_v11 = vld [vmem:[%s2551_s22 + $0x98] sm:$0xff]  ;;  %1445 = vmatpush.msra.mxu2 %v2355_v4  ;;  %v2339_v14 = vld [vmem:[%s3504_s1 + $0x2a8] sm:$0xff] }
  0xfa   : > { %1231 = vmatpush.msra.mxu1 %v2339_v14 }
  0xfb   : > { %v3029_v22 = vadd.f32 %v1024_v5, %v918_v36  ;;  %468 = vmatmul.f32.gmra.mxu1 %v188_v15  ;;  %646 = vmatmul.f32.gmra.mxu2 %v755_v47  ;;  %v758_v47 = vld [vmem:[%s2551_s22 + $0xa2] sm:$0xff] }
  0xfd   : > { %860 = vmatmul.f32.gmra.mxu3 %v757_v21 }
  0xfe   : > { %v599_v26 = vpop.f32.mrf.mxu2  ;;  %v1027_v29 = vpop.f32.mrf.mxu0 }
  0xff   : > { %v705_v32 = vadd.f32 %v599_v26, %v422_v23  ;;  %v973_v23 = vld [vmem:[%s2551_s22 + $0xab] sm:$0xff] }
 0x100   : > { %v424_v38 = vpop.f32.mrf.mxu1  ;;  %v813_v41 = vpop.f32.mrf.mxu3 }
 0x101   : > { %v919_v50 = vadd.f32 %v813_v41, %v705_v32  ;;  %1074 = vmatmul.f32.gmra.mxu0 %v971_v30  ;;  %v425_v45 = vadd.f32 %v424_v38, %v2907_v53  ;;  %v2371_v53 = vld [vmem:[%s3504_s1 + $0x3a8] sm:$0xff]  ;;  %v191_v32 = vld [vmem:[%s2551_s22 + $0xa0] sm:$0xff]  ;;  %v760_v38 = vld [vmem:[%s2551_s22 + $0xb2] sm:$0xff] }
 0x102   : > { %1659 = vmatpush.msra.mxu3 %v2371_v53 }
 0x103   : > { %v3038_v55 = vadd.f32 %v1027_v29, %v919_v50  ;;  %471 = vmatmul.f32.gmra.mxu1 %v189_v46  ;;  %649 = vmatmul.f32.gmra.mxu2 %v756_v61  ;;  %v759_v61 = vld [vmem:[%s2551_s22 + $0xaa] sm:$0xff] }
 0x105   : > { %863 = vmatmul.f32.gmra.mxu3 %v758_v47 }
 0x106   : > { %v602_v59 = vpop.f32.mrf.mxu2  ;;  %v1030_v60 = vpop.f32.mrf.mxu0 }
 0x107   : > { %v706_v3 = vadd.f32 %v602_v59, %v425_v45  ;;  %v974_v45 = vld [vmem:[%s2551_s22 + $0xb3] sm:$0xff] }
 0x108   : > { %v427_v5 = vpop.f32.mrf.mxu1  ;;  %v816_v8 = vpop.f32.mrf.mxu3 }
 0x109   : > { %v920_v12 = vadd.f32 %v816_v8, %v706_v3  ;;  %1077 = vmatmul.f32.gmra.mxu0 %v972_v0  ;;  %v428_v15 = vadd.f32 %v427_v5, %v2927_v63  ;;  %v192_v3 = vld [vmem:[%s2551_s22 + $0xa8] sm:$0xff]  ;;  %v2354_v5 = vld [vmem:[%s3504_s1 + $0x320] sm:$0xff] }
 0x10a   : > { %v761_v8 = vld [vmem:[%s2551_s22 + $0xba] sm:$0xff]  ;;  %1446 = vmatpush.msra.mxu2 %v2354_v5 }
 0x10b   : > { %v3050_v13 = vadd.f32 %v1030_v60, %v920_v12  ;;  %474 = vmatmul.f32.gmra.mxu1 %v190_v11  ;;  %652 = vmatmul.f32.gmra.mxu2 %v757_v21  ;;  %v2387_v21 = vld [vmem:[%s3504_s1 + $0x428] sm:$0xff]  ;;  %v2338_v12 = vld [vmem:[%s3504_s1 + $0x2a0] sm:$0xff] }
 0x10c   : > { %1873 = vmatpush.msra.mxu0 %v2387_v21  ;;  %1232 = vmatpush.msra.mxu1 %v2338_v12 }
 0x10d   : > { %866 = vmatmul.f32.gmra.mxu3 %v759_v61 }
 0x10e   : > { %v605_v36 = vpop.f32.mrf.mxu2  ;;  %v1033_v18 = vpop.f32.mrf.mxu0 }
 0x10f   : > { %v707_v26 = vadd.f32 %v605_v36, %v428_v15  ;;  %v975_v15 = vld [vmem:[%s2551_s22 + $0xbb] sm:$0xff] }
 0x110   : > { %v430_v29 = vpop.f32.mrf.mxu1  ;;  %v819_v30 = vpop.f32.mrf.mxu3 }
 0x111   : > { %v921_v33 = vadd.f32 %v819_v30, %v707_v26  ;;  %1080 = vmatmul.f32.gmra.mxu0 %v973_v23  ;;  %v431_v41 = vadd.f32 %v430_v29, %v2941_v7  ;;  %v2370_v7 = vld [vmem:[%s3504_s1 + $0x3a0] sm:$0xff]  ;;  %v193_v23 = vld [vmem:[%s2551_s22 + $0xb0] sm:$0xff] }
 0x112   : > { %1660 = vmatpush.msra.mxu3 %v2370_v7  ;;  %v762_v29 = vld [vmem:[%s2551_s22 + $0xc2] sm:$0xff] }
 0x113   : > { %v3062_v63 = vadd.f32 %v1033_v18, %v921_v33  ;;  %477 = vmatmul.f32.gmra.mxu1 %v191_v32  ;;  %655 = vmatmul.f32.gmra.mxu2 %v758_v47 }
 0x115   : > { %869 = vmatmul.f32.gmra.mxu3 %v760_v38 }
 0x116   : > { %v608_v46 = vpop.f32.mrf.mxu2  ;;  %v1036_v50 = vpop.f32.mrf.mxu0 }
 0x117   : > { %v708_v59 = vadd.f32 %v608_v46, %v431_v41  ;;  %v976_v41 = vld [vmem:[%s2551_s22 + $0xc3] sm:$0xff] }
 0x118   : > { %v433_v60 = vpop.f32.mrf.mxu1  ;;  %v822_v0 = vpop.f32.mrf.mxu3 }
 0x119   : > { %v922_v4 = vadd.f32 %v822_v0, %v708_v59  ;;  %1083 = vmatmul.f32.gmra.mxu0 %v974_v45  ;;  %v434_v11 = vadd.f32 %v433_v60, %v2961_v17  ;;  %v2386_v17 = vld [vmem:[%s3504_s1 + $0x420] sm:$0xff]  ;;  %v194_v59 = vld [vmem:[%s2551_s22 + $0xb8] sm:$0xff]  ;;  %v763_v0 = vld [vmem:[%s2551_s22 + $0xca] sm:$0xff] }
 0x11a   : > { %1874 = vmatpush.msra.mxu0 %v2386_v17 }
 0x11b   : > { %v3071_v47 = vadd.f32 %v1036_v50, %v922_v4  ;;  %480 = vmatmul.f32.gmra.mxu1 %v192_v3  ;;  %658 = vmatmul.f32.gmra.mxu2 %v759_v61  ;;  %v2369_v4 = vld [vmem:[%s3504_s1 + $0x398] sm:$0xff] }
 0x11c   : > { %1661 = vmatpush.msra.mxu3 %v2369_v4 }
 0x11d   : > { %872 = vmatmul.f32.gmra.mxu3 %v761_v8 }
 0x11e   : > { %v611_v53 = vpop.f32.mrf.mxu2  ;;  %v1039_v14 = vpop.f32.mrf.mxu0 }
 0x11f   : > { %v709_v36 = vadd.f32 %v611_v53, %v434_v11  ;;  %v977_v11 = vld [vmem:[%s2551_s22 + $0xcb] sm:$0xff] }
 0x120   : > { %v436_v61 = vpop.f32.mrf.mxu1  ;;  %v825_v18 = vpop.f32.mrf.mxu3 }
 0x121   : > { %v923_v26 = vadd.f32 %v825_v18, %v709_v36  ;;  %1086 = vmatmul.f32.gmra.mxu0 %v975_v15  ;;  %v437_v32 = vadd.f32 %v436_v61, %v2975_v25  ;;  %v2353_v25 = vld [vmem:[%s3504_s1 + $0x318] sm:$0xff]  ;;  %v195_v15 = vld [vmem:[%s2551_s22 + $0xc0] sm:$0xff] }
 0x122   : > { %1447 = vmatpush.msra.mxu2 %v2353_v25  ;;  %v764_v36 = vld [vmem:[%s2551_s22 + $0xd2] sm:$0xff] }
 0x123   : > { %v3083_v30 = vadd.f32 %v1039_v14, %v923_v26  ;;  %483 = vmatmul.f32.gmra.mxu1 %v193_v23  ;;  %661 = vmatmul.f32.gmra.mxu2 %v760_v38  ;;  %v2385_v23 = vld [vmem:[%s3504_s1 + $0x418] sm:$0xff] }
 0x124   : > { %1875 = vmatpush.msra.mxu0 %v2385_v23 }
 0x125   : > { %875 = vmatmul.f32.gmra.mxu3 %v762_v29 }
 0x126   : > { %v614_v33 = vpop.f32.mrf.mxu2  ;;  %v1042_v21 = vpop.f32.mrf.mxu0 }
 0x127   : > { %v710_v46 = vadd.f32 %v614_v33, %v437_v32  ;;  %v978_v32 = vld [vmem:[%s2551_s22 + $0xd3] sm:$0xff] }
 0x128   : > { %v439_v50 = vpop.f32.mrf.mxu1  ;;  %v828_v45 = vpop.f32.mrf.mxu3 }
 0x129   : > { %v924_v60 = vadd.f32 %v828_v45, %v710_v46  ;;  %1089 = vmatmul.f32.gmra.mxu0 %v976_v41  ;;  %v440_v3 = vadd.f32 %v439_v50, %v2992_v37  ;;  %v196_v46 = vld [vmem:[%s2551_s22 + $0xc8] sm:$0xff] }
 0x12b   : > { %v3092_v38 = vadd.f32 %v1042_v21, %v924_v60  ;;  %486 = vmatmul.f32.gmra.mxu1 %v194_v59  ;;  %664 = vmatmul.f32.gmra.mxu2 %v761_v8  ;;  %v2337_v8 = vld [vmem:[%s3504_s1 + $0x298] sm:$0xff]  ;;  %v2352_v59 = vld [vmem:[%s3504_s1 + $0x310] sm:$0xff] }
 0x12c   : > { %1233 = vmatpush.msra.mxu1 %v2337_v8  ;;  %1448 = vmatpush.msra.mxu2 %v2352_v59  ;;  %v766_v8 = vld [vmem:[%s2551_s22 + $0xe2] sm:$0xff] }
 0x12d   : > { %878 = vmatmul.f32.gmra.mxu3 %v763_v0 }
 0x12e   : > { %v617_v5 = vpop.f32.mrf.mxu2  ;;  %v1045_v7 = vpop.f32.mrf.mxu0 }
 0x12f   : > { %v711_v12 = vadd.f32 %v617_v5, %v440_v3  ;;  %v979_v3 = vld [vmem:[%s2551_s22 + $0xdb] sm:$0xff]  ;;  %v2368_v5 = vld [vmem:[%s3504_s1 + $0x390] sm:$0xff] }
 0x130   : > { %v442_v53 = vpop.f32.mrf.mxu1  ;;  %v831_v14 = vpop.f32.mrf.mxu3  ;;  %1662 = vmatpush.msra.mxu3 %v2368_v5 }
 0x131   : > { %v925_v37 = vadd.f32 %v831_v14, %v711_v12  ;;  %1092 = vmatmul.f32.gmra.mxu0 %v977_v11  ;;  %v443_v18 = vadd.f32 %v442_v53, %v3009_v54  ;;  %v197_v11 = vld [vmem:[%s2551_s22 + $0xd0] sm:$0xff] }
 0x132   : > { %v2336_v12 = vld [vmem:[%s3504_s1 + $0x290] sm:$0xff] }
 0x133   : > { %v3107_v61 = vadd.f32 %v1045_v7, %v925_v37  ;;  %489 = vmatmul.f32.gmra.mxu1 %v195_v15  ;;  %667 = vmatmul.f32.gmra.mxu2 %v762_v29  ;;  %v765_v29 = vld [vmem:[%s2551_s22 + $0xda] sm:$0xff] }
 0x134   : > { %1234 = vmatpush.msra.mxu1 %v2336_v12 }
 0x135   : > { %881 = vmatmul.f32.gmra.mxu3 %v764_v36 }
 0x136   : > { %v620_v26 = vpop.f32.mrf.mxu2  ;;  %v1048_v17 = vpop.f32.mrf.mxu0 }
 0x137   : > { %v712_v33 = vadd.f32 %v620_v26, %v443_v18  ;;  %v980_v18 = vld [vmem:[%s2551_s22 + $0xe3] sm:$0xff]  ;;  %v2384_v26 = vld [vmem:[%s3504_s1 + $0x410] sm:$0xff] }
 0x138   : > { %v445_v21 = vpop.f32.mrf.mxu1  ;;  %v834_v41 = vpop.f32.mrf.mxu3  ;;  %1876 = vmatpush.msra.mxu0 %v2384_v26 }
 0x139   : > { %v926_v50 = vadd.f32 %v834_v41, %v712_v33  ;;  %1095 = vmatmul.f32.gmra.mxu0 %v978_v32  ;;  %v446_v54 = vadd.f32 %v445_v21, %v2867_v31  ;;  %v198_v33 = vld [vmem:[%s2551_s22 + $0xd8] sm:$0xff] }
 0x13b   : > { %v3116_v45 = vadd.f32 %v1048_v17, %v926_v50  ;;  %492 = vmatmul.f32.gmra.mxu1 %v196_v46  ;;  %670 = vmatmul.f32.gmra.mxu2 %v763_v0 }
 0x13d   : > { %884 = vmatmul.f32.gmra.mxu3 %v765_v29 }
 0x13e   : > { %v623_v60 = vpop.f32.mrf.mxu2  ;;  %v1051_v25 = vpop.f32.mrf.mxu0 }
 0x13f   : > { %v713_v4 = vadd.f32 %v623_v60, %v446_v54  ;;  %v981_v54 = vld [vmem:[%s2551_s22 + $0xeb] sm:$0xff] }
 0x140   : > { %v448_v7 = vpop.f32.mrf.mxu1  ;;  %v837_v0 = vpop.f32.mrf.mxu3  ;;  %v2351_v60 = vld [vmem:[%s3504_s1 + $0x308] sm:$0xff] }
 0x141   : > { %v927_v31 = vadd.f32 %v837_v0, %v713_v4  ;;  %1098 = vmatmul.f32.gmra.mxu0 %v979_v3  ;;  %v449_v14 = vadd.f32 %v448_v7, %v2882_v39  ;;  %v199_v4 = vld [vmem:[%s2551_s22 + $0xe0] sm:$0xff]  ;;  %1449 = vmatpush.msra.mxu2 %v2351_v60  ;;  %v2335_v0 = vld [vmem:[%s3504_s1 + $0x288] sm:$0xff] }
 0x142   : > { %1235 = vmatpush.msra.mxu1 %v2335_v0 }
 0x143   : > { %v3131_v53 = vadd.f32 %v1051_v25, %v927_v31  ;;  %495 = vmatmul.f32.gmra.mxu1 %v197_v11  ;;  %673 = vmatmul.f32.gmra.mxu2 %v764_v36  ;;  %v767_v36 = vld [vmem:[%s2551_s22 + $0xea] sm:$0xff] }
 0x145   : > { %887 = vmatmul.f32.gmra.mxu3 %v766_v8 }
 0x146   : > { %v626_v15 = vpop.f32.mrf.mxu2  ;;  %v1054_v37 = vpop.f32.mrf.mxu0 }
 0x147   : > { %v714_v23 = vadd.f32 %v626_v15, %v449_v14  ;;  %v982_v14 = vld [vmem:[%s2551_s22 + $0xf3] sm:$0xff] }
 0x148   : > { %v451_v17 = vpop.f32.mrf.mxu1  ;;  %v840_v32 = vpop.f32.mrf.mxu3 }
 0x149   : > { %v928_v21 = vadd.f32 %v840_v32, %v714_v23  ;;  %1101 = vmatmul.f32.gmra.mxu0 %v980_v18  ;;  %v452_v39 = vadd.f32 %v451_v17, %v2899_v48  ;;  %v2367_v48 = vld [vmem:[%s3504_s1 + $0x388] sm:$0xff]  ;;  %v769_v17 = vld [vmem:[%s2551_s22 + $0xfa] sm:$0xff] }
 0x14a   : > { %1663 = vmatpush.msra.mxu3 %v2367_v48  ;;  %v200_v23 = vld [vmem:[%s2551_s22 + $0xe8] sm:$0xff] }
 0x14b   : > { %v3140_v41 = vadd.f32 %v1054_v37, %v928_v21  ;;  %498 = vmatmul.f32.gmra.mxu1 %v198_v33  ;;  %676 = vmatmul.f32.gmra.mxu2 %v765_v29  ;;  %v768_v29 = vld [vmem:[%s2551_s22 + $0xf2] sm:$0xff] }
 0x14d   : > { %890 = vmatmul.f32.gmra.mxu3 %v767_v36 }
 0x14e   : > { %v629_v46 = vpop.f32.mrf.mxu2  ;;  %v1057_v50 = vpop.f32.mrf.mxu0 }
 0x14f   : > { %v715_v59 = vadd.f32 %v629_v46, %v452_v39  ;;  %v983_v39 = vld [vmem:[%s2551_s22 + $0xfb] sm:$0xff] }
 0x150   : > { %v454_v25 = vpop.f32.mrf.mxu1  ;;  %v843_v3 = vpop.f32.mrf.mxu3 }
 0x151   : > { %v929_v5 = vadd.f32 %v843_v3, %v715_v59  ;;  %1104 = vmatmul.f32.gmra.mxu0 %v981_v54  ;;  %v455_v11 = vadd.f32 %v454_v25, %v2913_v56  ;;  %v201_v59 = vld [vmem:[%s2551_s22 + $0xf0] sm:$0xff]  ;;  %v2350_v25 = vld [vmem:[%s3504_s1 + $0x300] sm:$0xff] }
 0x152   : > { %v770_v3 = vld [vmem:[%s2551_s22 + $0x102] sm:$0xff]  ;;  %1450 = vmatpush.msra.mxu2 %v2350_v25  ;;  %v986_v25 = vld [vmem:[%s2551_s22 + $0x113] sm:$0xff] }
 0x153   : > { %v3152_v7 = vadd.f32 %v1057_v50, %v929_v5  ;;  %501 = vmatmul.f32.gmra.mxu1 %v199_v4  ;;  %679 = vmatmul.f32.gmra.mxu2 %v766_v8  ;;  %v2383_v8 = vld [vmem:[%s3504_s1 + $0x408] sm:$0xff]  ;;  %v2334_v5 = vld [vmem:[%s3504_s1 + $0x280] sm:$0xff] }
 0x154   : > { %1877 = vmatpush.msra.mxu0 %v2383_v8  ;;  %1236 = vmatpush.msra.mxu1 %v2334_v5 }
 0x155   : > { %893 = vmatmul.f32.gmra.mxu3 %v768_v29 }
 0x156   : > { %v632_v31 = vpop.f32.mrf.mxu2  ;;  %v1060_v12 = vpop.f32.mrf.mxu0 }
 0x157   : > { %v716_v15 = vadd.f32 %v632_v31, %v455_v11  ;;  %v984_v11 = vld [vmem:[%s2551_s22 + $0x103] sm:$0xff] }
 0x158   : > { %v457_v37 = vpop.f32.mrf.mxu1  ;;  %v846_v18 = vpop.f32.mrf.mxu3 }
 0x159   : > { %v930_v26 = vadd.f32 %v846_v18, %v716_v15  ;;  %1107 = vmatmul.f32.gmra.mxu0 %v982_v14  ;;  %v458_v32 = vadd.f32 %v457_v37, %v2930_v1  ;;  %v2366_v1 = vld [vmem:[%s3504_s1 + $0x380] sm:$0xff]  ;;  %v202_v14 = vld [vmem:[%s2551_s22 + $0xf8] sm:$0xff]  ;;  %v771_v37 = vld [vmem:[%s2551_s22 + $0x10a] sm:$0xff] }
 0x15a   : > { %1664 = vmatpush.msra.mxu3 %v2366_v1 }
 0x15b   : > { %v3164_v56 = vadd.f32 %v1060_v12, %v930_v26  ;;  %504 = vmatmul.f32.gmra.mxu1 %v200_v23  ;;  %682 = vmatmul.f32.gmra.mxu2 %v767_v36 }
 0x15d   : > { %896 = vmatmul.f32.gmra.mxu3 %v769_v17 }
 0x15e   : > { %v635_v33 = vpop.f32.mrf.mxu2  ;;  %v1063_v21 = vpop.f32.mrf.mxu0 }
 0x15f   : > { %v717_v46 = vadd.f32 %v635_v33, %v458_v32  ;;  %v985_v32 = vld [vmem:[%s2551_s22 + $0x10b] sm:$0xff] }
 0x160   : > { %v460_v50 = vpop.f32.mrf.mxu1  ;;  %v849_v54 = vpop.f32.mrf.mxu3 }
 0x161   : > { %v931_v60 = vadd.f32 %v849_v54, %v717_v46  ;;  %1110 = vmatmul.f32.gmra.mxu0 %v983_v39  ;;  %v461_v4 = vadd.f32 %v460_v50, %v2944_v9  ;;  %v2382_v9 = vld [vmem:[%s3504_s1 + $0x400] sm:$0xff] }
 0x162   : > { %1878 = vmatpush.msra.mxu0 %v2382_v9  ;;  %v203_v46 = vld [vmem:[%s2551_s22 + $0x100] sm:$0xff] }
 0x163   : > { %v3173_v36 = vadd.f32 %v1063_v21, %v931_v60  ;;  %507 = vmatmul.f32.gmra.mxu1 %v201_v59  ;;  %685 = vmatmul.f32.gmra.mxu2 %v768_v29 }
 0x165   : > { %899 = vmatmul.f32.gmra.mxu3 %v770_v3 }
 0x166   : > { %v638_v48 = vpop.f32.mrf.mxu2  ;;  %v1066_v0 = vpop.f32.mrf.mxu0 }
 0x167   : > { %v718_v31 = vadd.f32 %v638_v48, %v461_v4  ;;  %v204_v48 = vld [vmem:[%s2551_s22 + $0x108] sm:$0xff] }
 0x168   : > { %v463_v29 = vpop.f32.mrf.mxu1  ;;  %v852_v12 = vpop.f32.mrf.mxu3 }
 0x169   : > { %v932_v15 = vadd.f32 %v852_v12, %v718_v31  ;;  %1113 = vmatmul.f32.gmra.mxu0 %v984_v11  ;;  %v464_v23 = vadd.f32 %v463_v29, %v2964_v19  ;;  %v773_v11 = vld [vmem:[%s2551_s22 + $0x11a] sm:$0xff] }
 0x16a   : > { %v987_v12 = vld [vmem:[%s2551_s22 + $0x11b] sm:$0xff] }
 0x16b   : > { %v3185_v18 = vadd.f32 %v1066_v0, %v932_v15  ;;  %510 = vmatmul.f32.gmra.mxu1 %v202_v14  ;;  %688 = vmatmul.f32.gmra.mxu2 %v769_v17  ;;  %v772_v17 = vld [vmem:[%s2551_s22 + $0x112] sm:$0xff] }
 0x16d   : > { %902 = vmatmul.f32.gmra.mxu3 %v771_v37 }
 0x16e   : > { %v641_v26 = vpop.f32.mrf.mxu2  ;;  %v1069_v8 = vpop.f32.mrf.mxu0 }
 0x16f   : > { %v719_v33 = vadd.f32 %v641_v26, %v464_v23  ;;  %v205_v23 = vld [vmem:[%s2551_s22 + $0x110] sm:$0xff] }
 0x170   : > { %v466_v21 = vpop.f32.mrf.mxu1  ;;  %v855_v39 = vpop.f32.mrf.mxu3 }
 0x171   : > { %v933_v50 = vadd.f32 %v855_v39, %v719_v33  ;;  %1116 = vmatmul.f32.gmra.mxu0 %v985_v32  ;;  %v467_v19 = vadd.f32 %v466_v21, %v2978_v27  ;;  %v988_v21 = vld [vmem:[%s2551_s22 + $0x123] sm:$0xff] }
 0x173   : > { %v3194_v54 = vadd.f32 %v1069_v8, %v933_v50  ;;  %513 = vmatmul.f32.gmra.mxu1 %v203_v46  ;;  %691 = vmatmul.f32.gmra.mxu2 %v770_v3  ;;  %v774_v8 = vld [vmem:[%s2551_s22 + $0x122] sm:$0xff] }
 0x175   : > { %905 = vmatmul.f32.gmra.mxu3 %v772_v17 }
 0x176   : > { %v644_v59 = vpop.f32.mrf.mxu2  ;;  %v1072_v60 = vpop.f32.mrf.mxu0 }
 0x177   : > { %v720_v1 = vadd.f32 %v644_v59, %v467_v19  ;;  %v206_v19 = vld [vmem:[%s2551_s22 + $0x118] sm:$0xff] }
 0x178   : > { %v469_v4 = vpop.f32.mrf.mxu1  ;;  %v858_v5 = vpop.f32.mrf.mxu3 }
 0x179   : > { %v934_v0 = vadd.f32 %v858_v5, %v720_v1  ;;  %1119 = vmatmul.f32.gmra.mxu0 %v986_v25  ;;  %v470_v27 = vadd.f32 %v469_v4, %v2998_v42  ;;  %v989_v4 = vld [vmem:[%s2551_s22 + $0x12b] sm:$0xff] }
 0x17b   : > { %v3200_v31 = vadd.f32 %v1072_v60, %v934_v0  ;;  %516 = vmatmul.f32.gmra.mxu1 %v204_v48  ;;  %694 = vmatmul.f32.gmra.mxu2 %v771_v37  ;;  %v775_v60 = vld [vmem:[%s2551_s22 + $0x12a] sm:$0xff] }
 0x17d   : > { %908 = vmatmul.f32.gmra.mxu3 %v773_v11 }
 0x17e   : > { %v647_v3 = vpop.f32.mrf.mxu2  ;;  %v1075_v29 = vpop.f32.mrf.mxu0 }
 0x17f   : > { %v721_v14 = vadd.f32 %v647_v3, %v470_v27  ;;  %v1168_v27 = vld [vmem:[%s2551_s22 + $0x14] sm:$0xff]  ;;  %v1382_v3 = vld [vmem:[%s2551_s22 + $0x24] sm:$0xff] }
 0x180   : > { %v472_v15 = vpop.f32.mrf.mxu1  ;;  %v861_v9 = vpop.f32.mrf.mxu3 }
 0x181   : > { %v935_v26 = vadd.f32 %v861_v9, %v721_v14  ;;  %1122 = vmatmul.f32.gmra.mxu0 %v987_v12  ;;  %v473_v42 = vadd.f32 %v472_v15, %v2874_v35  ;;  %v1596_v12 = vld [vmem:[%s2551_s22 + $0x25] sm:$0xff] }
 0x182   : > { %v1810_v9 = vld [vmem:[%s2551_s22 + $0x26] sm:$0xff] }
 0x183   : > { %v3206_v32 = vadd.f32 %v1075_v29, %v935_v26  ;;  %519 = vmatmul.f32.gmra.mxu1 %v205_v23  ;;  %697 = vmatmul.f32.gmra.mxu2 %v772_v17 }
 0x185   : > { %911 = vmatmul.f32.gmra.mxu3 %v774_v8 }
 0x186   : > { %v650_v37 = vpop.f32.mrf.mxu2  ;;  %v1078_v33 = vpop.f32.mrf.mxu0 }
 0x187   : > { %v722_v39 = vadd.f32 %v650_v37, %v473_v42  ;;  %v1169_v42 = vld [vmem:[%s2551_s22 + $0x1c] sm:$0xff]  ;;  %v1383_v37 = vld [vmem:[%s2551_s22 + $0x2c] sm:$0xff] }
 0x188   : > { %v475_v46 = vpop.f32.mrf.mxu1  ;;  %v864_v50 = vpop.f32.mrf.mxu3 }
 0x189   : > { %v936_v59 = vadd.f32 %v864_v50, %v722_v39  ;;  %1125 = vmatmul.f32.gmra.mxu0 %v988_v21  ;;  %v476_v35 = vadd.f32 %v475_v46, %v2891_v44  ;;  %v1597_v21 = vld [vmem:[%s2551_s22 + $0x2d] sm:$0xff] }
 0x18b   : > { %v3212_v25 = vadd.f32 %v1078_v33, %v936_v59  ;;  %522 = vmatmul.f32.gmra.mxu1 %v206_v19  ;;  %700 = vmatmul.f32.gmra.mxu2 %v773_v11  ;;  %v1811_v19 = vld [vmem:[%s2551_s22 + $0x2e] sm:$0xff] }
 0x18d   : > { %914 = vmatmul.f32.gmra.mxu3 %v775_v60 }
 0x18e   : > { %v653_v17 = vpop.f32.mrf.mxu2  ;;  %v1081_v1 = vpop.f32.mrf.mxu0 }
 0x18f   : > { %v723_v5 = vadd.f32 %v653_v17, %v476_v35  ;;  %v1384_v17 = vld [vmem:[%s2551_s22 + $0x34] sm:$0xff] }
 0x190   : > { %v478_v48 = vpop.f32.mrf.mxu1  ;;  %v867_v0 = vpop.f32.mrf.mxu3 }
 0x191   : > { %v937_v29 = vadd.f32 %v867_v0, %v723_v5  ;;  %1128 = vmatmul.f32.gmra.mxu0 %v989_v4  ;;  %v479_v44 = vadd.f32 %v478_v48, %v2905_v52  ;;  %v1598_v4 = vld [vmem:[%s2551_s22 + $0x35] sm:$0xff] }
 0x193   : > { %v3219_v14 = vadd.f32 %v1081_v1, %v937_v29  ;;  %1237 = vmatmul.f32.vlgmr.msra.gmra.mxu1 %v1168_v27  ;;  %1451 = vmatmul.f32.vlgmr.msra.gmra.mxu2 %v1382_v3  ;;  %v1812_v27 = vld [vmem:[%s2551_s22 + $0x36] sm:$0xff] }
 0x195   : > { %1665 = vmatmul.f32.vlgmr.msra.gmra.mxu3 %v1596_v12 }
 0x196   : > { %v656_v11 = vpop.f32.mrf.mxu2  ;;  %v1084_v15 = vpop.f32.mrf.mxu0 }
 0x197   : > { %v724_v23 = vadd.f32 %v656_v11, %v479_v44  ;;  %v1385_v11 = vld [vmem:[%s2551_s22 + $0x3c] sm:$0xff] }
 0x198   : > { %v481_v26 = vpop.f32.mrf.mxu1  ;;  %v870_v8 = vpop.f32.mrf.mxu3 }
 0x199   : > { %v938_v33 = vadd.f32 %v870_v8, %v724_v23  ;;  %1879 = vmatmul.f32.vlgmr.msra.gmra.mxu0 %v1810_v9  ;;  %v482_v52 = vadd.f32 %v481_v26, %v2925_v62  ;;  %v1599_v9 = vld [vmem:[%s2551_s22 + $0x3d] sm:$0xff] }
 0x19a   : > { %v1813_v8 = vld [vmem:[%s2551_s22 + $0x3e] sm:$0xff] }
 0x19b   : > { %v3226_v39 = vadd.f32 %v1084_v15, %v938_v33  ;;  %1240 = vmatmul.f32.gmra.mxu1 %v1169_v42  ;;  %1454 = vmatmul.f32.gmra.mxu2 %v1383_v37 }
 0x19d   : > { %1668 = vmatmul.f32.gmra.mxu3 %v1597_v21 }
 0x19e   : > { %v659_v46 = vpop.f32.mrf.mxu2  ;;  %v1087_v50 = vpop.f32.mrf.mxu0 }
 0x19f   : > { %v725_v59 = vadd.f32 %v659_v46, %v482_v52  ;;  %v1386_v52 = vld [vmem:[%s2551_s22 + $0x44] sm:$0xff] }
 0x1a0   : > { %v484_v60 = vpop.f32.mrf.mxu1  ;;  %v873_v35 = vpop.f32.mrf.mxu3 }
 0x1a1   : > { %v939_v1 = vadd.f32 %v873_v35, %v725_v59  ;;  %1882 = vmatmul.f32.gmra.mxu0 %v1811_v19  ;;  %v485_v62 = vadd.f32 %v484_v60, %v2939_v6  ;;  %v1814_v60 = vld [vmem:[%s2551_s22 + $0x46] sm:$0xff] }
 0x1a3   : > { %v3232_v5 = vadd.f32 %v1087_v50, %v939_v1  ;;  %1243 = vmatmul.f32.gmra.mxu1 %v1382_v3  ;;  %1457 = vmatmul.f32.gmra.mxu2 %v1384_v17  ;;  %v1600_v50 = vld [vmem:[%s2551_s22 + $0x45] sm:$0xff] }
 0x1a5   : > { %1671 = vmatmul.f32.gmra.mxu3 %v1598_v4 }
 0x1a6   : > { %v662_v48 = vpop.f32.mrf.mxu2  ;;  %v1090_v0 = vpop.f32.mrf.mxu0 }
 0x1a7   : > { %v726_v29 = vadd.f32 %v662_v48, %v485_v62  ;;  %v1387_v62 = vld [vmem:[%s2551_s22 + $0x4c] sm:$0xff] }
 0x1a8   : > { %v487_v12 = vpop.f32.mrf.mxu1  ;;  %v876_v44 = vpop.f32.mrf.mxu3 }
 0x1a9   : > { %v940_v15 = vadd.f32 %v876_v44, %v726_v29  ;;  %1885 = vmatmul.f32.gmra.mxu0 %v1812_v27  ;;  %v488_v6 = vadd.f32 %v487_v12, %v2959_v16  ;;  %v1815_v12 = vld [vmem:[%s2551_s22 + $0x4e] sm:$0xff] }
 0x1ab   : > { %v3238_v23 = vadd.f32 %v1090_v0, %v940_v15  ;;  %1246 = vmatmul.f32.gmra.mxu1 %v1383_v37  ;;  %1460 = vmatmul.f32.gmra.mxu2 %v1385_v11  ;;  %v1601_v0 = vld [vmem:[%s2551_s22 + $0x4d] sm:$0xff] }
 0x1ad   : > { %1674 = vmatmul.f32.gmra.mxu3 %v1599_v9 }
 0x1ae   : > { %v665_v3 = vpop.f32.mrf.mxu2  ;;  %v1093_v26 = vpop.f32.mrf.mxu0 }
 0x1af   : > { %v727_v42 = vadd.f32 %v665_v3, %v488_v6  ;;  %v1388_v6 = vld [vmem:[%s2551_s22 + $0x54] sm:$0xff] }
 0x1b0   : > { %v490_v33 = vpop.f32.mrf.mxu1  ;;  %v879_v21 = vpop.f32.mrf.mxu3 }
 0x1b1   : > { %v941_v46 = vadd.f32 %v879_v21, %v727_v42  ;;  %1888 = vmatmul.f32.gmra.mxu0 %v1813_v8  ;;  %v491_v16 = vadd.f32 %v490_v33, %v2973_v24  ;;  %v1816_v33 = vld [vmem:[%s2551_s22 + $0x56] sm:$0xff] }
 0x1b3   : > { %v3244_v19 = vadd.f32 %v1093_v26, %v941_v46  ;;  %1249 = vmatmul.f32.gmra.mxu1 %v1384_v17  ;;  %1463 = vmatmul.f32.gmra.mxu2 %v1386_v52  ;;  %v1602_v26 = vld [vmem:[%s2551_s22 + $0x55] sm:$0xff] }
 0x1b5   : > { %1677 = vmatmul.f32.gmra.mxu3 %v1600_v50 }
 0x1b6   : > { %v668_v37 = vpop.f32.mrf.mxu2  ;;  %v1096_v59 = vpop.f32.mrf.mxu0 }
 0x1b7   : > { %v728_v35 = vadd.f32 %v668_v37, %v491_v16  ;;  %v1389_v16 = vld [vmem:[%s2551_s22 + $0x5c] sm:$0xff] }
 0x1b8   : > { %v493_v1 = vpop.f32.mrf.mxu1  ;;  %v882_v4 = vpop.f32.mrf.mxu3 }
 0x1b9   : > { %v942_v48 = vadd.f32 %v882_v4, %v728_v35  ;;  %1891 = vmatmul.f32.gmra.mxu0 %v1814_v60  ;;  %v494_v24 = vadd.f32 %v493_v1, %v2990_v34  ;;  %v1817_v1 = vld [vmem:[%s2551_s22 + $0x5e] sm:$0xff] }
 0x1bb   : > { %v3250_v27 = vadd.f32 %v1096_v59, %v942_v48  ;;  %1252 = vmatmul.f32.gmra.mxu1 %v1385_v11  ;;  %1466 = vmatmul.f32.gmra.mxu2 %v1387_v62  ;;  %v1603_v59 = vld [vmem:[%s2551_s22 + $0x5d] sm:$0xff] }
 0x1bd   : > { %1680 = vmatmul.f32.gmra.mxu3 %v1601_v0 }
 0x1be   : > { %v671_v17 = vpop.f32.mrf.mxu2  ;;  %v1099_v29 = vpop.f32.mrf.mxu0 }
 0x1bf   : > { %v729_v44 = vadd.f32 %v671_v17, %v494_v24  ;;  %v1390_v24 = vld [vmem:[%s2551_s22 + $0x64] sm:$0xff] }
 0x1c0   : > { %v496_v15 = vpop.f32.mrf.mxu1  ;;  %v885_v9 = vpop.f32.mrf.mxu3 }
 0x1c1   : > { %v943_v3 = vadd.f32 %v885_v9, %v729_v44  ;;  %1894 = vmatmul.f32.gmra.mxu0 %v1815_v12  ;;  %v497_v34 = vadd.f32 %v496_v15, %v3007_v51  ;;  %v1818_v15 = vld [vmem:[%s2551_s22 + $0x66] sm:$0xff] }
 0x1c3   : > { %v3256_v8 = vadd.f32 %v1099_v29, %v943_v3  ;;  %1255 = vmatmul.f32.gmra.mxu1 %v1386_v52  ;;  %1469 = vmatmul.f32.gmra.mxu2 %v1388_v6  ;;  %v1604_v29 = vld [vmem:[%s2551_s22 + $0x65] sm:$0xff] }
 0x1c5   : > { %1683 = vmatmul.f32.gmra.mxu3 %v1602_v26 }
 0x1c6   : > { %v674_v11 = vpop.f32.mrf.mxu2  ;;  %v1102_v42 = vpop.f32.mrf.mxu0 }
 0x1c7   : > { %v730_v21 = vadd.f32 %v674_v11, %v497_v34  ;;  %v1391_v34 = vld [vmem:[%s2551_s22 + $0x6c] sm:$0xff] }
 0x1c8   : > { %v499_v46 = vpop.f32.mrf.mxu1  ;;  %v888_v50 = vpop.f32.mrf.mxu3 }
 0x1c9   : > { %v944_v37 = vadd.f32 %v888_v50, %v730_v21  ;;  %1897 = vmatmul.f32.gmra.mxu0 %v1816_v33  ;;  %v500_v51 = vadd.f32 %v499_v46, %v2884_v40  ;;  %v1819_v46 = vld [vmem:[%s2551_s22 + $0x6e] sm:$0xff] }
 0x1cb   : > { %v3262_v60 = vadd.f32 %v1102_v42, %v944_v37  ;;  %1258 = vmatmul.f32.gmra.mxu1 %v1387_v62  ;;  %1472 = vmatmul.f32.gmra.mxu2 %v1389_v16  ;;  %v1605_v42 = vld [vmem:[%s2551_s22 + $0x6d] sm:$0xff] }
 0x1cd   : > { %1686 = vmatmul.f32.gmra.mxu3 %v1603_v59 }
 0x1ce   : > { %v677_v52 = vpop.f32.mrf.mxu2  ;;  %v1105_v35 = vpop.f32.mrf.mxu0 }
 0x1cf   : > { %v731_v4 = vadd.f32 %v677_v52, %v500_v51  ;;  %v1392_v51 = vld [vmem:[%s2551_s22 + $0x74] sm:$0xff] }
 0x1d0   : > { %v502_v48 = vpop.f32.mrf.mxu1  ;;  %v891_v0 = vpop.f32.mrf.mxu3 }
 0x1d1   : > { %v945_v17 = vadd.f32 %v891_v0, %v731_v4  ;;  %1900 = vmatmul.f32.gmra.mxu0 %v1817_v1  ;;  %v503_v40 = vadd.f32 %v502_v48, %v2901_v49  ;;  %v1820_v48 = vld [vmem:[%s2551_s22 + $0x76] sm:$0xff] }
 0x1d3   : > { %v3268_v12 = vadd.f32 %v1105_v35, %v945_v17  ;;  %1261 = vmatmul.f32.gmra.mxu1 %v1388_v6  ;;  %1475 = vmatmul.f32.gmra.mxu2 %v1390_v24  ;;  %v1606_v35 = vld [vmem:[%s2551_s22 + $0x75] sm:$0xff] }
 0x1d5   : > { %1689 = vmatmul.f32.gmra.mxu3 %v1604_v29 }
 0x1d6   : > { %v680_v62 = vpop.f32.mrf.mxu2  ;;  %v1108_v44 = vpop.f32.mrf.mxu0 }
 0x1d7   : > { %v732_v9 = vadd.f32 %v680_v62, %v503_v40  ;;  %v1393_v40 = vld [vmem:[%s2551_s22 + $0x7c] sm:$0xff] }
 0x1d8   : > { %v505_v3 = vpop.f32.mrf.mxu1  ;;  %v894_v26 = vpop.f32.mrf.mxu3 }
 0x1d9   : > { %v946_v11 = vadd.f32 %v894_v26, %v732_v9  ;;  %1903 = vmatmul.f32.gmra.mxu0 %v1818_v15  ;;  %v506_v49 = vadd.f32 %v505_v3, %v2915_v57  ;;  %v1821_v3 = vld [vmem:[%s2551_s22 + $0x7e] sm:$0xff] }
 0x1db   : > { %v3274_v33 = vadd.f32 %v1108_v44, %v946_v11  ;;  %1264 = vmatmul.f32.gmra.mxu1 %v1389_v16  ;;  %1478 = vmatmul.f32.gmra.mxu2 %v1391_v34  ;;  %v1607_v44 = vld [vmem:[%s2551_s22 + $0x7d] sm:$0xff] }
 0x1dd   : > { %1692 = vmatmul.f32.gmra.mxu3 %v1605_v42 }
 0x1de   : > { %v683_v6 = vpop.f32.mrf.mxu2  ;;  %v1111_v21 = vpop.f32.mrf.mxu0 }
 0x1df   : > { %v733_v50 = vadd.f32 %v683_v6, %v506_v49  ;;  %v1394_v49 = vld [vmem:[%s2551_s22 + $0x84] sm:$0xff] }
 0x1e0   : > { %v508_v37 = vpop.f32.mrf.mxu1  ;;  %v897_v59 = vpop.f32.mrf.mxu3 }
 0x1e1   : > { %v947_v52 = vadd.f32 %v897_v59, %v733_v50  ;;  %1906 = vmatmul.f32.gmra.mxu0 %v1819_v46  ;;  %v509_v57 = vadd.f32 %v508_v37, %v2932_v2  ;;  %v1822_v37 = vld [vmem:[%s2551_s22 + $0x86] sm:$0xff] }
 0x1e3   : > { %v3280_v1 = vadd.f32 %v1111_v21, %v947_v52  ;;  %1267 = vmatmul.f32.gmra.mxu1 %v1390_v24  ;;  %1481 = vmatmul.f32.gmra.mxu2 %v1392_v51  ;;  %v1608_v21 = vld [vmem:[%s2551_s22 + $0x85] sm:$0xff] }
 0x1e5   : > { %1695 = vmatmul.f32.gmra.mxu3 %v1606_v35 }
 0x1e6   : > { %v686_v16 = vpop.f32.mrf.mxu2  ;;  %v1114_v4 = vpop.f32.mrf.mxu0 }
 0x1e7   : > { %v734_v0 = vadd.f32 %v686_v16, %v509_v57  ;;  %v1395_v57 = vld [vmem:[%s2551_s22 + $0x8c] sm:$0xff] }
 0x1e8   : > { %v511_v17 = vpop.f32.mrf.mxu1  ;;  %v900_v29 = vpop.f32.mrf.mxu3 }
 0x1e9   : > { %v948_v62 = vadd.f32 %v900_v29, %v734_v0  ;;  %1909 = vmatmul.f32.gmra.mxu0 %v1820_v48  ;;  %v512_v2 = vadd.f32 %v511_v17, %v2946_v10  ;;  %v1823_v17 = vld [vmem:[%s2551_s22 + $0x8e] sm:$0xff] }
 0x1eb   : > { %v3286_v15 = vadd.f32 %v1114_v4, %v948_v62  ;;  %1270 = vmatmul.f32.gmra.mxu1 %v1391_v34  ;;  %1484 = vmatmul.f32.gmra.mxu2 %v1393_v40  ;;  %v1609_v4 = vld [vmem:[%s2551_s22 + $0x8d] sm:$0xff] }
 0x1ed   : > { %1698 = vmatmul.f32.gmra.mxu3 %v1607_v44 }
 0x1ee   : > { %v689_v24 = vpop.f32.mrf.mxu2  ;;  %v1117_v9 = vpop.f32.mrf.mxu0 }
 0x1ef   : > { %v735_v26 = vadd.f32 %v689_v24, %v512_v2  ;;  %v1396_v2 = vld [vmem:[%s2551_s22 + $0x94] sm:$0xff] }
 0x1f0   : > { %v514_v11 = vpop.f32.mrf.mxu1  ;;  %v903_v42 = vpop.f32.mrf.mxu3 }
 0x1f1   : > { %v949_v6 = vadd.f32 %v903_v42, %v735_v26  ;;  %1912 = vmatmul.f32.gmra.mxu0 %v1821_v3  ;;  %v515_v10 = vadd.f32 %v514_v11, %v2966_v20  ;;  %v1824_v11 = vld [vmem:[%s2551_s22 + $0x96] sm:$0xff] }
 0x1f3   : > { %v3292_v46 = vadd.f32 %v1117_v9, %v949_v6  ;;  %1273 = vmatmul.f32.gmra.mxu1 %v1392_v51  ;;  %1487 = vmatmul.f32.gmra.mxu2 %v1394_v49  ;;  %v1610_v9 = vld [vmem:[%s2551_s22 + $0x95] sm:$0xff] }
 0x1f5   : > { %1701 = vmatmul.f32.gmra.mxu3 %v1608_v21 }
 0x1f6   : > { %v692_v34 = vpop.f32.mrf.mxu2  ;;  %v1120_v50 = vpop.f32.mrf.mxu0 }
 0x1f7   : > { %v736_v59 = vadd.f32 %v692_v34, %v515_v10  ;;  %v1397_v10 = vld [vmem:[%s2551_s22 + $0x9c] sm:$0xff] }
 0x1f8   : > { %v517_v52 = vpop.f32.mrf.mxu1  ;;  %v906_v35 = vpop.f32.mrf.mxu3 }
 0x1f9   : > { %v950_v16 = vadd.f32 %v906_v35, %v736_v59  ;;  %1915 = vmatmul.f32.gmra.mxu0 %v1822_v37  ;;  %v518_v20 = vadd.f32 %v517_v52, %v2980_v28  ;;  %v1825_v52 = vld [vmem:[%s2551_s22 + $0x9e] sm:$0xff] }
 0x1fb   : > { %v3298_v48 = vadd.f32 %v1120_v50, %v950_v16  ;;  %1276 = vmatmul.f32.gmra.mxu1 %v1393_v40  ;;  %1490 = vmatmul.f32.gmra.mxu2 %v1395_v57  ;;  %v1611_v50 = vld [vmem:[%s2551_s22 + $0x9d] sm:$0xff] }
 0x1fd   : > { %1704 = vmatmul.f32.gmra.mxu3 %v1609_v4 }
 0x1fe   : > { %v695_v51 = vpop.f32.mrf.mxu2  ;;  %v1123_v0 = vpop.f32.mrf.mxu0 }
 0x1ff   : > { %v737_v29 = vadd.f32 %v695_v51, %v518_v20  ;;  %v1398_v20 = vld [vmem:[%s2551_s22 + $0xa4] sm:$0xff] }
 0x200   : > { %v520_v62 = vpop.f32.mrf.mxu1  ;;  %v909_v44 = vpop.f32.mrf.mxu3 }
 0x201   : > { %v951_v24 = vadd.f32 %v909_v44, %v737_v29  ;;  %1918 = vmatmul.f32.gmra.mxu0 %v1823_v17  ;;  %v521_v28 = vadd.f32 %v520_v62, %v3000_v43  ;;  %v1826_v62 = vld [vmem:[%s2551_s22 + $0xa6] sm:$0xff] }
 0x203   : > { %v3304_v3 = vadd.f32 %v1123_v0, %v951_v24  ;;  %1279 = vmatmul.f32.gmra.mxu1 %v1394_v49  ;;  %1493 = vmatmul.f32.gmra.mxu2 %v1396_v2  ;;  %v1612_v0 = vld [vmem:[%s2551_s22 + $0xa5] sm:$0xff] }
 0x205   : > { %1707 = vmatmul.f32.gmra.mxu3 %v1610_v9 }
 0x206   : > { %v698_v40 = vpop.f32.mrf.mxu2  ;;  %v1126_v26 = vpop.f32.mrf.mxu0 }
 0x207   : > { %v738_v42 = vadd.f32 %v698_v40, %v521_v28  ;;  %v1399_v28 = vld [vmem:[%s2551_s22 + $0xac] sm:$0xff] }
 0x208   : > { %v523_v6 = vpop.f32.mrf.mxu1  ;;  %v912_v21 = vpop.f32.mrf.mxu3 }
 0x209   : > { %v952_v34 = vadd.f32 %v912_v21, %v738_v42  ;;  %1921 = vmatmul.f32.gmra.mxu0 %v1824_v11  ;;  %v524_v43 = vadd.f32 %v523_v6, %v3012_v58 }
 0x20b   : > { %v3310_v37 = vadd.f32 %v1126_v26, %v952_v34  ;;  %1282 = vmatmul.f32.gmra.mxu1 %v1395_v57  ;;  %1496 = vmatmul.f32.gmra.mxu2 %v1397_v10  ;;  %v3324_v26 = vld [vmem:[%s3505_s2] ss:$0 sm:$0xff]  ;;  %v1827_v34 = vld [vmem:[%s2551_s22 + $0xae] sm:$0xff] }
 0x20d   : > { %1710 = vmatmul.f32.gmra.mxu3 %v1611_v50 }
 0x20e   : > { %v701_v49 = vpop.f32.mrf.mxu2  ;;  %v1129_v59 = vpop.f32.mrf.mxu0 }
 0x20f   : > { %v739_v35 = vadd.f32 %v701_v49, %v524_v43 }
 0x210   : > { %v915_v16 = vpop.f32.mrf.mxu3  ;;  %v1238_v4 = vpop.f32.mrf.mxu1 }
 0x211   : > { %v953_v51 = vadd.f32 %v915_v16, %v739_v35  ;;  %1924 = vmatmul.f32.gmra.mxu0 %v1825_v52  ;;  %v1346_v58 = vadd.f32 %v1238_v4, %v3029_v22  ;;  %v1614_v35 = vld [vmem:[%s2551_s22 + $0xb5] sm:$0xff] }
 0x213   : > { %v3316_v17 = vadd.f32 %v1129_v59, %v953_v51  ;;  %1285 = vmatmul.f32.gmra.mxu1 %v1396_v2  ;;  %1499 = vmatmul.f32.gmra.mxu2 %v1398_v20  ;;  %v1613_v2 = vld [vmem:[%s2551_s22 + $0xad] sm:$0xff] }
 0x215   : > { %1713 = vmatmul.f32.gmra.mxu3 %v1612_v0 }
 0x216   : > { %v1452_v57 = vpop.f32.mrf.mxu2  ;;  %v1880_v29 = vpop.f32.mrf.mxu0 }
 0x217   : > { %v1560_v44 = vadd.f32 %v1452_v57, %v1346_v58  ;;  %v1828_v57 = vld [vmem:[%s2551_s22 + $0xb6] sm:$0xff] }
 0x218   : > { %v1241_v24 = vpop.f32.mrf.mxu1  ;;  %v1666_v9 = vpop.f32.mrf.mxu3 }
 0x219   : > { %v1774_v40 = vadd.f32 %v1666_v9, %v1560_v44  ;;  %1927 = vmatmul.f32.gmra.mxu0 %v1826_v62  ;;  %v1347_v11 = vadd.f32 %v1241_v24, %v3038_v55  ;;  %v1400_v55 = vld [vmem:[%s2551_s22 + $0xb4] sm:$0xff]  ;;  %v1401_v9 = vld [vmem:[%s2551_s22 + $0xbc] sm:$0xff] }
 0x21b   : > { %v1988_v22 = vadd.f32 %v1880_v29, %v1774_v40  ;;  %1288 = vmatmul.f32.gmra.mxu1 %v1397_v10  ;;  %1502 = vmatmul.f32.gmra.mxu2 %v1399_v28 }
 0x21d   : > { %v2028_v42 = vadd.f32 %v3324_v26, %v1988_v22  ;;  %1716 = vmatmul.f32.gmra.mxu3 %v1613_v2 }
 0x21e   : > { %v1455_v6 = vpop.f32.mrf.mxu2  ;;  %v1883_v21 = vpop.f32.mrf.mxu0 }
 0x21f   : > { %vm2064_vm0 = vcmp.ge.f32.partialorder %v2028_v42, 0.0  ;;  %v2100_v50 = vmul.f32 0.01, %v2028_v42  ;;  %v1561_v43 = vadd.f32 %v1455_v6, %v1347_v11 }
 0x220   : > { %v1244_v10 = vpop.f32.mrf.mxu1  ;;  %v1669_v49 = vpop.f32.mrf.mxu3 }
 0x221   : > { %v2136_v59 = vsel %vm2064_vm0, %v2028_v42, %v2100_v50  ;;  %v1775_v52 = vadd.f32 %v1669_v49, %v1561_v43  ;;  %1930 = vmatmul.f32.gmra.mxu0 %v1827_v34  ;;  %v1348_v4 = vadd.f32 %v1244_v10, %v3050_v13  ;;  %v1615_v13 = vld [vmem:[%s2551_s22 + $0xbd] sm:$0xff] }
 0x222   : > { %2172 = vst [vmem:[%s3334_s21] sm:$0xff] %v2136_v59  ;;  %v1402_v49 = vld [vmem:[%s2551_s22 + $0xc4] sm:$0xff] }
 0x223   : > { %v1989_v16 = vadd.f32 %v1883_v21, %v1775_v52  ;;  %1291 = vmatmul.f32.gmra.mxu1 %v1398_v20  ;;  %1505 = vmatmul.f32.gmra.mxu2 %v1400_v55  ;;  %v1829_v21 = vld [vmem:[%s2551_s22 + $0xbe] sm:$0xff] }
 0x225   : > { %v2029_v51 = vadd.f32 %v3324_v26, %v1989_v16  ;;  %1719 = vmatmul.f32.gmra.mxu3 %v1614_v35 }
 0x226   : > { %v1458_v0 = vpop.f32.mrf.mxu2  ;;  %v1886_v58 = vpop.f32.mrf.mxu0 }
 0x227   : > { %vm2065_vm1 = vcmp.ge.f32.partialorder %v2029_v51, 0.0  ;;  %v2101_v29 = vmul.f32 0.01, %v2029_v51  ;;  %v1562_v62 = vadd.f32 %v1458_v0, %v1348_v4  ;;  %v1830_v0 = vld [vmem:[%s2551_s22 + $0xc6] sm:$0xff] }
 0x228   : > { %v1247_v44 = vpop.f32.mrf.mxu1  ;;  %v1672_v24 = vpop.f32.mrf.mxu3 }
 0x229   : > { %v2137_v40 = vsel %vm2065_vm1, %v2029_v51, %v2101_v29  ;;  %v1776_v20 = vadd.f32 %v1672_v24, %v1562_v62  ;;  %1933 = vmatmul.f32.gmra.mxu0 %v1828_v57  ;;  %v1349_v22 = vadd.f32 %v1247_v44, %v3062_v63  ;;  %v1616_v63 = vld [vmem:[%s2551_s22 + $0xc5] sm:$0xff] }
 0x22a   : > { %2173 = vst [vmem:[%s3334_s21 + $0x8] sm:$0xff] %v2137_v40  ;;  %v1403_v44 = vld [vmem:[%s2551_s22 + $0xcc] sm:$0xff] }
 0x22b   : > { %v1990_v2 = vadd.f32 %v1886_v58, %v1776_v20  ;;  %1294 = vmatmul.f32.gmra.mxu1 %v1399_v28  ;;  %1508 = vmatmul.f32.gmra.mxu2 %v1401_v9 }
 0x22d   : > { %v2030_v11 = vadd.f32 %v3324_v26, %v1990_v2  ;;  %1722 = vmatmul.f32.gmra.mxu3 %v1615_v13 }
 0x22e   : > { %v1461_v42 = vpop.f32.mrf.mxu2  ;;  %v1889_v6 = vpop.f32.mrf.mxu0 }
 0x22f   : > { %vm2066_vm2 = vcmp.ge.f32.partialorder %v2030_v11, 0.0  ;;  %v2102_v34 = vmul.f32 0.01, %v2030_v11  ;;  %v1563_v50 = vadd.f32 %v1461_v42, %v1349_v22 }
 0x230   : > { %v1250_v43 = vpop.f32.mrf.mxu1  ;;  %v1675_v10 = vpop.f32.mrf.mxu3 }
 0x231   : > { %v2138_v59 = vsel %vm2066_vm2, %v2030_v11, %v2102_v34  ;;  %v1777_v28 = vadd.f32 %v1675_v10, %v1563_v50  ;;  %1936 = vmatmul.f32.gmra.mxu0 %v1829_v21  ;;  %v1350_v35 = vadd.f32 %v1250_v43, %v3071_v47  ;;  %v1617_v47 = vld [vmem:[%s2551_s22 + $0xcd] sm:$0xff] }
 0x232   : > { %2174 = vst [vmem:[%s3334_s21 + $0x10] sm:$0xff] %v2138_v59  ;;  %v1831_v11 = vld [vmem:[%s2551_s22 + $0xce] sm:$0xff] }
 0x233   : > { %v1991_v52 = vadd.f32 %v1889_v6, %v1777_v28  ;;  %1297 = vmatmul.f32.gmra.mxu1 %v1400_v55  ;;  %1511 = vmatmul.f32.gmra.mxu2 %v1402_v49  ;;  %v1404_v50 = vld [vmem:[%s2551_s22 + $0xd4] sm:$0xff] }
 0x235   : > { %v2031_v16 = vadd.f32 %v3324_v26, %v1991_v52  ;;  %1725 = vmatmul.f32.gmra.mxu3 %v1616_v63 }
 0x236   : > { %v1464_v4 = vpop.f32.mrf.mxu2  ;;  %v1892_v51 = vpop.f32.mrf.mxu0 }
 0x237   : > { %vm2067_vm3 = vcmp.ge.f32.partialorder %v2031_v16, 0.0  ;;  %v2103_v58 = vmul.f32 0.01, %v2031_v16  ;;  %v1564_v57 = vadd.f32 %v1464_v4, %v1350_v35  ;;  %v1832_v35 = vld [vmem:[%s2551_s22 + $0xd6] sm:$0xff] }
 0x238   : > { %v1253_v29 = vpop.f32.mrf.mxu1  ;;  %v1678_v62 = vpop.f32.mrf.mxu3 }
 0x239   : > { %v2139_v24 = vsel %vm2067_vm3, %v2031_v16, %v2103_v58  ;;  %v1778_v55 = vadd.f32 %v1678_v62, %v1564_v57  ;;  %1939 = vmatmul.f32.gmra.mxu0 %v1830_v0  ;;  %v1351_v20 = vadd.f32 %v1253_v29, %v3083_v30  ;;  %v1618_v30 = vld [vmem:[%s2551_s22 + $0xd5] sm:$0xff] }
 0x23a   : > { %2175 = vst [vmem:[%s3334_s21 + $0x18] sm:$0xff] %v2139_v24  ;;  %v1405_v58 = vld [vmem:[%s2551_s22 + $0xdc] sm:$0xff] }
 0x23b   : > { %v1992_v40 = vadd.f32 %v1892_v51, %v1778_v55  ;;  %1300 = vmatmul.f32.gmra.mxu1 %v1401_v9  ;;  %1514 = vmatmul.f32.gmra.mxu2 %v1403_v44 }
 0x23d   : > { %v2032_v13 = vadd.f32 %v3324_v26, %v1992_v40  ;;  %1728 = vmatmul.f32.gmra.mxu3 %v1617_v47  ;;  %v1833_v40 = vld [vmem:[%s2551_s22 + $0xde] sm:$0xff] }
 0x23e   : > { %v1467_v2 = vpop.f32.mrf.mxu2  ;;  %v1895_v22 = vpop.f32.mrf.mxu0 }
 0x23f   : > { %vm2068_vm4 = vcmp.ge.f32.partialorder %v2032_v13, 0.0  ;;  %v2104_v42 = vmul.f32 0.01, %v2032_v13  ;;  %v1565_v6 = vadd.f32 %v1467_v2, %v1351_v20 }
 0x240   : > { %v1256_v21 = vpop.f32.mrf.mxu1  ;;  %v1681_v34 = vpop.f32.mrf.mxu3 }
 0x241   : > { %v2140_v43 = vsel %vm2068_vm4, %v2032_v13, %v2104_v42  ;;  %v1779_v9 = vadd.f32 %v1681_v34, %v1565_v6  ;;  %1942 = vmatmul.f32.gmra.mxu0 %v1831_v11  ;;  %v1352_v59 = vadd.f32 %v1256_v21, %v3092_v38  ;;  %v1619_v38 = vld [vmem:[%s2551_s22 + $0xdd] sm:$0xff] }
 0x242   : > { %2176 = vst [vmem:[%s3334_s21 + $0x20] sm:$0xff] %v2140_v43  ;;  %v1406_v11 = vld [vmem:[%s2551_s22 + $0xe4] sm:$0xff] }
 0x243   : > { %v1993_v10 = vadd.f32 %v1895_v22, %v1779_v9  ;;  %1303 = vmatmul.f32.gmra.mxu1 %v1402_v49  ;;  %1517 = vmatmul.f32.gmra.mxu2 %v1404_v50 }
 0x245   : > { %v2033_v28 = vadd.f32 %v3324_v26, %v1993_v10  ;;  %1731 = vmatmul.f32.gmra.mxu3 %v1618_v30  ;;  %v1834_v30 = vld [vmem:[%s2551_s22 + $0xe6] sm:$0xff] }
 0x246   : > { %v1470_v63 = vpop.f32.mrf.mxu2  ;;  %v1898_v52 = vpop.f32.mrf.mxu0 }
 0x247   : > { %vm2069_vm5 = vcmp.ge.f32.partialorder %v2033_v28, 0.0  ;;  %v2105_v16 = vmul.f32 0.01, %v2033_v28  ;;  %v1566_v4 = vadd.f32 %v1470_v63, %v1352_v59 }
 0x248   : > { %v1259_v51 = vpop.f32.mrf.mxu1  ;;  %v1684_v0 = vpop.f32.mrf.mxu3 }
 0x249   : > { %v2141_v57 = vsel %vm2069_vm5, %v2033_v28, %v2105_v16  ;;  %v1780_v49 = vadd.f32 %v1684_v0, %v1566_v4  ;;  %1945 = vmatmul.f32.gmra.mxu0 %v1832_v35  ;;  %v1353_v62 = vadd.f32 %v1259_v51, %v3107_v61  ;;  %v1620_v61 = vld [vmem:[%s2551_s22 + $0xe5] sm:$0xff] }
 0x24a   : > { %2177 = vst [vmem:[%s3334_s21 + $0x28] sm:$0xff] %v2141_v57 }
 0x24b   : > { %v1994_v29 = vadd.f32 %v1898_v52, %v1780_v49  ;;  %1306 = vmatmul.f32.gmra.mxu1 %v1403_v44  ;;  %1520 = vmatmul.f32.gmra.mxu2 %v1405_v58  ;;  %v1407_v52 = vld [vmem:[%s2551_s22 + $0xec] sm:$0xff] }
 0x24c   : > { %v1835_v49 = vld [vmem:[%s2551_s22 + $0xee] sm:$0xff] }
 0x24d   : > { %v2034_v24 = vadd.f32 %v3324_v26, %v1994_v29  ;;  %1734 = vmatmul.f32.gmra.mxu3 %v1619_v38 }
 0x24e   : > { %v1473_v55 = vpop.f32.mrf.mxu2  ;;  %v1901_v47 = vpop.f32.mrf.mxu0 }
 0x24f   : > { %vm2070_vm6 = vcmp.ge.f32.partialorder %v2034_v24, 0.0  ;;  %v2106_v20 = vmul.f32 0.01, %v2034_v24  ;;  %v1567_v13 = vadd.f32 %v1473_v55, %v1353_v62  ;;  %v1408_v55 = vld [vmem:[%s2551_s22 + $0xf4] sm:$0xff] }
 0x250   : > { %v1262_v2 = vpop.f32.mrf.mxu1  ;;  %v1687_v22 = vpop.f32.mrf.mxu3 }
 0x251   : > { %v2142_v42 = vsel %vm2070_vm6, %v2034_v24, %v2106_v20  ;;  %v1781_v44 = vadd.f32 %v1687_v22, %v1567_v13  ;;  %1948 = vmatmul.f32.gmra.mxu0 %v1833_v40  ;;  %v1354_v21 = vadd.f32 %v1262_v2, %v3116_v45  ;;  %v1621_v45 = vld [vmem:[%s2551_s22 + $0xed] sm:$0xff] }
 0x252   : > { %2178 = vst [vmem:[%s3334_s21 + $0x30] sm:$0xff] %v2142_v42  ;;  %v1836_v42 = vld [vmem:[%s2551_s22 + $0xf6] sm:$0xff] }
 0x253   : > { %v1995_v6 = vadd.f32 %v1901_v47, %v1781_v44  ;;  %1309 = vmatmul.f32.gmra.mxu1 %v1404_v50  ;;  %1523 = vmatmul.f32.gmra.mxu2 %v1406_v11 }
 0x255   : > { %v2035_v34 = vadd.f32 %v3324_v26, %v1995_v6  ;;  %1737 = vmatmul.f32.gmra.mxu3 %v1620_v61 }
 0x256   : > { %v1476_v43 = vpop.f32.mrf.mxu2  ;;  %v1904_v9 = vpop.f32.mrf.mxu0 }
 0x257   : > { %vm2071_vm7 = vcmp.ge.f32.partialorder %v2035_v34, 0.0  ;;  %v2107_v10 = vmul.f32 0.01, %v2035_v34  ;;  %v1568_v59 = vadd.f32 %v1476_v43, %v1354_v21 }
 0x258   : > { %v1265_v28 = vpop.f32.mrf.mxu1  ;;  %v1690_v63 = vpop.f32.mrf.mxu3 }
 0x259   : > { %v2143_v35 = vsel %vm2071_vm7, %v2035_v34, %v2107_v10  ;;  %v1782_v50 = vadd.f32 %v1690_v63, %v1568_v59  ;;  %1951 = vmatmul.f32.gmra.mxu0 %v1834_v30  ;;  %v1355_v4 = vadd.f32 %v1265_v28, %v3131_v53  ;;  %v1622_v53 = vld [vmem:[%s2551_s22 + $0xf5] sm:$0xff]  ;;  %v1837_v63 = vld [vmem:[%s2551_s22 + $0xfe] sm:$0xff] }
 0x25a   : > { %2179 = vst [vmem:[%s3334_s21 + $0x38] sm:$0xff] %v2143_v35  ;;  %v1409_v34 = vld [vmem:[%s2551_s22 + $0xfc] sm:$0xff] }
 0x25b   : > { %v1996_v16 = vadd.f32 %v1904_v9, %v1782_v50  ;;  %1312 = vmatmul.f32.gmra.mxu1 %v1405_v58  ;;  %1526 = vmatmul.f32.gmra.mxu2 %v1407_v52 }
 0x25d   : > { %v2036_v51 = vadd.f32 %v3324_v26, %v1996_v16  ;;  %1740 = vmatmul.f32.gmra.mxu3 %v1621_v45 }
 0x25e   : > { %v1479_v0 = vpop.f32.mrf.mxu2  ;;  %v1907_v57 = vpop.f32.mrf.mxu0 }
 0x25f   : > { %vm2072_vm8 = vcmp.ge.f32.partialorder %v2036_v51, 0.0  ;;  %v2108_v38 = vmul.f32 0.01, %v2036_v51  ;;  %v1569_v29 = vadd.f32 %v1479_v0, %v1355_v4  ;;  %v1410_v4 = vld [vmem:[%s2551_s22 + $0x104] sm:$0xff] }
 0x260   : > { %v1268_v62 = vpop.f32.mrf.mxu1  ;;  %v1693_v24 = vpop.f32.mrf.mxu3 }
 0x261   : > { %v2144_v47 = vsel %vm2072_vm8, %v2036_v51, %v2108_v38  ;;  %v1783_v58 = vadd.f32 %v1693_v24, %v1569_v29  ;;  %1954 = vmatmul.f32.gmra.mxu0 %v1835_v49  ;;  %v1356_v20 = vadd.f32 %v1268_v62, %v3140_v41  ;;  %v1623_v41 = vld [vmem:[%s2551_s22 + $0xfd] sm:$0xff]  ;;  %v1838_v62 = vld [vmem:[%s2551_s22 + $0x106] sm:$0xff] }
 0x262   : > { %2180 = vst [vmem:[%s3334_s21 + $0x40] sm:$0xff] %v2144_v47 }
 0x263   : > { %v1997_v40 = vadd.f32 %v1907_v57, %v1783_v58  ;;  %1315 = vmatmul.f32.gmra.mxu1 %v1406_v11  ;;  %1529 = vmatmul.f32.gmra.mxu2 %v1408_v55 }
 0x265   : > { %v2037_v13 = vadd.f32 %v3324_v26, %v1997_v40  ;;  %1743 = vmatmul.f32.gmra.mxu3 %v1622_v53  ;;  %v1411_v40 = vld [vmem:[%s2551_s22 + $0x10c] sm:$0xff] }
 0x266   : > { %v1482_v2 = vpop.f32.mrf.mxu2  ;;  %v1910_v22 = vpop.f32.mrf.mxu0 }
 0x267   : > { %vm2073_vm9 = vcmp.ge.f32.partialorder %v2037_v13, 0.0  ;;  %v2109_v44 = vmul.f32 0.01, %v2037_v13  ;;  %v1570_v61 = vadd.f32 %v1482_v2, %v1356_v20 }
 0x268   : > { %v1271_v6 = vpop.f32.mrf.mxu1  ;;  %v1696_v21 = vpop.f32.mrf.mxu3 }
 0x269   : > { %v2145_v43 = vsel %vm2073_vm9, %v2037_v13, %v2109_v44  ;;  %v1784_v11 = vadd.f32 %v1696_v21, %v1570_v61  ;;  %1957 = vmatmul.f32.gmra.mxu0 %v1836_v42  ;;  %v1357_v30 = vadd.f32 %v1271_v6, %v3152_v7  ;;  %v1624_v7 = vld [vmem:[%s2551_s22 + $0x105] sm:$0xff]  ;;  %v1839_v61 = vld [vmem:[%s2551_s22 + $0x10e] sm:$0xff] }
 0x26a   : > { %2181 = vst [vmem:[%s3334_s21 + $0x48] sm:$0xff] %v2145_v43 }
 0x26b   : > { %v1998_v9 = vadd.f32 %v1910_v22, %v1784_v11  ;;  %1318 = vmatmul.f32.gmra.mxu1 %v1407_v52  ;;  %1532 = vmatmul.f32.gmra.mxu2 %v1409_v34 }
 0x26d   : > { %v2038_v10 = vadd.f32 %v3324_v26, %v1998_v9  ;;  %1746 = vmatmul.f32.gmra.mxu3 %v1623_v41  ;;  %v1412_v41 = vld [vmem:[%s2551_s22 + $0x114] sm:$0xff] }
 0x26e   : > { %v1485_v59 = vpop.f32.mrf.mxu2  ;;  %v1913_v28 = vpop.f32.mrf.mxu0 }
 0x26f   : > { %vm2074_vm10 = vcmp.ge.f32.partialorder %v2038_v10, 0.0  ;;  %v2110_v35 = vmul.f32 0.01, %v2038_v10  ;;  %v1571_v50 = vadd.f32 %v1485_v59, %v1357_v30 }
 0x270   : > { %v1274_v45 = vpop.f32.mrf.mxu1  ;;  %v1699_v16 = vpop.f32.mrf.mxu3 }
 0x271   : > { %v2146_v51 = vsel %vm2074_vm10, %v2038_v10, %v2110_v35  ;;  %v1785_v52 = vadd.f32 %v1699_v16, %v1571_v50  ;;  %1960 = vmatmul.f32.gmra.mxu0 %v1837_v63  ;;  %v1358_v57 = vadd.f32 %v1274_v45, %v3164_v56  ;;  %v1625_v56 = vld [vmem:[%s2551_s22 + $0x10d] sm:$0xff]  ;;  %v1840_v35 = vld [vmem:[%s2551_s22 + $0x116] sm:$0xff] }
 0x272   : > { %2182 = vst [vmem:[%s3334_s21 + $0x50] sm:$0xff] %v2146_v51 }
 0x273   : > { %v1999_v0 = vadd.f32 %v1913_v28, %v1785_v52  ;;  %1321 = vmatmul.f32.gmra.mxu1 %v1408_v55  ;;  %1535 = vmatmul.f32.gmra.mxu2 %v1410_v4  ;;  %v1413_v52 = vld [vmem:[%s2551_s22 + $0x11c] sm:$0xff] }
 0x275   : > { %v2039_v49 = vadd.f32 %v3324_v26, %v1999_v0  ;;  %1749 = vmatmul.f32.gmra.mxu3 %v1624_v7 }
 0x276   : > { %v1488_v38 = vpop.f32.mrf.mxu2  ;;  %v1916_v29 = vpop.f32.mrf.mxu0 }
 0x277   : > { %vm2075_vm11 = vcmp.ge.f32.partialorder %v2039_v49, 0.0  ;;  %v2111_v24 = vmul.f32 0.01, %v2039_v49  ;;  %v1572_v47 = vadd.f32 %v1488_v38, %v1358_v57 }
 0x278   : > { %v1277_v58 = vpop.f32.mrf.mxu1  ;;  %v1702_v53 = vpop.f32.mrf.mxu3 }
 0x279   : > { %v2147_v20 = vsel %vm2075_vm11, %v2039_v49, %v2111_v24  ;;  %v1786_v55 = vadd.f32 %v1702_v53, %v1572_v47  ;;  %1963 = vmatmul.f32.gmra.mxu0 %v1838_v62  ;;  %v1359_v2 = vadd.f32 %v1277_v58, %v3173_v36  ;;  %v1626_v36 = vld [vmem:[%s2551_s22 + $0x115] sm:$0xff]  ;;  %v1841_v62 = vld [vmem:[%s2551_s22 + $0x11e] sm:$0xff] }
 0x27a   : > { %2183 = vst [vmem:[%s3334_s21 + $0x58] sm:$0xff] %v2147_v20  ;;  %v1414_v20 = vld [vmem:[%s2551_s22 + $0x124] sm:$0xff] }
 0x27b   : > { %v2000_v13 = vadd.f32 %v1916_v29, %v1786_v55  ;;  %1324 = vmatmul.f32.gmra.mxu1 %v1409_v34  ;;  %1538 = vmatmul.f32.gmra.mxu2 %v1411_v40 }
 0x27d   : > { %v2040_v22 = vadd.f32 %v3324_v26, %v2000_v13  ;;  %1752 = vmatmul.f32.gmra.mxu3 %v1625_v56 }
 0x27e   : > { %v1491_v42 = vpop.f32.mrf.mxu2  ;;  %v1919_v44 = vpop.f32.mrf.mxu0 }
 0x27f   : > { %vm2076_vm12 = vcmp.ge.f32.partialorder %v2040_v22, 0.0  ;;  %v2112_v6 = vmul.f32 0.01, %v2040_v22  ;;  %v1573_v21 = vadd.f32 %v1491_v42, %v1359_v2 }
 0x280   : > { %v1280_v43 = vpop.f32.mrf.mxu1  ;;  %v1705_v11 = vpop.f32.mrf.mxu3 }
 0x281   : > { %v2148_v9 = vsel %vm2076_vm12, %v2040_v22, %v2112_v6  ;;  %v1787_v34 = vadd.f32 %v1705_v11, %v1573_v21  ;;  %1966 = vmatmul.f32.gmra.mxu0 %v1839_v61  ;;  %v1360_v10 = vadd.f32 %v1280_v43, %v3185_v18  ;;  %v1627_v18 = vld [vmem:[%s2551_s22 + $0x11d] sm:$0xff]  ;;  %v1415_v11 = vld [vmem:[%s2551_s22 + $0x12c] sm:$0xff] }
 0x282   : > { %2184 = vst [vmem:[%s3334_s21 + $0x60] sm:$0xff] %v2148_v9 }
 0x283   : > { %v2001_v30 = vadd.f32 %v1919_v44, %v1787_v34  ;;  %1327 = vmatmul.f32.gmra.mxu1 %v1410_v4  ;;  %1541 = vmatmul.f32.gmra.mxu2 %v1412_v41  ;;  %v1842_v44 = vld [vmem:[%s2551_s22 + $0x126] sm:$0xff] }
 0x285   : > { %v2041_v59 = vadd.f32 %v3324_v26, %v2001_v30  ;;  %1755 = vmatmul.f32.gmra.mxu3 %v1626_v36 }
 0x286   : > { %v1494_v28 = vpop.f32.mrf.mxu2  ;;  %v1922_v63 = vpop.f32.mrf.mxu0 }
 0x287   : > { %vm2077_vm13 = vcmp.ge.f32.partialorder %v2041_v59, 0.0  ;;  %v2113_v50 = vmul.f32 0.01, %v2041_v59  ;;  %v1574_v45 = vadd.f32 %v1494_v28, %v1360_v10  ;;  %v1843_v28 = vld [vmem:[%s2551_s22 + $0x12e] sm:$0xff] }
 0x288   : > { %v1283_v16 = vpop.f32.mrf.mxu1  ;;  %v1708_v51 = vpop.f32.mrf.mxu3 }
 0x289   : > { %v2149_v7 = vsel %vm2077_vm13, %v2041_v59, %v2113_v50  ;;  %v1788_v4 = vadd.f32 %v1708_v51, %v1574_v45  ;;  %1969 = vmatmul.f32.gmra.mxu0 %v1840_v35  ;;  %v1361_v57 = vadd.f32 %v1283_v16, %v3194_v54  ;;  %v1628_v54 = vld [vmem:[%s2551_s22 + $0x125] sm:$0xff]  ;;  %v1416_v16 = vld [vmem:[%s2551_s22 + $0x134] sm:$0xff] }
 0x28a   : > { %2185 = vst [vmem:[%s3334_s21 + $0x68] sm:$0xff] %v2149_v7 }
 0x28b   : > { %v2002_v0 = vadd.f32 %v1922_v63, %v1788_v4  ;;  %1330 = vmatmul.f32.gmra.mxu1 %v1411_v40  ;;  %1544 = vmatmul.f32.gmra.mxu2 %v1413_v52 }
 0x28d   : > { %v2042_v49 = vadd.f32 %v3324_v26, %v2002_v0  ;;  %1758 = vmatmul.f32.gmra.mxu3 %v1627_v18 }
 0x28e   : > { %v1497_v38 = vpop.f32.mrf.mxu2  ;;  %v1925_v29 = vpop.f32.mrf.mxu0 }
 0x28f   : > { %vm2078_vm14 = vcmp.ge.f32.partialorder %v2042_v49, 0.0  ;;  %v2114_v24 = vmul.f32 0.01, %v2042_v49  ;;  %v1575_v47 = vadd.f32 %v1497_v38, %v1361_v57 }
 0x290   : > { %v1286_v58 = vpop.f32.mrf.mxu1  ;;  %v1711_v53 = vpop.f32.mrf.mxu3 }
 0x291   : > { %v2150_v55 = vsel %vm2078_vm14, %v2042_v49, %v2114_v24  ;;  %v1789_v40 = vadd.f32 %v1711_v53, %v1575_v47  ;;  %1972 = vmatmul.f32.gmra.mxu0 %v1841_v62  ;;  %v1362_v13 = vadd.f32 %v1286_v58, %v3200_v31  ;;  %v1629_v31 = vld [vmem:[%s2551_s22 + $0x12d] sm:$0xff]  ;;  %v1844_v49 = vld [vmem:[%s2551_s22 + $0x136] sm:$0xff] }
 0x292   : > { %2186 = vst [vmem:[%s3334_s21 + $0x70] sm:$0xff] %v2150_v55  ;;  %v1417_v47 = vld [vmem:[%s2551_s22 + $0x13c] sm:$0xff] }
 0x293   : > { %v2003_v56 = vadd.f32 %v1925_v29, %v1789_v40  ;;  %1333 = vmatmul.f32.gmra.mxu1 %v1412_v41  ;;  %1547 = vmatmul.f32.gmra.mxu2 %v1414_v20 }
 0x295   : > { %v2043_v2 = vadd.f32 %v3324_v26, %v2003_v56  ;;  %1761 = vmatmul.f32.gmra.mxu3 %v1628_v54 }
 0x296   : > { %v1500_v22 = vpop.f32.mrf.mxu2  ;;  %v1928_v42 = vpop.f32.mrf.mxu0 }
 0x297   : > { %vm2079_vm15 = vcmp.ge.f32.partialorder %v2043_v2, 0.0  ;;  %v2115_v61 = vmul.f32 0.01, %v2043_v2  ;;  %v1576_v6 = vadd.f32 %v1500_v22, %v1362_v13  ;;  %v1845_v13 = vld [vmem:[%s2551_s22 + $0x13e] sm:$0xff] }
 0x298   : > { %v1289_v21 = vpop.f32.mrf.mxu1  ;;  %v1714_v43 = vpop.f32.mrf.mxu3 }
 0x299   : > { %v2151_v9 = vsel %vm2079_vm15, %v2043_v2, %v2115_v61  ;;  %v1790_v41 = vadd.f32 %v1714_v43, %v1576_v6  ;;  %1975 = vmatmul.f32.gmra.mxu0 %v1842_v44  ;;  %v1363_v36 = vadd.f32 %v1289_v21, %v3206_v32  ;;  %v1630_v32 = vld [vmem:[%s2551_s22 + $0x135] sm:$0xff] }
 0x29a   : > { %2187 = vst [vmem:[%s3334_s21 + $0x78] sm:$0xff] %v2151_v9 }
 0x29b   : > { %v2004_v34 = vadd.f32 %v1928_v42, %v1790_v41  ;;  %1336 = vmatmul.f32.gmra.mxu1 %v1413_v52  ;;  %1550 = vmatmul.f32.gmra.mxu2 %v1415_v11 }
 0x29d   : > { %v2044_v30 = vadd.f32 %v3324_v26, %v2004_v34  ;;  %1764 = vmatmul.f32.gmra.mxu3 %v1629_v31 }
 0x29e   : > { %v1503_v10 = vpop.f32.mrf.mxu2  ;;  %v1931_v59 = vpop.f32.mrf.mxu0 }
 0x29f   : > { %vm2080_vm0 = vcmp.ge.f32.partialorder %v2044_v30, 0.0  ;;  %v2116_v63 = vmul.f32 0.01, %v2044_v30  ;;  %v1577_v35 = vadd.f32 %v1503_v10, %v1363_v36 }
 0x2a0   : > { %v1292_v50 = vpop.f32.mrf.mxu1  ;;  %v1717_v45 = vpop.f32.mrf.mxu3 }
 0x2a1   : > { %v2152_v51 = vsel %vm2080_vm0, %v2044_v30, %v2116_v63  ;;  %v1791_v52 = vadd.f32 %v1717_v45, %v1577_v35  ;;  %1978 = vmatmul.f32.gmra.mxu0 %v1843_v28  ;;  %v1364_v4 = vadd.f32 %v1292_v50, %v3212_v25 }
 0x2a2   : > { %2188 = vst [vmem:[%s3334_s21 + $0x80] sm:$0xff] %v2152_v51 }
 0x2a3   : > { %v2005_v7 = vadd.f32 %v1931_v59, %v1791_v52  ;;  %1339 = vmatmul.f32.gmra.mxu1 %v1414_v20  ;;  %1553 = vmatmul.f32.gmra.mxu2 %v1416_v16  ;;  %v1631_v20 = vld [vmem:[%s2551_s22 + $0x13d] sm:$0xff] }
 0x2a5   : > { %v2045_v18 = vadd.f32 %v3324_v26, %v2005_v7  ;;  %1767 = vmatmul.f32.gmra.mxu3 %v1630_v32 }
 0x2a6   : > { %v1506_v0 = vpop.f32.mrf.mxu2  ;;  %v1934_v57 = vpop.f32.mrf.mxu0 }
 0x2a7   : > { %vm2081_vm1 = vcmp.ge.f32.partialorder %v2045_v18, 0.0  ;;  %v2117_v38 = vmul.f32 0.01, %v2045_v18  ;;  %v1578_v29 = vadd.f32 %v1506_v0, %v1364_v4 }
 0x2a8   : > { %v1295_v62 = vpop.f32.mrf.mxu1  ;;  %v1720_v24 = vpop.f32.mrf.mxu3 }
 0x2a9   : > { %v2153_v58 = vsel %vm2081_vm1, %v2045_v18, %v2117_v38  ;;  %v1792_v53 = vadd.f32 %v1720_v24, %v1578_v29  ;;  %1981 = vmatmul.f32.gmra.mxu0 %v1844_v49  ;;  %v1365_v55 = vadd.f32 %v1295_v62, %v3219_v14 }
 0x2aa   : > { %2189 = vst [vmem:[%s3334_s21 + $0x88] sm:$0xff] %v2153_v58 }
 0x2ab   : > { %v2006_v25 = vadd.f32 %v1934_v57, %v1792_v53  ;;  %1342 = vmatmul.f32.gmra.mxu1 %v1415_v11  ;;  %1556 = vmatmul.f32.gmra.mxu2 %v1417_v47 }
 0x2ad   : > { %v2046_v40 = vadd.f32 %v3324_v26, %v2006_v25  ;;  %1770 = vmatmul.f32.gmra.mxu3 %v1631_v20 }
 0x2ae   : > { %v1509_v54 = vpop.f32.mrf.mxu2  ;;  %v1937_v56 = vpop.f32.mrf.mxu0 }
 0x2af   : > { %vm2082_vm2 = vcmp.ge.f32.partialorder %v2046_v40, 0.0  ;;  %v2118_v2 = vmul.f32 0.01, %v2046_v40  ;;  %v1579_v22 = vadd.f32 %v1509_v54, %v1365_v55 }
 0x2b0   : > { %v1298_v42 = vpop.f32.mrf.mxu1  ;;  %v1723_v44 = vpop.f32.mrf.mxu3 }
 0x2b1   : > { %v2154_v61 = vsel %vm2082_vm2, %v2046_v40, %v2118_v2  ;;  %v1793_v6 = vadd.f32 %v1723_v44, %v1579_v22  ;;  %1984 = vmatmul.f32.gmra.mxu0 %v1845_v13  ;;  %v1366_v43 = vadd.f32 %v1298_v42, %v3226_v39 }
 0x2b2   : > { %2190 = vst [vmem:[%s3334_s21 + $0x90] sm:$0xff] %v2154_v61 }
 0x2b3   : > { %v2007_v21 = vadd.f32 %v1937_v56, %v1793_v6 }
 0x2b5   : > { %v2047_v14 = vadd.f32 %v3324_v26, %v2007_v21 }
 0x2b6   : > { %v1512_v11 = vpop.f32.mrf.mxu2  ;;  %v1940_v9 = vpop.f32.mrf.mxu0 }
 0x2b7   : > { %vm2083_vm3 = vcmp.ge.f32.partialorder %v2047_v14, 0.0  ;;  %v2119_v41 = vmul.f32 0.01, %v2047_v14  ;;  %v1580_v31 = vadd.f32 %v1512_v11, %v1366_v43 }
 0x2b8   : > { %v1301_v34 = vpop.f32.mrf.mxu1  ;;  %v1726_v36 = vpop.f32.mrf.mxu3 }
 0x2b9   : > { %v2155_v30 = vsel %vm2083_vm3, %v2047_v14, %v2119_v41  ;;  %v1794_v10 = vadd.f32 %v1726_v36, %v1580_v31  ;;  %v1367_v28 = vadd.f32 %v1301_v34, %v3232_v5 }
 0x2ba   : > { %2191 = vst [vmem:[%s3334_s21 + $0x98] sm:$0xff] %v2155_v30 }
 0x2bb   : > { %v2008_v59 = vadd.f32 %v1940_v9, %v1794_v10 }
 0x2bd   : > { %v2048_v63 = vadd.f32 %v3324_v26, %v2008_v59 }
 0x2be   : > { %v1515_v35 = vpop.f32.mrf.mxu2  ;;  %v1943_v39 = vpop.f32.mrf.mxu0 }
 0x2bf   : > { %vm2084_vm4 = vcmp.ge.f32.partialorder %v2048_v63, 0.0  ;;  %v2120_v50 = vmul.f32 0.01, %v2048_v63  ;;  %v1581_v45 = vadd.f32 %v1515_v35, %v1367_v28 }
 0x2c0   : > { %v1304_v16 = vpop.f32.mrf.mxu1  ;;  %v1729_v51 = vpop.f32.mrf.mxu3 }
 0x2c1   : > { %v2156_v52 = vsel %vm2084_vm4, %v2048_v63, %v2120_v50  ;;  %v1795_v32 = vadd.f32 %v1729_v51, %v1581_v45  ;;  %v1368_v4 = vadd.f32 %v1304_v16, %v3238_v23 }
 0x2c2   : > { %2192 = vst [vmem:[%s3334_s21 + $0xa0] sm:$0xff] %v2156_v52 }
 0x2c3   : > { %v2009_v7 = vadd.f32 %v1943_v39, %v1795_v32 }
 0x2c5   : > { %v2049_v18 = vadd.f32 %v3324_v26, %v2009_v7 }
 0x2c6   : > { %v1518_v0 = vpop.f32.mrf.mxu2  ;;  %v1946_v5 = vpop.f32.mrf.mxu0 }
 0x2c7   : > { %vm2085_vm5 = vcmp.ge.f32.partialorder %v2049_v18, 0.0  ;;  %v2121_v57 = vmul.f32 0.01, %v2049_v18  ;;  %v1582_v49 = vadd.f32 %v1518_v0, %v1368_v4 }
 0x2c8   : > { %v1307_v38 = vpop.f32.mrf.mxu1  ;;  %v1732_v29 = vpop.f32.mrf.mxu3 }
 0x2c9   : > { %v2157_v62 = vsel %vm2085_vm5, %v2049_v18, %v2121_v57  ;;  %v1796_v24 = vadd.f32 %v1732_v29, %v1582_v49  ;;  %v1369_v58 = vadd.f32 %v1307_v38, %v3244_v19 }
 0x2ca   : > { %2193 = vst [vmem:[%s3334_s21 + $0xa8] sm:$0xff] %v2157_v62 }
 0x2cb   : > { %v2010_v47 = vadd.f32 %v1946_v5, %v1796_v24 }
 0x2cd   : > { %v2050_v53 = vadd.f32 %v3324_v26, %v2010_v47 }
 0x2ce   : > { %v1521_v20 = vpop.f32.mrf.mxu2  ;;  %v1949_v23 = vpop.f32.mrf.mxu0 }
 0x2cf   : > { %vm2086_vm6 = vcmp.ge.f32.partialorder %v2050_v53, 0.0  ;;  %v2122_v25 = vmul.f32 0.01, %v2050_v53  ;;  %v1583_v55 = vadd.f32 %v1521_v20, %v1369_v58 }
 0x2d0   : > { %v1310_v40 = vpop.f32.mrf.mxu1  ;;  %v1735_v54 = vpop.f32.mrf.mxu3 }
 0x2d1   : > { %v2158_v56 = vsel %vm2086_vm6, %v2050_v53, %v2122_v25  ;;  %v1797_v13 = vadd.f32 %v1735_v54, %v1583_v55  ;;  %v1370_v22 = vadd.f32 %v1310_v40, %v3250_v27 }
 0x2d2   : > { %2194 = vst [vmem:[%s3334_s21 + $0xb0] sm:$0xff] %v2158_v56 }
 0x2d3   : > { %v2011_v2 = vadd.f32 %v1949_v23, %v1797_v13 }
 0x2d5   : > { %v2051_v42 = vadd.f32 %v3324_v26, %v2011_v2 }
 0x2d6   : > { %v1524_v44 = vpop.f32.mrf.mxu2  ;;  %v1952_v19 = vpop.f32.mrf.mxu0 }
 0x2d7   : > { %vm2087_vm7 = vcmp.ge.f32.partialorder %v2051_v42, 0.0  ;;  %v2123_v61 = vmul.f32 0.01, %v2051_v42  ;;  %v1584_v6 = vadd.f32 %v1524_v44, %v1370_v22 }
 0x2d8   : > { %v1313_v21 = vpop.f32.mrf.mxu1  ;;  %v1738_v43 = vpop.f32.mrf.mxu3 }
 0x2d9   : > { %v2159_v14 = vsel %vm2087_vm7, %v2051_v42, %v2123_v61  ;;  %v1798_v11 = vadd.f32 %v1738_v43, %v1584_v6  ;;  %v1371_v41 = vadd.f32 %v1313_v21, %v3256_v8 }
 0x2da   : > { %2195 = vst [vmem:[%s3334_s21 + $0xb8] sm:$0xff] %v2159_v14 }
 0x2db   : > { %v2012_v9 = vadd.f32 %v1952_v19, %v1798_v11 }
 0x2dd   : > { %v2052_v31 = vadd.f32 %v3324_v26, %v2012_v9 }
 0x2de   : > { %v1527_v34 = vpop.f32.mrf.mxu2  ;;  %v1955_v27 = vpop.f32.mrf.mxu0 }
 0x2df   : > { %vm2088_vm8 = vcmp.ge.f32.partialorder %v2052_v31, 0.0  ;;  %v2124_v36 = vmul.f32 0.01, %v2052_v31  ;;  %v1585_v30 = vadd.f32 %v1527_v34, %v1371_v41 }
 0x2e0   : > { %v1316_v10 = vpop.f32.mrf.mxu1  ;;  %v1741_v59 = vpop.f32.mrf.mxu3 }
 0x2e1   : > { %v2160_v28 = vsel %vm2088_vm8, %v2052_v31, %v2124_v36  ;;  %v1799_v63 = vadd.f32 %v1741_v59, %v1585_v30  ;;  %v1372_v39 = vadd.f32 %v1316_v10, %v3262_v60 }
 0x2e2   : > { %2196 = vst [vmem:[%s3334_s21 + $0xc0] sm:$0xff] %v2160_v28 }
 0x2e3   : > { %v2013_v35 = vadd.f32 %v1955_v27, %v1799_v63 }
 0x2e5   : > { %v2053_v50 = vadd.f32 %v3324_v26, %v2013_v35 }
 0x2e6   : > { %v1530_v45 = vpop.f32.mrf.mxu2  ;;  %v1958_v8 = vpop.f32.mrf.mxu0 }
 0x2e7   : > { %vm2089_vm9 = vcmp.ge.f32.partialorder %v2053_v50, 0.0  ;;  %v2125_v16 = vmul.f32 0.01, %v2053_v50  ;;  %v1586_v51 = vadd.f32 %v1530_v45, %v1372_v39 }
 0x2e8   : > { %v1319_v52 = vpop.f32.mrf.mxu1  ;;  %v1744_v32 = vpop.f32.mrf.mxu3 }
 0x2e9   : > { %v2161_v7 = vsel %vm2089_vm9, %v2053_v50, %v2125_v16  ;;  %v1800_v4 = vadd.f32 %v1744_v32, %v1586_v51  ;;  %v1373_v0 = vadd.f32 %v1319_v52, %v3268_v12 }
 0x2ea   : > { %2197 = vst [vmem:[%s3334_s21 + $0xc8] sm:$0xff] %v2161_v7 }
 0x2eb   : > { %v2014_v18 = vadd.f32 %v1958_v8, %v1800_v4 }
 0x2ed   : > { %v2054_v5 = vadd.f32 %v3324_v26, %v2014_v18 }
 0x2ee   : > { %v1533_v57 = vpop.f32.mrf.mxu2  ;;  %v1961_v60 = vpop.f32.mrf.mxu0 }
 0x2ef   : > { %vm2090_vm10 = vcmp.ge.f32.partialorder %v2054_v5, 0.0  ;;  %v2126_v49 = vmul.f32 0.01, %v2054_v5  ;;  %v1587_v38 = vadd.f32 %v1533_v57, %v1373_v0 }
 0x2f0   : > { %v1322_v29 = vpop.f32.mrf.mxu1  ;;  %v1747_v62 = vpop.f32.mrf.mxu3 }
 0x2f1   : > { %v2162_v24 = vsel %vm2090_vm10, %v2054_v5, %v2126_v49  ;;  %v1801_v47 = vadd.f32 %v1747_v62, %v1587_v38  ;;  %v1374_v53 = vadd.f32 %v1322_v29, %v3274_v33 }
 0x2f2   : > { %2198 = vst [vmem:[%s3334_s21 + $0xd0] sm:$0xff] %v2162_v24 }
 0x2f3   : > { %v2015_v58 = vadd.f32 %v1961_v60, %v1801_v47 }
 0x2f5   : > { %v2055_v20 = vadd.f32 %v3324_v26, %v2015_v58 }
 0x2f6   : > { %v1536_v23 = vpop.f32.mrf.mxu2  ;;  %v1964_v12 = vpop.f32.mrf.mxu0 }
 0x2f7   : > { %vm2091_vm11 = vcmp.ge.f32.partialorder %v2055_v20, 0.0  ;;  %v2127_v25 = vmul.f32 0.01, %v2055_v20  ;;  %v1588_v55 = vadd.f32 %v1536_v23, %v1374_v53 }
 0x2f8   : > { %v1325_v40 = vpop.f32.mrf.mxu1  ;;  %v1750_v54 = vpop.f32.mrf.mxu3 }
 0x2f9   : > { %v2163_v56 = vsel %vm2091_vm11, %v2055_v20, %v2127_v25  ;;  %v1802_v13 = vadd.f32 %v1750_v54, %v1588_v55  ;;  %v1375_v22 = vadd.f32 %v1325_v40, %v3280_v1  ;;  %v3479_v1 = vld [vmem:[%s3505_s2] ss:$0 sm:$0xff] }
 0x2fa   : > { %2199 = vst [vmem:[%s3334_s21 + $0xd8] sm:$0xff] %v2163_v56 }
 0x2fb   : > { %v2016_v2 = vadd.f32 %v1964_v12, %v1802_v13 }
 0x2fd   : > { %v2056_v42 = vadd.f32 %v3324_v26, %v2016_v2 }
 0x2fe   : > { %v1539_v44 = vpop.f32.mrf.mxu2  ;;  %v1967_v33 = vpop.f32.mrf.mxu0 }
 0x2ff   : > { %vm2092_vm12 = vcmp.ge.f32.partialorder %v2056_v42, 0.0  ;;  %v2128_v19 = vmul.f32 0.01, %v2056_v42  ;;  %v1589_v61 = vadd.f32 %v1539_v44, %v1375_v22 }
 0x300   : > { %v1328_v6 = vpop.f32.mrf.mxu1  ;;  %v1753_v21 = vpop.f32.mrf.mxu3 }
 0x301   : > { %v2164_v43 = vsel %vm2092_vm12, %v2056_v42, %v2128_v19  ;;  %v1803_v14 = vadd.f32 %v1753_v21, %v1589_v61  ;;  %v1376_v9 = vadd.f32 %v1328_v6, %v3286_v15 }
 0x302   : > { %2200 = vst [vmem:[%s3334_s21 + $0xe0] sm:$0xff] %v2164_v43 }
 0x303   : > { %v2017_v11 = vadd.f32 %v1967_v33, %v1803_v14 }
 0x305   : > { %v2057_v26 = vadd.f32 %v3479_v1, %v2017_v11 }
 0x306   : > { %v1542_v41 = vpop.f32.mrf.mxu2  ;;  %v1970_v31 = vpop.f32.mrf.mxu0 }
 0x307   : > { %vm2093_vm13 = vcmp.ge.f32.partialorder %v2057_v26, 0.0  ;;  %v2129_v34 = vmul.f32 0.01, %v2057_v26  ;;  %v1590_v27 = vadd.f32 %v1542_v41, %v1376_v9 }
 0x308   : > { %v1331_v36 = vpop.f32.mrf.mxu1  ;;  %v1756_v30 = vpop.f32.mrf.mxu3 }
 0x309   : > { %v2165_v10 = vsel %vm2093_vm13, %v2057_v26, %v2129_v34  ;;  %v1804_v59 = vadd.f32 %v1756_v30, %v1590_v27  ;;  %v1377_v15 = vadd.f32 %v1331_v36, %v3292_v46 }
 0x30a   : > { %2201 = vst [vmem:[%s3334_s21 + $0xe8] sm:$0xff] %v2165_v10 }
 0x30b   : > { %v2018_v28 = vadd.f32 %v1970_v31, %v1804_v59 }
 0x30d   : > { %v2058_v63 = vadd.f32 %v3479_v1, %v2018_v28 }
 0x30e   : > { %v1545_v35 = vpop.f32.mrf.mxu2  ;;  %v1973_v39 = vpop.f32.mrf.mxu0 }
 0x30f   : > { %vm2094_vm14 = vcmp.ge.f32.partialorder %v2058_v63, 0.0  ;;  %v2130_v50 = vmul.f32 0.01, %v2058_v63  ;;  %v1591_v45 = vadd.f32 %v1545_v35, %v1377_v15 }
 0x310   : > { %v1334_v8 = vpop.f32.mrf.mxu1  ;;  %v1759_v16 = vpop.f32.mrf.mxu3 }
 0x311   : > { %v2166_v51 = vsel %vm2094_vm14, %v2058_v63, %v2130_v50  ;;  %v1805_v52 = vadd.f32 %v1759_v16, %v1591_v45  ;;  %v1378_v7 = vadd.f32 %v1334_v8, %v3298_v48 }
 0x312   : > { %2202 = vst [vmem:[%s3334_s21 + $0xf0] sm:$0xff] %v2166_v51 }
 0x313   : > { %v2019_v32 = vadd.f32 %v1973_v39, %v1805_v52 }
 0x315   : > { %v2059_v4 = vadd.f32 %v3479_v1, %v2019_v32 }
 0x316   : > { %v1548_v18 = vpop.f32.mrf.mxu2  ;;  %v1976_v46 = vpop.f32.mrf.mxu0 }
 0x317   : > { %vm2095_vm15 = vcmp.ge.f32.partialorder %v2059_v4, 0.0  ;;  %v2131_v0 = vmul.f32 0.01, %v2059_v4  ;;  %v1592_v5 = vadd.f32 %v1548_v18, %v1378_v7 }
 0x318   : > { %v1337_v57 = vpop.f32.mrf.mxu1  ;;  %v1762_v60 = vpop.f32.mrf.mxu3 }
 0x319   : > { %v2167_v49 = vsel %vm2095_vm15, %v2059_v4, %v2131_v0  ;;  %v1806_v38 = vadd.f32 %v1762_v60, %v1592_v5  ;;  %v1379_v62 = vadd.f32 %v1337_v57, %v3304_v3 }
 0x31a   : > { %2203 = vst [vmem:[%s3334_s21 + $0xf8] sm:$0xff] %v2167_v49 }
 0x31b   : > { %v2020_v29 = vadd.f32 %v1976_v46, %v1806_v38 }
 0x31d   : > { %v2060_v24 = vadd.f32 %v3479_v1, %v2020_v29 }
 0x31e   : > { %v1551_v47 = vpop.f32.mrf.mxu2  ;;  %v1979_v48 = vpop.f32.mrf.mxu0 }
 0x31f   : > { %vm2096_vm0 = vcmp.ge.f32.partialorder %v2060_v24, 0.0  ;;  %v2132_v58 = vmul.f32 0.01, %v2060_v24  ;;  %v1593_v53 = vadd.f32 %v1551_v47, %v1379_v62 }
 0x320   : > { %v1340_v20 = vpop.f32.mrf.mxu1  ;;  %v1765_v23 = vpop.f32.mrf.mxu3 }
 0x321   : > { %v2168_v12 = vsel %vm2096_vm0, %v2060_v24, %v2132_v58  ;;  %v1807_v25 = vadd.f32 %v1765_v23, %v1593_v53  ;;  %v1380_v40 = vadd.f32 %v1340_v20, %v3310_v37 }
 0x322   : > { %2204 = vst [vmem:[%s3334_s21 + $0x100] sm:$0xff] %v2168_v12 }
 0x323   : > { %v2021_v55 = vadd.f32 %v1979_v48, %v1807_v25 }
 0x325   : > { %v2061_v54 = vadd.f32 %v3479_v1, %v2021_v55 }
 0x326   : > { %v1554_v56 = vpop.f32.mrf.mxu2  ;;  %v1982_v3 = vpop.f32.mrf.mxu0 }
 0x327   : > { %vm2097_vm1 = vcmp.ge.f32.partialorder %v2061_v54, 0.0  ;;  %v2133_v13 = vmul.f32 0.01, %v2061_v54  ;;  %v1594_v2 = vadd.f32 %v1554_v56, %v1380_v40 }
 0x328   : > { %v1768_v22 = vpop.f32.mrf.mxu3  ;;  %v1343_v33 = vpop.f32.mrf.mxu1 }
 0x329   : > { %v2169_v42 = vsel %vm2097_vm1, %v2061_v54, %v2133_v13  ;;  %v1808_v44 = vadd.f32 %v1768_v22, %v1594_v2  ;;  %v1381_v61 = vadd.f32 %v1343_v33, %v3316_v17 }
 0x32a   : > { %2205 = vst [vmem:[%s3334_s21 + $0x108] sm:$0xff] %v2169_v42 }
 0x32b   : > { %v2022_v19 = vadd.f32 %v1982_v3, %v1808_v44 }
 0x32d   : > { %v2062_v6 = vadd.f32 %v3479_v1, %v2022_v19 }
 0x32e   : > { %v1557_v37 = vpop.f32.mrf.mxu2  ;;  %v1985_v11 = vpop.f32.mrf.mxu0 }
 0x32f   : > { %vm2098_vm2 = vcmp.ge.f32.partialorder %v2062_v6, 0.0  ;;  %v2134_v21 = vmul.f32 0.01, %v2062_v6  ;;  %v1595_v43 = vadd.f32 %v1557_v37, %v1381_v61 }
 0x330   : > { %v1771_v14 = vpop.f32.mrf.mxu3 }
 0x331   : > { %v2170_v9 = vsel %vm2098_vm2, %v2062_v6, %v2134_v21  ;;  %v1809_v26 = vadd.f32 %v1771_v14, %v1595_v43 }
 0x332   : > { %2206 = vst [vmem:[%s3334_s21 + $0x110] sm:$0xff] %v2170_v9 }
 0x333   : > { %v2023_v41 = vadd.f32 %v1985_v11, %v1809_v26 }
 0x335   : > { %v2063_v31 = vadd.f32 %v3479_v1, %v2023_v41 }
 0x337   : > { %vm2099_vm3 = vcmp.ge.f32.partialorder %v2063_v31, 0.0  ;;  %v2135_v34 = vmul.f32 0.01, %v2063_v31 }
 0x339   : > { %v2171_v27 = vsel %vm2099_vm3, %v2063_v31, %v2135_v34 }
 0x33a   : > { %2207 = vst [vmem:[%s3334_s21 + $0x118] sm:$0xff] %v2171_v27 }
 0x33b PF: > { %s13_s12 = sadd.s32 1, %s2466_s12  }
 0x33c   : > { %p10_p4 = scmp.ge.s32.totalorder %s13_s12, 4  }
 0x33e   :  { %12 = sbr.rel (!%p10_p4) target bundleno = 1 (0x1), region = 70 }

// kernel: resblockcc_forward.10
= control target key start
LH: loop header
LB: loop body
LE: loop exit
PB: predicated region body
PF: predicated region fallthrough
CT: control target
= control target key end

     0   :  { %s748_s15 = smov 0   ;;  %s964_s0 = inlined_call_operand.vmem [shape: f32[2,256,128], index: 0, kind: input, shape index: {}]   ;;  %s965_s1 = inlined_call_operand.vmem [shape: f32[1,128,128], index: 1, kind: input, shape index: {}]   ;;  %s966_s2 = inlined_call_operand.vmem [shape: f32[1,128], index: 2, kind: input, shape index: {}]   ;;  %s967_s3 = inlined_call_operand.vmem [shape: f32[2,256,128], index: 3, kind: input, shape index: {}]   ;;  %s968_s4 = inlined_call_operand.vmem [shape: f32[2,256,128], index: 4, kind: output, shape index: {}]  }
   0x1 LB: > { %s642_s16 = sadd.s32 4294967295, %s721_s15   ;;  %p646_p0 = scmp.ge.s32.totalorder %s721_s15, 1  ;;  %s721_s15 = sphi %s748_s15, %s14_s15  }
   0x2   : > { %p172_p1 = scmp.lt.s32.totalorder %s721_s15, 3 }
   0x4   : > { %p173_p2 = pnand %p646_p0, %p172_p1 }
   0x5   : > { %p203_p3 = scmp.lt.s32.totalorder (!%p173_p2), %s642_s16, 1 }
   0x6   : > { %176 = sbr.rel (%p173_p2) target bundleno = 240 (0xf0), region = 36 }
   0xb   : > { %v265_v0 = vld [vmem:[%s965_s1 + $0x78] sm:$0xff]  ;;  %v264_v1 = vld [vmem:[%s965_s1 + $0x70] sm:$0xff]  ;;  %v263_v2 = vld [vmem:[%s965_s1 + $0x68] sm:$0xff]  ;;  %s970_s16 = smov (!%p203_p3, %s642_s16), 1 }
   0xc   : > { %659 = vmatpush.msra.mxu2 %v265_v0  ;;  %660 = vmatpush.msra.mxu3 %v265_v0  ;;  %v262_v3 = vld [vmem:[%s965_s1 + $0x60] sm:$0xff]  ;;  %v261_v4 = vld [vmem:[%s965_s1 + $0x58] sm:$0xff]  ;;  %v260_v5 = vld [vmem:[%s965_s1 + $0x50] sm:$0xff]  ;;  %s799_s19 = sshll.u32 %s970_s16, 8 }
   0xd   : > { %270 = vmatpush.msra.mxu0 %v265_v0  ;;  %658 = vmatpush.msra.mxu1 %v265_v0  ;;  %v259_v6 = vld [vmem:[%s965_s1 + $0x48] sm:$0xff]  ;;  %v258_v7 = vld [vmem:[%s965_s1 + $0x40] sm:$0xff]  ;;  %v257_v8 = vld [vmem:[%s965_s1 + $0x38] sm:$0xff]  ;;  %s811_s16 = scalar_lea.vmem %s964_s0, %s799_s19  ;;  %s852_s30 = scalar_lea.vmem %s967_s3, %s799_s19 }
   0xe   : > { %662 = vmatpush.msra.mxu2 %v264_v1  ;;  %663 = vmatpush.msra.mxu3 %v264_v1  ;;  %v256_v9 = vld [vmem:[%s965_s1 + $0x30] sm:$0xff]  ;;  %v255_v10 = vld [vmem:[%s965_s1 + $0x28] sm:$0xff]  ;;  %v254_v11 = vld [vmem:[%s965_s1 + $0x20] sm:$0xff]  ;;  %s869_s9 = scalar_lea.vmem %s968_s4, %s799_s19 }
   0xf   : > { %271 = vmatpush.msra.mxu0 %v264_v1  ;;  %661 = vmatpush.msra.mxu1 %v264_v1  ;;  %v253_v12 = vld [vmem:[%s965_s1 + $0x18] sm:$0xff]  ;;  %v252_v13 = vld [vmem:[%s965_s1 + $0x10] sm:$0xff]  ;;  %v251_v14 = vld [vmem:[%s965_s1 + $0x8] sm:$0xff] }
  0x10   : > { %665 = vmatpush.msra.mxu2 %v263_v2  ;;  %666 = vmatpush.msra.mxu3 %v263_v2  ;;  %v250_v15 = vld [vmem:[%s965_s1] sm:$0xff]  ;;  %v235_v20 = vld [vmem:[%s811_s16 + $0x88] sm:$0xff]  ;;  %v236_v24 = vld [vmem:[%s811_s16 + $0x90] sm:$0xff] }
  0x11   : > { %272 = vmatpush.msra.mxu0 %v263_v2  ;;  %664 = vmatpush.msra.mxu1 %v263_v2  ;;  %v234_v16 = vld [vmem:[%s811_s16 + $0x80] sm:$0xff]  ;;  %v243_v21 = vld [vmem:[%s811_s16 + $0xc8] sm:$0xff]  ;;  %v244_v25 = vld [vmem:[%s811_s16 + $0xd0] sm:$0xff] }
  0x12   : > { %668 = vmatpush.msra.mxu2 %v262_v3  ;;  %669 = vmatpush.msra.mxu3 %v262_v3  ;;  %v242_v17 = vld [vmem:[%s811_s16 + $0xc0] sm:$0xff]  ;;  %v219_v22 = vld [vmem:[%s811_s16 + $0x8] sm:$0xff]  ;;  %v220_v26 = vld [vmem:[%s811_s16 + $0x10] sm:$0xff] }
  0x13   : > { %273 = vmatpush.msra.mxu0 %v262_v3  ;;  %667 = vmatpush.msra.mxu1 %v262_v3  ;;  %v218_v18 = vld [vmem:[%s811_s16] sm:$0xff]  ;;  %v227_v23 = vld [vmem:[%s811_s16 + $0x48] sm:$0xff]  ;;  %v228_v27 = vld [vmem:[%s811_s16 + $0x50] sm:$0xff] }
  0x14   : > { %671 = vmatpush.msra.mxu2 %v261_v4  ;;  %672 = vmatpush.msra.mxu3 %v261_v4  ;;  %v226_v19 = vld [vmem:[%s811_s16 + $0x40] sm:$0xff]  ;;  %v237_v28 = vld [vmem:[%s811_s16 + $0x98] sm:$0xff]  ;;  %v239_v36 = vld [vmem:[%s811_s16 + $0xa8] sm:$0xff] }
  0x15   : > { %274 = vmatpush.msra.mxu0 %v261_v4  ;;  %670 = vmatpush.msra.mxu1 %v261_v4  ;;  %v245_v29 = vld [vmem:[%s811_s16 + $0xd8] sm:$0xff]  ;;  %v238_v32 = vld [vmem:[%s811_s16 + $0xa0] sm:$0xff]  ;;  %v247_v37 = vld [vmem:[%s811_s16 + $0xe8] sm:$0xff] }
  0x16   : > { %674 = vmatpush.msra.mxu2 %v260_v5  ;;  %675 = vmatpush.msra.mxu3 %v260_v5  ;;  %v221_v30 = vld [vmem:[%s811_s16 + $0x18] sm:$0xff]  ;;  %v246_v33 = vld [vmem:[%s811_s16 + $0xe0] sm:$0xff]  ;;  %v223_v38 = vld [vmem:[%s811_s16 + $0x28] sm:$0xff] }
  0x17   : > { %275 = vmatpush.msra.mxu0 %v260_v5  ;;  %673 = vmatpush.msra.mxu1 %v260_v5  ;;  %v229_v31 = vld [vmem:[%s811_s16 + $0x58] sm:$0xff]  ;;  %v222_v34 = vld [vmem:[%s811_s16 + $0x20] sm:$0xff]  ;;  %v231_v39 = vld [vmem:[%s811_s16 + $0x68] sm:$0xff] }
  0x18   : > { %677 = vmatpush.msra.mxu2 %v259_v6  ;;  %678 = vmatpush.msra.mxu3 %v259_v6  ;;  %v230_v35 = vld [vmem:[%s811_s16 + $0x60] sm:$0xff]  ;;  %v240_v40 = vld [vmem:[%s811_s16 + $0xb0] sm:$0xff]  ;;  %v241_v44 = vld [vmem:[%s811_s16 + $0xb8] sm:$0xff] }
  0x19   : > { %276 = vmatpush.msra.mxu0 %v259_v6  ;;  %676 = vmatpush.msra.mxu1 %v259_v6  ;;  %v248_v41 = vld [vmem:[%s811_s16 + $0xf0] sm:$0xff]  ;;  %v249_v45 = vld [vmem:[%s811_s16 + $0xf8] sm:$0xff]  ;;  %v857_v48 = vld [vmem:[%s966_s2] ss:$0 sm:$0xff] }
  0x1a   : > { %680 = vmatpush.msra.mxu2 %v258_v7  ;;  %681 = vmatpush.msra.mxu3 %v258_v7  ;;  %v224_v42 = vld [vmem:[%s811_s16 + $0x30] sm:$0xff]  ;;  %v225_v46 = vld [vmem:[%s811_s16 + $0x38] sm:$0xff]  ;;  %v383_v50 = vld [vmem:[%s852_s30] sm:$0xff] }
  0x1b   : > { %277 = vmatpush.msra.mxu0 %v258_v7  ;;  %679 = vmatpush.msra.mxu1 %v258_v7  ;;  %v232_v43 = vld [vmem:[%s811_s16 + $0x70] sm:$0xff]  ;;  %v233_v47 = vld [vmem:[%s811_s16 + $0x78] sm:$0xff]  ;;  %v391_v52 = vld [vmem:[%s852_s30 + $0x40] sm:$0xff] }
  0x1c   : > { %683 = vmatpush.msra.mxu2 %v257_v8  ;;  %684 = vmatpush.msra.mxu3 %v257_v8  ;;  %v399_v58 = vld [vmem:[%s852_s30 + $0x80] sm:$0xff]  ;;  %v384_v6 = vld [vmem:[%s852_s30 + $0x8] sm:$0xff] }
  0x1d   : > { %278 = vmatpush.msra.mxu0 %v257_v8  ;;  %682 = vmatpush.msra.mxu1 %v257_v8  ;;  %v407_v60 = vld [vmem:[%s852_s30 + $0xc0] sm:$0xff]  ;;  %v392_v8 = vld [vmem:[%s852_s30 + $0x48] sm:$0xff] }
  0x1e   : > { %686 = vmatpush.msra.mxu2 %v256_v9  ;;  %687 = vmatpush.msra.mxu3 %v256_v9 }
  0x1f   : > { %279 = vmatpush.msra.mxu0 %v256_v9  ;;  %685 = vmatpush.msra.mxu1 %v256_v9 }
  0x20   : > { %689 = vmatpush.msra.mxu2 %v255_v10  ;;  %690 = vmatpush.msra.mxu3 %v255_v10 }
  0x21   : > { %280 = vmatpush.msra.mxu0 %v255_v10  ;;  %688 = vmatpush.msra.mxu1 %v255_v10 }
  0x22   : > { %692 = vmatpush.msra.mxu2 %v254_v11  ;;  %693 = vmatpush.msra.mxu3 %v254_v11 }
  0x23   : > { %281 = vmatpush.msra.mxu0 %v254_v11  ;;  %691 = vmatpush.msra.mxu1 %v254_v11 }
  0x24   : > { %695 = vmatpush.msra.mxu2 %v253_v12  ;;  %696 = vmatpush.msra.mxu3 %v253_v12 }
  0x25   : > { %282 = vmatpush.msra.mxu0 %v253_v12  ;;  %694 = vmatpush.msra.mxu1 %v253_v12 }
  0x26   : > { %698 = vmatpush.msra.mxu2 %v252_v13  ;;  %699 = vmatpush.msra.mxu3 %v252_v13 }
  0x27   : > { %283 = vmatpush.msra.mxu0 %v252_v13  ;;  %697 = vmatpush.msra.mxu1 %v252_v13 }
  0x28   : > { %701 = vmatpush.msra.mxu2 %v251_v14  ;;  %702 = vmatpush.msra.mxu3 %v251_v14 }
  0x29   : > { %284 = vmatpush.msra.mxu0 %v251_v14  ;;  %700 = vmatpush.msra.mxu1 %v251_v14 }
  0x2a   : > { %704 = vmatpush.msra.mxu2 %v250_v15  ;;  %705 = vmatpush.msra.mxu3 %v250_v15 }
  0x2b   : > { %334 = vmatmul.f32.vlgmr.msra.gmra.mxu2 %v234_v16  ;;  %358 = vmatmul.f32.vlgmr.msra.gmra.mxu3 %v242_v17 }
  0x2c   : > { %285 = vmatpush.msra.mxu0 %v250_v15  ;;  %703 = vmatpush.msra.mxu1 %v250_v15 }
  0x2d   : > { %286 = vmatmul.f32.vlgmr.msra.gmra.mxu0 %v218_v18  ;;  %310 = vmatmul.f32.vlgmr.msra.gmra.mxu1 %v226_v19  ;;  %v400_v18 = vld [vmem:[%s852_s30 + $0x88] sm:$0xff] }
  0x33   : > { %337 = vmatmul.f32.gmra.mxu2 %v235_v20  ;;  %361 = vmatmul.f32.gmra.mxu3 %v243_v21 }
  0x35   : > { %289 = vmatmul.f32.gmra.mxu0 %v219_v22  ;;  %313 = vmatmul.f32.gmra.mxu1 %v227_v23  ;;  %v408_v22 = vld [vmem:[%s852_s30 + $0xc8] sm:$0xff] }
  0x3b   : > { %340 = vmatmul.f32.gmra.mxu2 %v236_v24  ;;  %364 = vmatmul.f32.gmra.mxu3 %v244_v25 }
  0x3d   : > { %292 = vmatmul.f32.gmra.mxu0 %v220_v26  ;;  %316 = vmatmul.f32.gmra.mxu1 %v228_v27 }
  0x43   : > { %343 = vmatmul.f32.gmra.mxu2 %v237_v28  ;;  %367 = vmatmul.f32.gmra.mxu3 %v245_v29 }
  0x45   : > { %295 = vmatmul.f32.gmra.mxu0 %v221_v30  ;;  %319 = vmatmul.f32.gmra.mxu1 %v229_v31  ;;  %v385_v30 = vld [vmem:[%s852_s30 + $0x10] sm:$0xff] }
  0x4b   : > { %346 = vmatmul.f32.gmra.mxu2 %v238_v32  ;;  %370 = vmatmul.f32.gmra.mxu3 %v246_v33  ;;  %v393_v32 = vld [vmem:[%s852_s30 + $0x50] sm:$0xff] }
  0x4d   : > { %298 = vmatmul.f32.gmra.mxu0 %v222_v34  ;;  %322 = vmatmul.f32.gmra.mxu1 %v230_v35 }
  0x53   : > { %349 = vmatmul.f32.gmra.mxu2 %v239_v36  ;;  %373 = vmatmul.f32.gmra.mxu3 %v247_v37 }
  0x55   : > { %301 = vmatmul.f32.gmra.mxu0 %v223_v38  ;;  %325 = vmatmul.f32.gmra.mxu1 %v231_v39 }
  0x5b   : > { %352 = vmatmul.f32.gmra.mxu2 %v240_v40  ;;  %376 = vmatmul.f32.gmra.mxu3 %v248_v41 }
  0x5d   : > { %304 = vmatmul.f32.gmra.mxu0 %v224_v42  ;;  %328 = vmatmul.f32.gmra.mxu1 %v232_v43  ;;  %v401_v42 = vld [vmem:[%s852_s30 + $0x90] sm:$0xff] }
  0x63   : > { %355 = vmatmul.f32.gmra.mxu2 %v241_v44  ;;  %379 = vmatmul.f32.gmra.mxu3 %v249_v45 }
  0x65   : > { %307 = vmatmul.f32.gmra.mxu0 %v225_v46  ;;  %331 = vmatmul.f32.gmra.mxu1 %v233_v47  ;;  %v409_v46 = vld [vmem:[%s852_s30 + $0xd0] sm:$0xff] }
  0xaa   : > { %v287_v49 = vpop.f32.mrf.mxu0  ;;  %v311_v51 = vpop.f32.mrf.mxu1 }
  0xab   : > { %v288_v53 = vadd.f32 %v857_v48, %v287_v49  ;;  %v312_v54 = vadd.f32 %v857_v48, %v311_v51 }
  0xad   : > { %v415_v55 = vadd.f32 %v383_v50, %v288_v53  ;;  %v423_v56 = vadd.f32 %v391_v52, %v312_v54 }
  0xae   : > { %v335_v57 = vpop.f32.mrf.mxu2  ;;  %v359_v59 = vpop.f32.mrf.mxu3 }
  0xaf   : > { %vm447_vm0 = vcmp.ge.f32.partialorder %v415_v55, 0.0  ;;  %v479_v61 = vmul.f32 0.01, %v415_v55  ;;  %vm455_vm1 = vcmp.ge.f32.partialorder %v423_v56, 0.0  ;;  %v487_v62 = vmul.f32 0.01, %v423_v56 }
  0xb0   : > { %v336_v63 = vadd.f32 %v857_v48, %v335_v57  ;;  %v360_v0 = vadd.f32 %v857_v48, %v359_v59  ;;  %v394_v57 = vld [vmem:[%s852_s30 + $0x58] sm:$0xff] }
  0xb1   : > { %v511_v1 = vsel %vm447_vm0, %v415_v55, %v479_v61  ;;  %v519_v2 = vsel %vm455_vm1, %v423_v56, %v487_v62  ;;  %v386_v55 = vld [vmem:[%s852_s30 + $0x18] sm:$0xff] }
  0xb2   : > { %543 = vst [vmem:[%s869_s9] sm:$0xff] %v511_v1  ;;  %v431_v3 = vadd.f32 %v399_v58, %v336_v63  ;;  %v439_v4 = vadd.f32 %v407_v60, %v360_v0  ;;  %v290_v5 = vpop.f32.mrf.mxu0  ;;  %v314_v7 = vpop.f32.mrf.mxu1 }
  0xb3   : > { %551 = vst [vmem:[%s869_s9 + $0x40] sm:$0xff] %v519_v2  ;;  %v291_v9 = vadd.f32 %v857_v48, %v290_v5  ;;  %v315_v10 = vadd.f32 %v857_v48, %v314_v7  ;;  %v410_v7 = vld [vmem:[%s852_s30 + $0xd8] sm:$0xff] }
  0xb4   : > { %vm463_vm2 = vcmp.ge.f32.partialorder %v431_v3, 0.0  ;;  %v495_v11 = vmul.f32 0.01, %v431_v3  ;;  %vm471_vm3 = vcmp.ge.f32.partialorder %v439_v4, 0.0  ;;  %v503_v12 = vmul.f32 0.01, %v439_v4 }
  0xb5   : > { %v416_v13 = vadd.f32 %v384_v6, %v291_v9  ;;  %v424_v14 = vadd.f32 %v392_v8, %v315_v10 }
  0xb6   : > { %v527_v15 = vsel %vm463_vm2, %v431_v3, %v495_v11  ;;  %v535_v16 = vsel %vm471_vm3, %v439_v4, %v503_v12  ;;  %v338_v17 = vpop.f32.mrf.mxu2  ;;  %v362_v19 = vpop.f32.mrf.mxu3  ;;  %v402_v3 = vld [vmem:[%s852_s30 + $0x98] sm:$0xff] }
  0xb7   : > { %559 = vst [vmem:[%s869_s9 + $0x80] sm:$0xff] %v527_v15  ;;  %vm448_vm4 = vcmp.ge.f32.partialorder %v416_v13, 0.0  ;;  %v480_v20 = vmul.f32 0.01, %v416_v13  ;;  %vm456_vm5 = vcmp.ge.f32.partialorder %v424_v14, 0.0  ;;  %v339_v21 = vadd.f32 %v857_v48, %v338_v17  ;;  %v387_v15 = vld [vmem:[%s852_s30 + $0x20] sm:$0xff] }
  0xb8   : > { %567 = vst [vmem:[%s869_s9 + $0xc0] sm:$0xff] %v535_v16  ;;  %v488_v23 = vmul.f32 0.01, %v424_v14  ;;  %v363_v24 = vadd.f32 %v857_v48, %v362_v19  ;;  %v395_v17 = vld [vmem:[%s852_s30 + $0x60] sm:$0xff] }
  0xb9   : > { %v512_v25 = vsel %vm448_vm4, %v416_v13, %v480_v20  ;;  %v432_v26 = vadd.f32 %v400_v18, %v339_v21 }
  0xba   : > { %544 = vst [vmem:[%s869_s9 + $0x8] sm:$0xff] %v512_v25  ;;  %v520_v27 = vsel %vm456_vm5, %v424_v14, %v488_v23  ;;  %v440_v28 = vadd.f32 %v408_v22, %v363_v24  ;;  %v293_v29 = vpop.f32.mrf.mxu0  ;;  %v317_v31 = vpop.f32.mrf.mxu1 }
  0xbb   : > { %552 = vst [vmem:[%s869_s9 + $0x48] sm:$0xff] %v520_v27  ;;  %vm464_vm6 = vcmp.ge.f32.partialorder %v432_v26, 0.0  ;;  %v496_v33 = vmul.f32 0.01, %v432_v26  ;;  %v294_v34 = vadd.f32 %v857_v48, %v293_v29  ;;  %v318_v35 = vadd.f32 %v857_v48, %v317_v31  ;;  %v403_v27 = vld [vmem:[%s852_s30 + $0xa0] sm:$0xff] }
  0xbc   : > { %vm472_vm7 = vcmp.ge.f32.partialorder %v440_v28, 0.0  ;;  %v504_v36 = vmul.f32 0.01, %v440_v28  ;;  %v411_v31 = vld [vmem:[%s852_s30 + $0xe0] sm:$0xff] }
  0xbd   : > { %v528_v37 = vsel %vm464_vm6, %v432_v26, %v496_v33  ;;  %v417_v38 = vadd.f32 %v385_v30, %v294_v34  ;;  %v425_v39 = vadd.f32 %v393_v32, %v318_v35 }
  0xbe   : > { %560 = vst [vmem:[%s869_s9 + $0x88] sm:$0xff] %v528_v37  ;;  %v536_v40 = vsel %vm472_vm7, %v440_v28, %v504_v36  ;;  %v341_v41 = vpop.f32.mrf.mxu2  ;;  %v365_v43 = vpop.f32.mrf.mxu3 }
  0xbf   : > { %568 = vst [vmem:[%s869_s9 + $0xc8] sm:$0xff] %v536_v40  ;;  %vm449_vm8 = vcmp.ge.f32.partialorder %v417_v38, 0.0  ;;  %v481_v44 = vmul.f32 0.01, %v417_v38  ;;  %vm457_vm9 = vcmp.ge.f32.partialorder %v425_v39, 0.0  ;;  %v342_v45 = vadd.f32 %v857_v48, %v341_v41  ;;  %v396_v41 = vld [vmem:[%s852_s30 + $0x68] sm:$0xff] }
  0xc0   : > { %v489_v47 = vmul.f32 0.01, %v425_v39  ;;  %v366_v49 = vadd.f32 %v857_v48, %v365_v43 }
  0xc1   : > { %v513_v50 = vsel %vm449_vm8, %v417_v38, %v481_v44  ;;  %v433_v51 = vadd.f32 %v401_v42, %v342_v45 }
  0xc2   : > { %545 = vst [vmem:[%s869_s9 + $0x10] sm:$0xff] %v513_v50  ;;  %v521_v52 = vsel %vm457_vm9, %v425_v39, %v489_v47  ;;  %v441_v53 = vadd.f32 %v409_v46, %v366_v49  ;;  %v296_v54 = vpop.f32.mrf.mxu0  ;;  %v320_v56 = vpop.f32.mrf.mxu1  ;;  %v388_v39 = vld [vmem:[%s852_s30 + $0x28] sm:$0xff] }
  0xc3   : > { %553 = vst [vmem:[%s869_s9 + $0x50] sm:$0xff] %v521_v52  ;;  %vm465_vm10 = vcmp.ge.f32.partialorder %v433_v51, 0.0  ;;  %v497_v58 = vmul.f32 0.01, %v433_v51  ;;  %v297_v59 = vadd.f32 %v857_v48, %v296_v54  ;;  %v321_v60 = vadd.f32 %v857_v48, %v320_v56  ;;  %v404_v52 = vld [vmem:[%s852_s30 + $0xa8] sm:$0xff] }
  0xc4   : > { %vm473_vm11 = vcmp.ge.f32.partialorder %v441_v53, 0.0  ;;  %v505_v61 = vmul.f32 0.01, %v441_v53  ;;  %v412_v56 = vld [vmem:[%s852_s30 + $0xe8] sm:$0xff] }
  0xc5   : > { %v529_v62 = vsel %vm465_vm10, %v433_v51, %v497_v58  ;;  %v418_v63 = vadd.f32 %v386_v55, %v297_v59  ;;  %v426_v0 = vadd.f32 %v394_v57, %v321_v60 }
  0xc6   : > { %561 = vst [vmem:[%s869_s9 + $0x90] sm:$0xff] %v529_v62  ;;  %v537_v1 = vsel %vm473_vm11, %v441_v53, %v505_v61  ;;  %v344_v2 = vpop.f32.mrf.mxu2  ;;  %v368_v4 = vpop.f32.mrf.mxu3 }
  0xc7   : > { %569 = vst [vmem:[%s869_s9 + $0xd0] sm:$0xff] %v537_v1  ;;  %vm450_vm12 = vcmp.ge.f32.partialorder %v418_v63, 0.0  ;;  %v482_v5 = vmul.f32 0.01, %v418_v63  ;;  %vm458_vm13 = vcmp.ge.f32.partialorder %v426_v0, 0.0  ;;  %v345_v6 = vadd.f32 %v857_v48, %v344_v2  ;;  %v397_v2 = vld [vmem:[%s852_s30 + $0x70] sm:$0xff] }
  0xc8   : > { %v490_v8 = vmul.f32 0.01, %v426_v0  ;;  %v369_v9 = vadd.f32 %v857_v48, %v368_v4 }
  0xc9   : > { %v514_v10 = vsel %vm450_vm12, %v418_v63, %v482_v5  ;;  %v434_v11 = vadd.f32 %v402_v3, %v345_v6 }
  0xca   : > { %546 = vst [vmem:[%s869_s9 + $0x18] sm:$0xff] %v514_v10  ;;  %v522_v12 = vsel %vm458_vm13, %v426_v0, %v490_v8  ;;  %v442_v13 = vadd.f32 %v410_v7, %v369_v9  ;;  %v299_v14 = vpop.f32.mrf.mxu0  ;;  %v323_v16 = vpop.f32.mrf.mxu1  ;;  %v389_v0 = vld [vmem:[%s852_s30 + $0x30] sm:$0xff] }
  0xcb   : > { %554 = vst [vmem:[%s869_s9 + $0x58] sm:$0xff] %v522_v12  ;;  %vm466_vm14 = vcmp.ge.f32.partialorder %v434_v11, 0.0  ;;  %v498_v18 = vmul.f32 0.01, %v434_v11  ;;  %v300_v19 = vadd.f32 %v857_v48, %v299_v14  ;;  %v324_v20 = vadd.f32 %v857_v48, %v323_v16  ;;  %v405_v12 = vld [vmem:[%s852_s30 + $0xb0] sm:$0xff] }
  0xcc   : > { %vm474_vm15 = vcmp.ge.f32.partialorder %v442_v13, 0.0  ;;  %v506_v21 = vmul.f32 0.01, %v442_v13  ;;  %v413_v16 = vld [vmem:[%s852_s30 + $0xf0] sm:$0xff] }
  0xcd   : > { %v530_v22 = vsel %vm466_vm14, %v434_v11, %v498_v18  ;;  %v419_v23 = vadd.f32 %v387_v15, %v300_v19  ;;  %v427_v24 = vadd.f32 %v395_v17, %v324_v20 }
  0xce   : > { %562 = vst [vmem:[%s869_s9 + $0x98] sm:$0xff] %v530_v22  ;;  %v538_v25 = vsel %vm474_vm15, %v442_v13, %v506_v21  ;;  %v347_v26 = vpop.f32.mrf.mxu2  ;;  %v371_v28 = vpop.f32.mrf.mxu3 }
  0xcf   : > { %570 = vst [vmem:[%s869_s9 + $0xd8] sm:$0xff] %v538_v25  ;;  %vm451_vm0 = vcmp.ge.f32.partialorder %v419_v23, 0.0  ;;  %v483_v29 = vmul.f32 0.01, %v419_v23  ;;  %vm459_vm1 = vcmp.ge.f32.partialorder %v427_v24, 0.0  ;;  %v348_v30 = vadd.f32 %v857_v48, %v347_v26  ;;  %v398_v26 = vld [vmem:[%s852_s30 + $0x78] sm:$0xff] }
  0xd0   : > { %v491_v32 = vmul.f32 0.01, %v427_v24  ;;  %v372_v33 = vadd.f32 %v857_v48, %v371_v28 }
  0xd1   : > { %v515_v34 = vsel %vm451_vm0, %v419_v23, %v483_v29  ;;  %v435_v35 = vadd.f32 %v403_v27, %v348_v30 }
  0xd2   : > { %547 = vst [vmem:[%s869_s9 + $0x20] sm:$0xff] %v515_v34  ;;  %v523_v36 = vsel %vm459_vm1, %v427_v24, %v491_v32  ;;  %v443_v37 = vadd.f32 %v411_v31, %v372_v33  ;;  %v302_v38 = vpop.f32.mrf.mxu0  ;;  %v326_v40 = vpop.f32.mrf.mxu1  ;;  %v390_v24 = vld [vmem:[%s852_s30 + $0x38] sm:$0xff] }
  0xd3   : > { %555 = vst [vmem:[%s869_s9 + $0x60] sm:$0xff] %v523_v36  ;;  %vm467_vm2 = vcmp.ge.f32.partialorder %v435_v35, 0.0  ;;  %v499_v42 = vmul.f32 0.01, %v435_v35  ;;  %v303_v43 = vadd.f32 %v857_v48, %v302_v38  ;;  %v327_v44 = vadd.f32 %v857_v48, %v326_v40  ;;  %v406_v36 = vld [vmem:[%s852_s30 + $0xb8] sm:$0xff] }
  0xd4   : > { %vm475_vm3 = vcmp.ge.f32.partialorder %v443_v37, 0.0  ;;  %v507_v45 = vmul.f32 0.01, %v443_v37  ;;  %v414_v40 = vld [vmem:[%s852_s30 + $0xf8] sm:$0xff] }
  0xd5   : > { %v531_v46 = vsel %vm467_vm2, %v435_v35, %v499_v42  ;;  %v420_v47 = vadd.f32 %v388_v39, %v303_v43  ;;  %v428_v49 = vadd.f32 %v396_v41, %v327_v44 }
  0xd6   : > { %563 = vst [vmem:[%s869_s9 + $0xa0] sm:$0xff] %v531_v46  ;;  %v539_v50 = vsel %vm475_vm3, %v443_v37, %v507_v45  ;;  %v350_v51 = vpop.f32.mrf.mxu2  ;;  %v374_v53 = vpop.f32.mrf.mxu3 }
  0xd7   : > { %571 = vst [vmem:[%s869_s9 + $0xe0] sm:$0xff] %v539_v50  ;;  %vm452_vm4 = vcmp.ge.f32.partialorder %v420_v47, 0.0  ;;  %v484_v54 = vmul.f32 0.01, %v420_v47  ;;  %vm460_vm5 = vcmp.ge.f32.partialorder %v428_v49, 0.0  ;;  %v351_v55 = vadd.f32 %v857_v48, %v350_v51 }
  0xd8   : > { %v492_v57 = vmul.f32 0.01, %v428_v49  ;;  %v375_v58 = vadd.f32 %v857_v48, %v374_v53 }
  0xd9   : > { %v516_v59 = vsel %vm452_vm4, %v420_v47, %v484_v54  ;;  %v436_v60 = vadd.f32 %v404_v52, %v351_v55 }
  0xda   : > { %548 = vst [vmem:[%s869_s9 + $0x28] sm:$0xff] %v516_v59  ;;  %v524_v61 = vsel %vm460_vm5, %v428_v49, %v492_v57  ;;  %v444_v62 = vadd.f32 %v412_v56, %v375_v58  ;;  %v305_v63 = vpop.f32.mrf.mxu0  ;;  %v329_v1 = vpop.f32.mrf.mxu1 }
  0xdb   : > { %556 = vst [vmem:[%s869_s9 + $0x68] sm:$0xff] %v524_v61  ;;  %vm468_vm6 = vcmp.ge.f32.partialorder %v436_v60, 0.0  ;;  %v500_v3 = vmul.f32 0.01, %v436_v60  ;;  %v306_v4 = vadd.f32 %v857_v48, %v305_v63  ;;  %v330_v5 = vadd.f32 %v857_v48, %v329_v1 }
  0xdc   : > { %vm476_vm7 = vcmp.ge.f32.partialorder %v444_v62, 0.0  ;;  %v508_v6 = vmul.f32 0.01, %v444_v62 }
  0xdd   : > { %v532_v7 = vsel %vm468_vm6, %v436_v60, %v500_v3  ;;  %v421_v8 = vadd.f32 %v389_v0, %v306_v4  ;;  %v429_v9 = vadd.f32 %v397_v2, %v330_v5 }
  0xde   : > { %564 = vst [vmem:[%s869_s9 + $0xa8] sm:$0xff] %v532_v7  ;;  %v540_v10 = vsel %vm476_vm7, %v444_v62, %v508_v6  ;;  %v353_v11 = vpop.f32.mrf.mxu2  ;;  %v377_v13 = vpop.f32.mrf.mxu3 }
  0xdf   : > { %572 = vst [vmem:[%s869_s9 + $0xe8] sm:$0xff] %v540_v10  ;;  %vm453_vm8 = vcmp.ge.f32.partialorder %v421_v8, 0.0  ;;  %v485_v14 = vmul.f32 0.01, %v421_v8  ;;  %vm461_vm9 = vcmp.ge.f32.partialorder %v429_v9, 0.0  ;;  %v354_v15 = vadd.f32 %v857_v48, %v353_v11 }
  0xe0   : > { %v493_v17 = vmul.f32 0.01, %v429_v9  ;;  %v378_v18 = vadd.f32 %v857_v48, %v377_v13 }
  0xe1   : > { %v517_v19 = vsel %vm453_vm8, %v421_v8, %v485_v14  ;;  %v437_v20 = vadd.f32 %v405_v12, %v354_v15 }
  0xe2   : > { %549 = vst [vmem:[%s869_s9 + $0x30] sm:$0xff] %v517_v19  ;;  %v525_v21 = vsel %vm461_vm9, %v429_v9, %v493_v17  ;;  %v445_v22 = vadd.f32 %v413_v16, %v378_v18  ;;  %v308_v23 = vpop.f32.mrf.mxu0  ;;  %v332_v25 = vpop.f32.mrf.mxu1 }
  0xe3   : > { %557 = vst [vmem:[%s869_s9 + $0x70] sm:$0xff] %v525_v21  ;;  %vm469_vm10 = vcmp.ge.f32.partialorder %v437_v20, 0.0  ;;  %v501_v27 = vmul.f32 0.01, %v437_v20  ;;  %v309_v28 = vadd.f32 %v857_v48, %v308_v23  ;;  %v333_v29 = vadd.f32 %v857_v48, %v332_v25 }
  0xe4   : > { %vm477_vm11 = vcmp.ge.f32.partialorder %v445_v22, 0.0  ;;  %v509_v30 = vmul.f32 0.01, %v445_v22 }
  0xe5   : > { %v533_v31 = vsel %vm469_vm10, %v437_v20, %v501_v27  ;;  %v422_v32 = vadd.f32 %v390_v24, %v309_v28  ;;  %v430_v33 = vadd.f32 %v398_v26, %v333_v29 }
  0xe6   : > { %565 = vst [vmem:[%s869_s9 + $0xb0] sm:$0xff] %v533_v31  ;;  %v541_v34 = vsel %vm477_vm11, %v445_v22, %v509_v30  ;;  %v356_v35 = vpop.f32.mrf.mxu2  ;;  %v380_v37 = vpop.f32.mrf.mxu3 }
  0xe7   : > { %573 = vst [vmem:[%s869_s9 + $0xf0] sm:$0xff] %v541_v34  ;;  %vm454_vm12 = vcmp.ge.f32.partialorder %v422_v32, 0.0  ;;  %v486_v38 = vmul.f32 0.01, %v422_v32  ;;  %vm462_vm13 = vcmp.ge.f32.partialorder %v430_v33, 0.0  ;;  %v357_v39 = vadd.f32 %v857_v48, %v356_v35 }
  0xe8   : > { %v494_v41 = vmul.f32 0.01, %v430_v33  ;;  %v381_v42 = vadd.f32 %v857_v48, %v380_v37 }
  0xe9   : > { %v518_v43 = vsel %vm454_vm12, %v422_v32, %v486_v38  ;;  %v438_v44 = vadd.f32 %v406_v36, %v357_v39 }
  0xea   : > { %550 = vst [vmem:[%s869_s9 + $0x38] sm:$0xff] %v518_v43  ;;  %v526_v45 = vsel %vm462_vm13, %v430_v33, %v494_v41  ;;  %v446_v46 = vadd.f32 %v414_v40, %v381_v42 }
  0xeb   : > { %558 = vst [vmem:[%s869_s9 + $0x78] sm:$0xff] %v526_v45  ;;  %vm470_vm14 = vcmp.ge.f32.partialorder %v438_v44, 0.0  ;;  %v502_v47 = vmul.f32 0.01, %v438_v44 }
  0xec   : > { %vm478_vm15 = vcmp.ge.f32.partialorder %v446_v46, 0.0  ;;  %v510_v49 = vmul.f32 0.01, %v446_v46 }
  0xed   : > { %v534_v50 = vsel %vm470_vm14, %v438_v44, %v502_v47 }
  0xee   : > { %566 = vst [vmem:[%s869_s9 + $0xb8] sm:$0xff] %v534_v50  ;;  %v542_v51 = vsel %vm478_vm15, %v446_v46, %v510_v49 }
  0xef   : > { %574 = vst [vmem:[%s869_s9 + $0xf8] sm:$0xff] %v542_v51 }
  0xf0 PF: > { %s14_s15 = sadd.s32 1, %s721_s15  }
  0xf1   : > { %p11_p4 = scmp.ge.s32.totalorder %s14_s15, 4  }
  0xf3   :  { %13 = sbr.rel (!%p11_p4) target bundleno = 1 (0x1), region = 69 }

</bundles_post_ra>
